<compile_context>
chip_gen: v5e
topology: v5e:2x2
jax: 0.10.0
libtpu: 0.0.40
codegen_flags: <defaults>
</compile_context>

<pallas_src>
import functools

import jax
import jax.numpy as jnp
from jax.experimental import pallas as pl
from jax.experimental.pallas import tpu as pltpu

# Tiny denominator guard (reference has none; only affects degenerate
# constant / zero-mean bands that would otherwise produce inf/NaN).
_EPS = 1e-12

# Padded, double-buffered *input* working-set budget, and the explicit scoped
# VMEM limit handed to Mosaic (safe on v5e/v6e/v7x physical VMEM).
_VMEM_INPUT_BUDGET = 16 * 1024 * 1024
_VMEM_LIMIT_BYTES = 32 * 1024 * 1024


def _moment_kernel(b_ref, p_ref,
                   gbb_ref, gbp_ref, gb_ref, gpp_ref, gp_ref,
                   *, tk, hw, need_mask):
    """Accumulate raw per-image moment sums over spatial tiles.

    b_ref: (C, TK)  band stack tile (ps or ms bands).
    p_ref: (1, TK)  reference band tile (pan or pan_l).
    Output refs (accumulated in place; block index constant over k):
      gbb: (C, C)  sum_x b_i b_j     (MXU Gram)
      gbp: (C, 1)  sum_x b_i p       (MXU)
      gb : (C, 1)  sum_x b_i         (VPU/XLU row sum)
      gpp: (1, 1)  sum_x p^2         (MXU)
      gp : (1, 1)  sum_x p           (VPU/XLU row sum)
    """
    s = pl.program_id(1)   # spatial split (v7x dual-TC axis)
    k = pl.program_id(2)   # spatial reduction axis

    @pl.when(k == 0)
    def _init():
        gbb_ref[...] = jnp.zeros_like(gbb_ref)
        gbp_ref[...] = jnp.zeros_like(gbp_ref)
        gb_ref[...] = jnp.zeros_like(gb_ref)
        gpp_ref[...] = jnp.zeros_like(gpp_ref)
        gp_ref[...] = jnp.zeros_like(gp_ref)

    def accum(b, p):
        dn = (((1,), (1,)), ((), ()))          # contract the lane axis
        hi = jax.lax.Precision.HIGHEST
        gbb_ref[...] += jax.lax.dot_general(
            b, b, dn, precision=hi, preferred_element_type=jnp.float32)
        gbp_ref[...] += jax.lax.dot_general(
            b, p, dn, precision=hi, preferred_element_type=jnp.float32)
        gpp_ref[...] += jax.lax.dot_general(
            p, p, dn, precision=hi, preferred_element_type=jnp.float32)
        gb_ref[...] += jnp.sum(b, axis=1, keepdims=True, dtype=jnp.float32)
        gp_ref[...] += jnp.sum(p, axis=1, keepdims=True, dtype=jnp.float32)

    if not need_mask:                          # static: tile divides H*W
        accum(b_ref[...], p_ref[...])
    else:
        # Only the single ragged global tile pays for masking.
        is_tail = jnp.logical_and(s == pl.num_programs(1) - 1,
                                  k == pl.num_programs(2) - 1)

        @pl.when(jnp.logical_not(is_tail))
        def _full():
            accum(b_ref[...], p_ref[...])

        @pl.when(is_tail)
        def _tail():
            g = s * pl.num_programs(2) + k     # global tile index
            lane = jax.lax.broadcasted_iota(jnp.int32, (1, tk), 1) + g * tk
            valid = lane < hw
            accum(jnp.where(valid, b_ref[...], jnp.zeros((), b_ref.dtype)),
                  jnp.where(valid, p_ref[...], jnp.zeros((), p_ref.dtype)))


def _choose_tile(hw, n_bands, itemsize):
    """Largest lane tile whose padded, double-buffered input footprint stays
    under _VMEM_INPUT_BUDGET, preferring a tile that divides hw exactly."""
    sub = max(8, 32 // itemsize)                    # sublane tile (8 f32, 16 bf16)
    rows = -(-n_bands // sub) * sub + sub           # padded band rows + padded pan rows
    per_lane = 2 * rows * itemsize                  # x2 BlockSpec double-buffering
    max_tk = max(128, (_VMEM_INPUT_BUDGET // per_lane) // 128 * 128)
    if hw <= max_tk:
        return hw                                   # single block == full dim (legal)
    for tk in range(max_tk, 127, -128):
        if hw % tk == 0:
            return tk
    return max_tk                                   # ragged tail masked in-kernel


def _moment_stats(bands, ref, *, tile_hint=None):
    """bands: (N, C, H, W), ref: (N, 1, H, W) -> per-image raw moment sums."""
    N, C, H, W = bands.shape
    hw = H * W
    b = bands.reshape(N, C, hw)          # free view, no HBM copy
    p = ref.reshape(N, 1, hw)

    itemsize = jnp.dtype(bands.dtype).itemsize
    tk = _choose_tile(hw, C, itemsize)
    if tile_hint is not None and tile_hint < hw:
        tk = min(tk, max(128, (tile_hint // 128) * 128))

    nt = pl.cdiv(hw, tk)
    # Second parallel axis over a spatial split so both v7x TensorCores get
    # work when N == 1 (partial sums are plain sums, folded in the wrapper).
    split = 2 if (N == 1 and nt >= 2 and nt % 2 == 0) else 1
    gk = nt // split
    need_mask = (nt * tk) != hw

    kern = functools.partial(_moment_kernel, tk=tk, hw=hw, need_mask=need_mask)

    out_shapes = (
        jax.ShapeDtypeStruct((N, split, C, C), jnp.float32),
        jax.ShapeDtypeStruct((N, split, C, 1), jnp.float32),
        jax.ShapeDtypeStruct((N, split, C, 1), jnp.float32),
        jax.ShapeDtypeStruct((N, split, 1, 1), jnp.float32),
        jax.ShapeDtypeStruct((N, split, 1, 1), jnp.float32),
    )
    out_specs = (
        pl.BlockSpec((None, None, C, C), lambda n, s, k: (n, s, 0, 0)),
        pl.BlockSpec((None, None, C, 1), lambda n, s, k: (n, s, 0, 0)),
        pl.BlockSpec((None, None, C, 1), lambda n, s, k: (n, s, 0, 0)),
        pl.BlockSpec((None, None, 1, 1), lambda n, s, k: (n, s, 0, 0)),
        pl.BlockSpec((None, None, 1, 1), lambda n, s, k: (n, s, 0, 0)),
    )

    stats = pl.pallas_call(
        kern,
        out_shape=out_shapes,
        grid=(N, split, gk),
        in_specs=[
            pl.BlockSpec((None, C, tk), lambda n, s, k: (n, 0, s * gk + k)),
            pl.BlockSpec((None, 1, tk), lambda n, s, k: (n, 0, s * gk + k)),
        ],
        out_specs=out_specs,
        compiler_params=pltpu.CompilerParams(
            dimension_semantics=("parallel", "parallel", "arbitrary"),
            vmem_limit_bytes=_VMEM_LIMIT_BYTES),
    )(b, p)

    # Fold the spatial-split partial sums (exact).
    return tuple(x.sum(axis=1) for x in stats)


def _q_matrices(stats, hw):
    """Raw moment sums -> per-image UIQI matrices.

    Returns:
      q_bb: (N, C, C)  UIQI(band_i, band_j)
      q_bp: (N, C)     UIQI(band_i, reference)
    """
    gbb, gbp, gb, gpp, gp = stats
    inv = 1.0 / hw
    e_bb = gbb * inv                       # (N, C, C) E[b_i b_j]
    e_bp = gbp[..., 0] * inv               # (N, C)    E[b_i p]
    e_b = gb[..., 0] * inv                 # (N, C)    E[b_i]
    e_pp = gpp[..., 0, 0] * inv            # (N,)      E[p^2]
    e_p = gp[..., 0, 0] * inv              # (N,)      E[p]

    # Variance via E[x^2] - E[x]^2 (fine in f32 for [0,1]-normalized images;
    # for raw uint16 DN inputs consider subtracting a per-image offset first).
    e_b2 = jnp.diagonal(e_bb, axis1=1, axis2=2)        # (N, C) E[b_i^2]
    var_b = e_b2 - e_b * e_b                           # (N, C)
    var_p = e_pp - e_p * e_p                           # (N,)

    # band-band UIQI
    cov_bb = e_bb - e_b[:, :, None] * e_b[:, None, :]
    num_bb = 4.0 * cov_bb * e_b[:, :, None] * e_b[:, None, :]
    den_bb = (var_b[:, :, None] + var_b[:, None, :]) * (
        e_b[:, :, None] ** 2 + e_b[:, None, :] ** 2)
    q_bb = num_bb / (den_bb + _EPS)

    # band-reference UIQI
    cov_bp = e_bp - e_b * e_p[:, None]
    num_bp = 4.0 * cov_bp * e_b * e_p[:, None]
    den_bp = (var_b + var_p[:, None]) * (e_b ** 2 + e_p[:, None] ** 2)
    q_bp = num_bp / (den_bp + _EPS)

    return q_bb, q_bp


def down_sample(x, r=4):
    # TODO(synk): reference uses bicubic F.interpolate; box (average-pool) downsample used here.
    N, C, H, W = x.shape
    return x.reshape(N, C, H // r, r, W // r, r).mean(axis=(3, 5))


def qnr_loss(pan, ms, out, pan_l=None, *, tile_hint=None):
    """pan: (N,1,H,W), ms: (N,C,h,w), out (pansharpened): (N,C,H,W) -> scalar loss."""
    if pan_l is None:
        pan_l = down_sample(pan, r=pan.shape[-1] // ms.shape[-1])
    C = ms.shape[1]

    # Full-resolution stats: pansharpened bands vs pan.
    stats_full = _moment_stats(out, pan, tile_hint=tile_hint)
    # Low-resolution stats: MS bands vs downsampled pan.
    stats_low = _moment_stats(ms, pan_l, tile_hint=tile_hint)

    q_bb_f, q_bp_f = _q_matrices(stats_full, out.shape[-2] * out.shape[-1])
    q_bb_l, q_bp_l = _q_matrices(stats_low, ms.shape[-2] * ms.shape[-1])

    # Batch-mean of per-image UIQI (matches the reference Q_torch).
    q_bb_f = q_bb_f.mean(axis=0)       # (C, C)
    q_bb_l = q_bb_l.mean(axis=0)
    q_bp_f = q_bp_f.mean(axis=0)       # (C,)
    q_bp_l = q_bp_l.mean(axis=0)

    diff_bb = jnp.abs(q_bb_f - q_bb_l)
    off_diag = 1.0 - jnp.eye(C, dtype=diff_bb.dtype)
    pair_count = C * (C - 1) if C > 1 else 1           # guard single-band MS
    d_lambda = jnp.sum(diff_bb * off_diag) / pair_count
    d_s = jnp.sum(jnp.abs(q_bp_f - q_bp_l)) / C

    qnr = (1.0 - d_lambda) * (1.0 - d_s)
    return 1.0 - qnr


# ----------------------------- pure-JAX reference ---------------------------

def _q_ref(a, b):
    """a, b: (N, H, W) -> batch-mean UIQI (raw-moment formulation, f32)."""
    a = a.astype(jnp.float32)
    b = b.astype(jnp.float32)
    ea = a.mean(axis=(1, 2))
    eb = b.mean(axis=(1, 2))
    eaa = (a * a).mean(axis=(1, 2))
    ebb = (b * b).mean(axis=(1, 2))
    eab = (a * b).mean(axis=(1, 2))
    var_a = eaa - ea * ea
    var_b = ebb - eb * eb
    cov = eab - ea * eb
    q = 4.0 * cov * ea * eb / ((var_a + var_b) * (ea ** 2 + eb ** 2) + _EPS)
    return q.mean()


def qnr_loss_ref(pan, ms, out, pan_l=None):
    if pan_l is None:
        pan_l = down_sample(pan, r=pan.shape[-1] // ms.shape[-1])
    C = ms.shape[1]
    d_lambda = jnp.float32(0.0)
    for i in range(C):
        for j in range(C):
            if i != j:
                d_lambda += jnp.abs(_q_ref(out[:, i], out[:, j]) -
                                    _q_ref(ms[:, i], ms[:, j]))
    d_lambda = d_lambda / (C * (C - 1)) if C > 1 else jnp.float32(0.0)
    d_s = jnp.float32(0.0)
    for i in range(C):
        d_s += jnp.abs(_q_ref(out[:, i], pan[:, 0]) - _q_ref(ms[:, i], pan_l[:, 0]))
    d_s = d_s / C
    return 1.0 - (1.0 - d_lambda) * (1.0 - d_s)


if __name__ == "__main__":
    key = jax.random.PRNGKey(0)
    k1, k2, k3 = jax.random.split(key, 3)

    N, C, h, w, r = 2, 4, 16, 16, 4
    H, W = h * r, w * r

    pan = jax.random.uniform(k1, (N, 1, H, W), jnp.float32)       # full-res PAN
    ms = jax.random.uniform(k2, (N, C, h, w), jnp.float32)        # low-res MS
    out = jax.random.uniform(k3, (N, C, H, W), jnp.float32)       # pansharpened output

    # 1) Default path: single spatial tile per image, batch axis parallel.
    loss = jax.block_until_ready(jax.jit(qnr_loss)(pan, ms, out))
    loss_ref = qnr_loss_ref(pan, ms, out)
    assert loss.shape == () and bool(jnp.isfinite(loss))
    assert abs(float(loss) - float(loss_ref)) < 1e-3, (float(loss), float(loss_ref))

    # 2) N=1 with a forced small tile: exercises multi-tile accumulation, the
    #    ragged-tail mask (pl.when split) and the 2-way spatial split that
    #    feeds both v7x TensorCores.
    pan1, ms1, out1 = pan[:1], ms[:1], out[:1]
    loss1 = jax.block_until_ready(
        jax.jit(functools.partial(qnr_loss, tile_hint=768))(pan1, ms1, out1))
    loss1_ref = qnr_loss_ref(pan1, ms1, out1)
    assert loss1.shape == () and bool(jnp.isfinite(loss1))
    assert abs(float(loss1) - float(loss1_ref)) < 1e-3, (float(loss1), float(loss1_ref))

    print("KERNEL_OK")
</pallas_src>

<mosaic_0001>
module attributes {stable_mosaic.version = 11 : i64} {
  func.func @_moment_kernel(%arg0: i32, %arg1: i32, %arg2: i32, %arg3: memref<1x4x256xf32, #tpu.memory_space<vmem>>, %arg4: memref<1x1x256xf32, #tpu.memory_space<vmem>>, %arg5: memref<1x1x4x4xf32, #tpu.memory_space<vmem>>, %arg6: memref<1x1x4x1xf32, #tpu.memory_space<vmem>>, %arg7: memref<1x1x4x1xf32, #tpu.memory_space<vmem>>, %arg8: memref<1x1x1x1xf32, #tpu.memory_space<vmem>>, %arg9: memref<1x1x1x1xf32, #tpu.memory_space<vmem>>) attributes {dimension_semantics = [#tpu.dimension_semantics<parallel>, #tpu.dimension_semantics<parallel>, #tpu.dimension_semantics<arbitrary>], iteration_bounds = array<i64: 2, 1, 1>, scalar_prefetch = 0 : i64, scratch_operands = 0 : i64, tpu.core_type = #tpu.core_type<tc>, window_params = [{transform_indices = @transform_0, window_bounds = array<i64: 1, 4, 256>}, {transform_indices = @transform_1, window_bounds = array<i64: 1, 1, 256>}, {transform_indices = @transform_2, window_bounds = array<i64: 1, 1, 4, 4>}, {transform_indices = @transform_3, window_bounds = array<i64: 1, 1, 4, 1>}, {transform_indices = @transform_4, window_bounds = array<i64: 1, 1, 4, 1>}, {transform_indices = @transform_5, window_bounds = array<i64: 1, 1, 1, 1>}, {transform_indices = @transform_6, window_bounds = array<i64: 1, 1, 1, 1>}]} {
    %c0_i32 = arith.constant 0 : i32
    %0 = arith.cmpi eq, %arg2, %c0_i32 : i32
    %1 = arith.extui %0 : i1 to i32
    %c0_i32_0 = arith.constant 0 : i32
    %2 = arith.cmpi ne, %1, %c0_i32_0 : i32
    scf.if %2 {
      %cst_50 = arith.constant 0.000000e+00 : f32
      %44 = vector.broadcast %cst_50 : f32 to vector<4x4xf32>
      %c0_51 = arith.constant 0 : index
      %c0_52 = arith.constant 0 : index
      %c0_53 = arith.constant 0 : index
      %c0_54 = arith.constant 0 : index
      %45 = vector.load %arg5[%c0_51, %c0_52, %c0_53, %c0_54] : memref<1x1x4x4xf32, #tpu.memory_space<vmem>>, vector<1x1x4x4xf32>
      %46 = vector.shape_cast %45 : vector<1x1x4x4xf32> to vector<4x4xf32>
      %47 = vector.shape_cast %44 : vector<4x4xf32> to vector<1x1x4x4xf32>
      tpu.vector_store %arg5[%c0_51, %c0_52, %c0_53, %c0_54], %47 {strides = array<i32>} : memref<1x1x4x4xf32, #tpu.memory_space<vmem>>, vector<1x1x4x4xf32>,
      %cst_55 = arith.constant 0.000000e+00 : f32
      %48 = vector.broadcast %cst_55 : f32 to vector<4x1xf32>
      %c0_56 = arith.constant 0 : index
      %c0_57 = arith.constant 0 : index
      %c0_58 = arith.constant 0 : index
      %c0_59 = arith.constant 0 : index
      %49 = vector.load %arg6[%c0_56, %c0_57, %c0_58, %c0_59] : memref<1x1x4x1xf32, #tpu.memory_space<vmem>>, vector<1x1x4x1xf32>
      %50 = vector.shape_cast %49 : vector<1x1x4x1xf32> to vector<4x1xf32>
      %51 = vector.shape_cast %48 : vector<4x1xf32> to vector<1x1x4x1xf32>
      tpu.vector_store %arg6[%c0_56, %c0_57, %c0_58, %c0_59], %51 {strides = array<i32>} : memref<1x1x4x1xf32, #tpu.memory_space<vmem>>, vector<1x1x4x1xf32>,
      %cst_60 = arith.constant 0.000000e+00 : f32
      %52 = vector.broadcast %cst_60 : f32 to vector<4x1xf32>
      %c0_61 = arith.constant 0 : index
      %c0_62 = arith.constant 0 : index
      %c0_63 = arith.constant 0 : index
      %c0_64 = arith.constant 0 : index
      %53 = vector.load %arg7[%c0_61, %c0_62, %c0_63, %c0_64] : memref<1x1x4x1xf32, #tpu.memory_space<vmem>>, vector<1x1x4x1xf32>
      %54 = vector.shape_cast %53 : vector<1x1x4x1xf32> to vector<4x1xf32>
      %55 = vector.shape_cast %52 : vector<4x1xf32> to vector<1x1x4x1xf32>
      tpu.vector_store %arg7[%c0_61, %c0_62, %c0_63, %c0_64], %55 {strides = array<i32>} : memref<1x1x4x1xf32, #tpu.memory_space<vmem>>, vector<1x1x4x1xf32>,
      %cst_65 = arith.constant 0.000000e+00 : f32
      %56 = vector.broadcast %cst_65 : f32 to vector<1x1xf32>
      %c0_66 = arith.constant 0 : index
      %c0_67 = arith.constant 0 : index
      %c0_68 = arith.constant 0 : index
      %c0_69 = arith.constant 0 : index
      %57 = vector.load %arg8[%c0_66, %c0_67, %c0_68, %c0_69] : memref<1x1x1x1xf32, #tpu.memory_space<vmem>>, vector<1x1x1x1xf32>
      %58 = vector.shape_cast %57 : vector<1x1x1x1xf32> to vector<1x1xf32>
      %59 = vector.shape_cast %56 : vector<1x1xf32> to vector<1x1x1x1xf32>
      tpu.vector_store %arg8[%c0_66, %c0_67, %c0_68, %c0_69], %59 {strides = array<i32>} : memref<1x1x1x1xf32, #tpu.memory_space<vmem>>, vector<1x1x1x1xf32>,
      %cst_70 = arith.constant 0.000000e+00 : f32
      %60 = vector.broadcast %cst_70 : f32 to vector<1x1xf32>
      %c0_71 = arith.constant 0 : index
      %c0_72 = arith.constant 0 : index
      %c0_73 = arith.constant 0 : index
      %c0_74 = arith.constant 0 : index
      %61 = vector.load %arg9[%c0_71, %c0_72, %c0_73, %c0_74] : memref<1x1x1x1xf32, #tpu.memory_space<vmem>>, vector<1x1x1x1xf32>
      %62 = vector.shape_cast %61 : vector<1x1x1x1xf32> to vector<1x1xf32>
      %63 = vector.shape_cast %60 : vector<1x1xf32> to vector<1x1x1x1xf32>
      tpu.vector_store %arg9[%c0_71, %c0_72, %c0_73, %c0_74], %63 {strides = array<i32>} : memref<1x1x1x1xf32, #tpu.memory_space<vmem>>, vector<1x1x1x1xf32>,
    } else {
    }
    %c0 = arith.constant 0 : index
    %c0_1 = arith.constant 0 : index
    %c0_2 = arith.constant 0 : index
    %3 = vector.load %arg3[%c0, %c0_1, %c0_2] : memref<1x4x256xf32, #tpu.memory_space<vmem>>, vector<1x4x256xf32>
    %4 = vector.shape_cast %3 : vector<1x4x256xf32> to vector<4x256xf32>
    %c0_3 = arith.constant 0 : index
    %c0_4 = arith.constant 0 : index
    %c0_5 = arith.constant 0 : index
    %5 = vector.load %arg4[%c0_3, %c0_4, %c0_5] : memref<1x1x256xf32, #tpu.memory_space<vmem>>, vector<1x1x256xf32>
    %6 = vector.shape_cast %5 : vector<1x1x256xf32> to vector<1x256xf32>
    %c0_6 = arith.constant 0 : index
    %c0_7 = arith.constant 0 : index
    %c0_8 = arith.constant 0 : index
    %c0_9 = arith.constant 0 : index
    %7 = vector.load %arg5[%c0_6, %c0_7, %c0_8, %c0_9] : memref<1x1x4x4xf32, #tpu.memory_space<vmem>>, vector<1x1x4x4xf32>
    %8 = vector.shape_cast %7 : vector<1x1x4x4xf32> to vector<4x4xf32>
    %cst = arith.constant dense<0.000000e+00> : vector<4x4xf32>
    %9 = tpu.matmul %4, %4, %cst {dimension_numbers = #tpu.dot_dimension_numbers<[1], [1], [0], [0], [0, 0, 1, 0], [], []>, precision = #tpu.contract_precision<fp32>} : vector<4x256xf32>, vector<4x256xf32>, vector<4x4xf32> -> vector<4x4xf32>
    %10 = arith.addf %8, %9 : vector<4x4xf32>
    %c0_10 = arith.constant 0 : index
    %c0_11 = arith.constant 0 : index
    %c0_12 = arith.constant 0 : index
    %c0_13 = arith.constant 0 : index
    %11 = vector.load %arg5[%c0_10, %c0_11, %c0_12, %c0_13] : memref<1x1x4x4xf32, #tpu.memory_space<vmem>>, vector<1x1x4x4xf32>
    %12 = vector.shape_cast %11 : vector<1x1x4x4xf32> to vector<4x4xf32>
    %13 = vector.shape_cast %10 : vector<4x4xf32> to vector<1x1x4x4xf32>
    tpu.vector_store %arg5[%c0_10, %c0_11, %c0_12, %c0_13], %13 {strides = array<i32>} : memref<1x1x4x4xf32, #tpu.memory_space<vmem>>, vector<1x1x4x4xf32>,
    %c0_14 = arith.constant 0 : index
    %c0_15 = arith.constant 0 : index
    %c0_16 = arith.constant 0 : index
    %c0_17 = arith.constant 0 : index
    %14 = vector.load %arg6[%c0_14, %c0_15, %c0_16, %c0_17] : memref<1x1x4x1xf32, #tpu.memory_space<vmem>>, vector<1x1x4x1xf32>
    %15 = vector.shape_cast %14 : vector<1x1x4x1xf32> to vector<4x1xf32>
    %cst_18 = arith.constant dense<0.000000e+00> : vector<4x1xf32>
    %16 = tpu.matmul %4, %6, %cst_18 {dimension_numbers = #tpu.dot_dimension_numbers<[1], [1], [0], [0], [0, 0, 1, 0], [], []>, precision = #tpu.contract_precision<fp32>} : vector<4x256xf32>, vector<1x256xf32>, vector<4x1xf32> -> vector<4x1xf32>
    %17 = arith.addf %15, %16 : vector<4x1xf32>
    %c0_19 = arith.constant 0 : index
    %c0_20 = arith.constant 0 : index
    %c0_21 = arith.constant 0 : index
    %c0_22 = arith.constant 0 : index
    %18 = vector.load %arg6[%c0_19, %c0_20, %c0_21, %c0_22] : memref<1x1x4x1xf32, #tpu.memory_space<vmem>>, vector<1x1x4x1xf32>
    %19 = vector.shape_cast %18 : vector<1x1x4x1xf32> to vector<4x1xf32>
    %20 = vector.shape_cast %17 : vector<4x1xf32> to vector<1x1x4x1xf32>
    tpu.vector_store %arg6[%c0_19, %c0_20, %c0_21, %c0_22], %20 {strides = array<i32>} : memref<1x1x4x1xf32, #tpu.memory_space<vmem>>, vector<1x1x4x1xf32>,
    %c0_23 = arith.constant 0 : index
    %c0_24 = arith.constant 0 : index
    %c0_25 = arith.constant 0 : index
    %c0_26 = arith.constant 0 : index
    %21 = vector.load %arg8[%c0_23, %c0_24, %c0_25, %c0_26] : memref<1x1x1x1xf32, #tpu.memory_space<vmem>>, vector<1x1x1x1xf32>
    %22 = vector.shape_cast %21 : vector<1x1x1x1xf32> to vector<1x1xf32>
    %cst_27 = arith.constant dense<0.000000e+00> : vector<1x1xf32>
    %23 = tpu.matmul %6, %6, %cst_27 {dimension_numbers = #tpu.dot_dimension_numbers<[1], [1], [0], [0], [0, 0, 1, 0], [], []>, precision = #tpu.contract_precision<fp32>} : vector<1x256xf32>, vector<1x256xf32>, vector<1x1xf32> -> vector<1x1xf32>
    %24 = arith.addf %22, %23 : vector<1x1xf32>
    %c0_28 = arith.constant 0 : index
    %c0_29 = arith.constant 0 : index
    %c0_30 = arith.constant 0 : index
    %c0_31 = arith.constant 0 : index
    %25 = vector.load %arg8[%c0_28, %c0_29, %c0_30, %c0_31] : memref<1x1x1x1xf32, #tpu.memory_space<vmem>>, vector<1x1x1x1xf32>
    %26 = vector.shape_cast %25 : vector<1x1x1x1xf32> to vector<1x1xf32>
    %27 = vector.shape_cast %24 : vector<1x1xf32> to vector<1x1x1x1xf32>
    tpu.vector_store %arg8[%c0_28, %c0_29, %c0_30, %c0_31], %27 {strides = array<i32>} : memref<1x1x1x1xf32, #tpu.memory_space<vmem>>, vector<1x1x1x1xf32>,
    %c0_32 = arith.constant 0 : index
    %c0_33 = arith.constant 0 : index
    %c0_34 = arith.constant 0 : index
    %c0_35 = arith.constant 0 : index
    %28 = vector.load %arg7[%c0_32, %c0_33, %c0_34, %c0_35] : memref<1x1x4x1xf32, #tpu.memory_space<vmem>>, vector<1x1x4x1xf32>
    %29 = vector.shape_cast %28 : vector<1x1x4x1xf32> to vector<4x1xf32>
    %cst_36 = arith.constant dense<0.000000e+00> : vector<4xf32>
    %30 = vector.multi_reduction <add>, %4, %cst_36 [1] : vector<4x256xf32> to vector<4xf32>
    %31 = vector.shape_cast %30 : vector<4xf32> to vector<4x1xf32>
    %32 = arith.addf %29, %31 : vector<4x1xf32>
    %c0_37 = arith.constant 0 : index
    %c0_38 = arith.constant 0 : index
    %c0_39 = arith.constant 0 : index
    %c0_40 = arith.constant 0 : index
    %33 = vector.load %arg7[%c0_37, %c0_38, %c0_39, %c0_40] : memref<1x1x4x1xf32, #tpu.memory_space<vmem>>, vector<1x1x4x1xf32>
    %34 = vector.shape_cast %33 : vector<1x1x4x1xf32> to vector<4x1xf32>
    %35 = vector.shape_cast %32 : vector<4x1xf32> to vector<1x1x4x1xf32>
    tpu.vector_store %arg7[%c0_37, %c0_38, %c0_39, %c0_40], %35 {strides = array<i32>} : memref<1x1x4x1xf32, #tpu.memory_space<vmem>>, vector<1x1x4x1xf32>,
    %c0_41 = arith.constant 0 : index
    %c0_42 = arith.constant 0 : index
    %c0_43 = arith.constant 0 : index
    %c0_44 = arith.constant 0 : index
    %36 = vector.load %arg9[%c0_41, %c0_42, %c0_43, %c0_44] : memref<1x1x1x1xf32, #tpu.memory_space<vmem>>, vector<1x1x1x1xf32>
    %37 = vector.shape_cast %36 : vector<1x1x1x1xf32> to vector<1x1xf32>
    %cst_45 = arith.constant dense<0.000000e+00> : vector<1xf32>
    %38 = vector.multi_reduction <add>, %6, %cst_45 [1] : vector<1x256xf32> to vector<1xf32>
    %39 = vector.shape_cast %38 : vector<1xf32> to vector<1x1xf32>
    %40 = arith.addf %37, %39 : vector<1x1xf32>
    %c0_46 = arith.constant 0 : index
    %c0_47 = arith.constant 0 : index
    %c0_48 = arith.constant 0 : index
    %c0_49 = arith.constant 0 : index
    %41 = vector.load %arg9[%c0_46, %c0_47, %c0_48, %c0_49] : memref<1x1x1x1xf32, #tpu.memory_space<vmem>>, vector<1x1x1x1xf32>
    %42 = vector.shape_cast %41 : vector<1x1x1x1xf32> to vector<1x1xf32>
    %43 = vector.shape_cast %40 : vector<1x1xf32> to vector<1x1x1x1xf32>
    tpu.vector_store %arg9[%c0_46, %c0_47, %c0_48, %c0_49], %43 {strides = array<i32>} : memref<1x1x1x1xf32, #tpu.memory_space<vmem>>, vector<1x1x1x1xf32>,
    return
  }
  func.func @transform_0(%arg0: i32, %arg1: i32, %arg2: i32) -> (i32, i32, i32) {
    %c1_i32 = arith.constant 1 : i32
    %0 = arith.muli %arg1, %c1_i32 : i32
    %1 = arith.addi %0, %arg2 : i32
    %c0_i32 = arith.constant 0 : i32
    %c0_i32_0 = arith.constant 0 : i32
    return %arg0, %c0_i32, %1 : i32, i32, i32
  }
  func.func @transform_1(%arg0: i32, %arg1: i32, %arg2: i32) -> (i32, i32, i32) {
    %c1_i32 = arith.constant 1 : i32
    %0 = arith.muli %arg1, %c1_i32 : i32
    %1 = arith.addi %0, %arg2 : i32
    %c0_i32 = arith.constant 0 : i32
    %c0_i32_0 = arith.constant 0 : i32
    return %arg0, %c0_i32, %1 : i32, i32, i32
  }
  func.func @transform_2(%arg0: i32, %arg1: i32, %arg2: i32) -> (i32, i32, i32, i32) {
    %c0_i32 = arith.constant 0 : i32
    %c0_i32_0 = arith.constant 0 : i32
    %c0_i32_1 = arith.constant 0 : i32
    return %arg0, %arg1, %c0_i32, %c0_i32_0 : i32, i32, i32, i32
  }
  func.func @transform_3(%arg0: i32, %arg1: i32, %arg2: i32) -> (i32, i32, i32, i32) {
    %c0_i32 = arith.constant 0 : i32
    %c0_i32_0 = arith.constant 0 : i32
    %c0_i32_1 = arith.constant 0 : i32
    return %arg0, %arg1, %c0_i32, %c0_i32_0 : i32, i32, i32, i32
  }
  func.func @transform_4(%arg0: i32, %arg1: i32, %arg2: i32) -> (i32, i32, i32, i32) {
    %c0_i32 = arith.constant 0 : i32
    %c0_i32_0 = arith.constant 0 : i32
    %c0_i32_1 = arith.constant 0 : i32
    return %arg0, %arg1, %c0_i32, %c0_i32_0 : i32, i32, i32, i32
  }
  func.func @transform_5(%arg0: i32, %arg1: i32, %arg2: i32) -> (i32, i32, i32, i32) {
    %c0_i32 = arith.constant 0 : i32
    %c0_i32_0 = arith.constant 0 : i32
    %c0_i32_1 = arith.constant 0 : i32
    return %arg0, %arg1, %c0_i32, %c0_i32_0 : i32, i32, i32, i32
  }
  func.func @transform_6(%arg0: i32, %arg1: i32, %arg2: i32) -> (i32, i32, i32, i32) {
    %c0_i32 = arith.constant 0 : i32
    %c0_i32_0 = arith.constant 0 : i32
    %c0_i32_1 = arith.constant 0 : i32
    return %arg0, %arg1, %c0_i32, %c0_i32_0 : i32, i32, i32, i32
  }
}

module attributes {stable_mosaic.version = 11 : i64} {
  func.func @_moment_kernel(%arg0: i32, %arg1: i32, %arg2: i32, %arg3: memref<1x4x4096xf32, #tpu.memory_space<vmem>>, %arg4: memref<1x1x4096xf32, #tpu.memory_space<vmem>>, %arg5: memref<1x1x4x4xf32, #tpu.memory_space<vmem>>, %arg6: memref<1x1x4x1xf32, #tpu.memory_space<vmem>>, %arg7: memref<1x1x4x1xf32, #tpu.memory_space<vmem>>, %arg8: memref<1x1x1x1xf32, #tpu.memory_space<vmem>>, %arg9: memref<1x1x1x1xf32, #tpu.memory_space<vmem>>) attributes {dimension_semantics = [#tpu.dimension_semantics<parallel>, #tpu.dimension_semantics<parallel>, #tpu.dimension_semantics<arbitrary>], iteration_bounds = array<i64: 2, 1, 1>, scalar_prefetch = 0 : i64, scratch_operands = 0 : i64, tpu.core_type = #tpu.core_type<tc>, window_params = [{transform_indices = @transform_0, window_bounds = array<i64: 1, 4, 4096>}, {transform_indices = @transform_1, window_bounds = array<i64: 1, 1, 4096>}, {transform_indices = @transform_2, window_bounds = array<i64: 1, 1, 4, 4>}, {transform_indices = @transform_3, window_bounds = array<i64: 1, 1, 4, 1>}, {transform_indices = @transform_4, window_bounds = array<i64: 1, 1, 4, 1>}, {transform_indices = @transform_5, window_bounds = array<i64: 1, 1, 1, 1>}, {transform_indices = @transform_6, window_bounds = array<i64: 1, 1, 1, 1>}]} {
    %c0_i32 = arith.constant 0 : i32
    %0 = arith.cmpi eq, %arg2, %c0_i32 : i32
    %1 = arith.extui %0 : i1 to i32
    %c0_i32_0 = arith.constant 0 : i32
    %2 = arith.cmpi ne, %1, %c0_i32_0 : i32
    scf.if %2 {
      %cst_50 = arith.constant 0.000000e+00 : f32
      %44 = vector.broadcast %cst_50 : f32 to vector<4x4xf32>
      %c0_51 = arith.constant 0 : index
      %c0_52 = arith.constant 0 : index
      %c0_53 = arith.constant 0 : index
      %c0_54 = arith.constant 0 : index
      %45 = vector.load %arg5[%c0_51, %c0_52, %c0_53, %c0_54] : memref<1x1x4x4xf32, #tpu.memory_space<vmem>>, vector<1x1x4x4xf32>
      %46 = vector.shape_cast %45 : vector<1x1x4x4xf32> to vector<4x4xf32>
      %47 = vector.shape_cast %44 : vector<4x4xf32> to vector<1x1x4x4xf32>
      tpu.vector_store %arg5[%c0_51, %c0_52, %c0_53, %c0_54], %47 {strides = array<i32>} : memref<1x1x4x4xf32, #tpu.memory_space<vmem>>, vector<1x1x4x4xf32>,
      %cst_55 = arith.constant 0.000000e+00 : f32
      %48 = vector.broadcast %cst_55 : f32 to vector<4x1xf32>
      %c0_56 = arith.constant 0 : index
      %c0_57 = arith.constant 0 : index
      %c0_58 = arith.constant 0 : index
      %c0_59 = arith.constant 0 : index
      %49 = vector.load %arg6[%c0_56, %c0_57, %c0_58, %c0_59] : memref<1x1x4x1xf32, #tpu.memory_space<vmem>>, vector<1x1x4x1xf32>
      %50 = vector.shape_cast %49 : vector<1x1x4x1xf32> to vector<4x1xf32>
      %51 = vector.shape_cast %48 : vector<4x1xf32> to vector<1x1x4x1xf32>
      tpu.vector_store %arg6[%c0_56, %c0_57, %c0_58, %c0_59], %51 {strides = array<i32>} : memref<1x1x4x1xf32, #tpu.memory_space<vmem>>, vector<1x1x4x1xf32>,
      %cst_60 = arith.constant 0.000000e+00 : f32
      %52 = vector.broadcast %cst_60 : f32 to vector<4x1xf32>
      %c0_61 = arith.constant 0 : index
      %c0_62 = arith.constant 0 : index
      %c0_63 = arith.constant 0 : index
      %c0_64 = arith.constant 0 : index
      %53 = vector.load %arg7[%c0_61, %c0_62, %c0_63, %c0_64] : memref<1x1x4x1xf32, #tpu.memory_space<vmem>>, vector<1x1x4x1xf32>
      %54 = vector.shape_cast %53 : vector<1x1x4x1xf32> to vector<4x1xf32>
      %55 = vector.shape_cast %52 : vector<4x1xf32> to vector<1x1x4x1xf32>
      tpu.vector_store %arg7[%c0_61, %c0_62, %c0_63, %c0_64], %55 {strides = array<i32>} : memref<1x1x4x1xf32, #tpu.memory_space<vmem>>, vector<1x1x4x1xf32>,
      %cst_65 = arith.constant 0.000000e+00 : f32
      %56 = vector.broadcast %cst_65 : f32 to vector<1x1xf32>
      %c0_66 = arith.constant 0 : index
      %c0_67 = arith.constant 0 : index
      %c0_68 = arith.constant 0 : index
      %c0_69 = arith.constant 0 : index
      %57 = vector.load %arg8[%c0_66, %c0_67, %c0_68, %c0_69] : memref<1x1x1x1xf32, #tpu.memory_space<vmem>>, vector<1x1x1x1xf32>
      %58 = vector.shape_cast %57 : vector<1x1x1x1xf32> to vector<1x1xf32>
      %59 = vector.shape_cast %56 : vector<1x1xf32> to vector<1x1x1x1xf32>
      tpu.vector_store %arg8[%c0_66, %c0_67, %c0_68, %c0_69], %59 {strides = array<i32>} : memref<1x1x1x1xf32, #tpu.memory_space<vmem>>, vector<1x1x1x1xf32>,
      %cst_70 = arith.constant 0.000000e+00 : f32
      %60 = vector.broadcast %cst_70 : f32 to vector<1x1xf32>
      %c0_71 = arith.constant 0 : index
      %c0_72 = arith.constant 0 : index
      %c0_73 = arith.constant 0 : index
      %c0_74 = arith.constant 0 : index
      %61 = vector.load %arg9[%c0_71, %c0_72, %c0_73, %c0_74] : memref<1x1x1x1xf32, #tpu.memory_space<vmem>>, vector<1x1x1x1xf32>
      %62 = vector.shape_cast %61 : vector<1x1x1x1xf32> to vector<1x1xf32>
      %63 = vector.shape_cast %60 : vector<1x1xf32> to vector<1x1x1x1xf32>
      tpu.vector_store %arg9[%c0_71, %c0_72, %c0_73, %c0_74], %63 {strides = array<i32>} : memref<1x1x1x1xf32, #tpu.memory_space<vmem>>, vector<1x1x1x1xf32>,
    } else {
    }
    %c0 = arith.constant 0 : index
    %c0_1 = arith.constant 0 : index
    %c0_2 = arith.constant 0 : index
    %3 = vector.load %arg3[%c0, %c0_1, %c0_2] : memref<1x4x4096xf32, #tpu.memory_space<vmem>>, vector<1x4x4096xf32>
    %4 = vector.shape_cast %3 : vector<1x4x4096xf32> to vector<4x4096xf32>
    %c0_3 = arith.constant 0 : index
    %c0_4 = arith.constant 0 : index
    %c0_5 = arith.constant 0 : index
    %5 = vector.load %arg4[%c0_3, %c0_4, %c0_5] : memref<1x1x4096xf32, #tpu.memory_space<vmem>>, vector<1x1x4096xf32>
    %6 = vector.shape_cast %5 : vector<1x1x4096xf32> to vector<1x4096xf32>
    %c0_6 = arith.constant 0 : index
    %c0_7 = arith.constant 0 : index
    %c0_8 = arith.constant 0 : index
    %c0_9 = arith.constant 0 : index
    %7 = vector.load %arg5[%c0_6, %c0_7, %c0_8, %c0_9] : memref<1x1x4x4xf32, #tpu.memory_space<vmem>>, vector<1x1x4x4xf32>
    %8 = vector.shape_cast %7 : vector<1x1x4x4xf32> to vector<4x4xf32>
    %cst = arith.constant dense<0.000000e+00> : vector<4x4xf32>
    %9 = tpu.matmul %4, %4, %cst {dimension_numbers = #tpu.dot_dimension_numbers<[1], [1], [0], [0], [0, 0, 1, 0], [], []>, precision = #tpu.contract_precision<fp32>} : vector<4x4096xf32>, vector<4x4096xf32>, vector<4x4xf32> -> vector<4x4xf32>
    %10 = arith.addf %8, %9 : vector<4x4xf32>
    %c0_10 = arith.constant 0 : index
    %c0_11 = arith.constant 0 : index
    %c0_12 = arith.constant 0 : index
    %c0_13 = arith.constant 0 : index
    %11 = vector.load %arg5[%c0_10, %c0_11, %c0_12, %c0_13] : memref<1x1x4x4xf32, #tpu.memory_space<vmem>>, vector<1x1x4x4xf32>
    %12 = vector.shape_cast %11 : vector<1x1x4x4xf32> to vector<4x4xf32>
    %13 = vector.shape_cast %10 : vector<4x4xf32> to vector<1x1x4x4xf32>
    tpu.vector_store %arg5[%c0_10, %c0_11, %c0_12, %c0_13], %13 {strides = array<i32>} : memref<1x1x4x4xf32, #tpu.memory_space<vmem>>, vector<1x1x4x4xf32>,
    %c0_14 = arith.constant 0 : index
    %c0_15 = arith.constant 0 : index
    %c0_16 = arith.constant 0 : index
    %c0_17 = arith.constant 0 : index
    %14 = vector.load %arg6[%c0_14, %c0_15, %c0_16, %c0_17] : memref<1x1x4x1xf32, #tpu.memory_space<vmem>>, vector<1x1x4x1xf32>
    %15 = vector.shape_cast %14 : vector<1x1x4x1xf32> to vector<4x1xf32>
    %cst_18 = arith.constant dense<0.000000e+00> : vector<4x1xf32>
    %16 = tpu.matmul %4, %6, %cst_18 {dimension_numbers = #tpu.dot_dimension_numbers<[1], [1], [0], [0], [0, 0, 1, 0], [], []>, precision = #tpu.contract_precision<fp32>} : vector<4x4096xf32>, vector<1x4096xf32>, vector<4x1xf32> -> vector<4x1xf32>
    %17 = arith.addf %15, %16 : vector<4x1xf32>
    %c0_19 = arith.constant 0 : index
    %c0_20 = arith.constant 0 : index
    %c0_21 = arith.constant 0 : index
    %c0_22 = arith.constant 0 : index
    %18 = vector.load %arg6[%c0_19, %c0_20, %c0_21, %c0_22] : memref<1x1x4x1xf32, #tpu.memory_space<vmem>>, vector<1x1x4x1xf32>
    %19 = vector.shape_cast %18 : vector<1x1x4x1xf32> to vector<4x1xf32>
    %20 = vector.shape_cast %17 : vector<4x1xf32> to vector<1x1x4x1xf32>
    tpu.vector_store %arg6[%c0_19, %c0_20, %c0_21, %c0_22], %20 {strides = array<i32>} : memref<1x1x4x1xf32, #tpu.memory_space<vmem>>, vector<1x1x4x1xf32>,
    %c0_23 = arith.constant 0 : index
    %c0_24 = arith.constant 0 : index
    %c0_25 = arith.constant 0 : index
    %c0_26 = arith.constant 0 : index
    %21 = vector.load %arg8[%c0_23, %c0_24, %c0_25, %c0_26] : memref<1x1x1x1xf32, #tpu.memory_space<vmem>>, vector<1x1x1x1xf32>
    %22 = vector.shape_cast %21 : vector<1x1x1x1xf32> to vector<1x1xf32>
    %cst_27 = arith.constant dense<0.000000e+00> : vector<1x1xf32>
    %23 = tpu.matmul %6, %6, %cst_27 {dimension_numbers = #tpu.dot_dimension_numbers<[1], [1], [0], [0], [0, 0, 1, 0], [], []>, precision = #tpu.contract_precision<fp32>} : vector<1x4096xf32>, vector<1x4096xf32>, vector<1x1xf32> -> vector<1x1xf32>
    %24 = arith.addf %22, %23 : vector<1x1xf32>
    %c0_28 = arith.constant 0 : index
    %c0_29 = arith.constant 0 : index
    %c0_30 = arith.constant 0 : index
    %c0_31 = arith.constant 0 : index
    %25 = vector.load %arg8[%c0_28, %c0_29, %c0_30, %c0_31] : memref<1x1x1x1xf32, #tpu.memory_space<vmem>>, vector<1x1x1x1xf32>
    %26 = vector.shape_cast %25 : vector<1x1x1x1xf32> to vector<1x1xf32>
    %27 = vector.shape_cast %24 : vector<1x1xf32> to vector<1x1x1x1xf32>
    tpu.vector_store %arg8[%c0_28, %c0_29, %c0_30, %c0_31], %27 {strides = array<i32>} : memref<1x1x1x1xf32, #tpu.memory_space<vmem>>, vector<1x1x1x1xf32>,
    %c0_32 = arith.constant 0 : index
    %c0_33 = arith.constant 0 : index
    %c0_34 = arith.constant 0 : index
    %c0_35 = arith.constant 0 : index
    %28 = vector.load %arg7[%c0_32, %c0_33, %c0_34, %c0_35] : memref<1x1x4x1xf32, #tpu.memory_space<vmem>>, vector<1x1x4x1xf32>
    %29 = vector.shape_cast %28 : vector<1x1x4x1xf32> to vector<4x1xf32>
    %cst_36 = arith.constant dense<0.000000e+00> : vector<4xf32>
    %30 = vector.multi_reduction <add>, %4, %cst_36 [1] : vector<4x4096xf32> to vector<4xf32>
    %31 = vector.shape_cast %30 : vector<4xf32> to vector<4x1xf32>
    %32 = arith.addf %29, %31 : vector<4x1xf32>
    %c0_37 = arith.constant 0 : index
    %c0_38 = arith.constant 0 : index
    %c0_39 = arith.constant 0 : index
    %c0_40 = arith.constant 0 : index
    %33 = vector.load %arg7[%c0_37, %c0_38, %c0_39, %c0_40] : memref<1x1x4x1xf32, #tpu.memory_space<vmem>>, vector<1x1x4x1xf32>
    %34 = vector.shape_cast %33 : vector<1x1x4x1xf32> to vector<4x1xf32>
    %35 = vector.shape_cast %32 : vector<4x1xf32> to vector<1x1x4x1xf32>
    tpu.vector_store %arg7[%c0_37, %c0_38, %c0_39, %c0_40], %35 {strides = array<i32>} : memref<1x1x4x1xf32, #tpu.memory_space<vmem>>, vector<1x1x4x1xf32>,
    %c0_41 = arith.constant 0 : index
    %c0_42 = arith.constant 0 : index
    %c0_43 = arith.constant 0 : index
    %c0_44 = arith.constant 0 : index
    %36 = vector.load %arg9[%c0_41, %c0_42, %c0_43, %c0_44] : memref<1x1x1x1xf32, #tpu.memory_space<vmem>>, vector<1x1x1x1xf32>
    %37 = vector.shape_cast %36 : vector<1x1x1x1xf32> to vector<1x1xf32>
    %cst_45 = arith.constant dense<0.000000e+00> : vector<1xf32>
    %38 = vector.multi_reduction <add>, %6, %cst_45 [1] : vector<1x4096xf32> to vector<1xf32>
    %39 = vector.shape_cast %38 : vector<1xf32> to vector<1x1xf32>
    %40 = arith.addf %37, %39 : vector<1x1xf32>
    %c0_46 = arith.constant 0 : index
    %c0_47 = arith.constant 0 : index
    %c0_48 = arith.constant 0 : index
    %c0_49 = arith.constant 0 : index
    %41 = vector.load %arg9[%c0_46, %c0_47, %c0_48, %c0_49] : memref<1x1x1x1xf32, #tpu.memory_space<vmem>>, vector<1x1x1x1xf32>
    %42 = vector.shape_cast %41 : vector<1x1x1x1xf32> to vector<1x1xf32>
    %43 = vector.shape_cast %40 : vector<1x1xf32> to vector<1x1x1x1xf32>
    tpu.vector_store %arg9[%c0_46, %c0_47, %c0_48, %c0_49], %43 {strides = array<i32>} : memref<1x1x1x1xf32, #tpu.memory_space<vmem>>, vector<1x1x1x1xf32>,
    return
  }
  func.func @transform_0(%arg0: i32, %arg1: i32, %arg2: i32) -> (i32, i32, i32) {
    %c1_i32 = arith.constant 1 : i32
    %0 = arith.muli %arg1, %c1_i32 : i32
    %1 = arith.addi %0, %arg2 : i32
    %c0_i32 = arith.constant 0 : i32
    %c0_i32_0 = arith.constant 0 : i32
    return %arg0, %c0_i32, %1 : i32, i32, i32
  }
  func.func @transform_1(%arg0: i32, %arg1: i32, %arg2: i32) -> (i32, i32, i32) {
    %c1_i32 = arith.constant 1 : i32
    %0 = arith.muli %arg1, %c1_i32 : i32
    %1 = arith.addi %0, %arg2 : i32
    %c0_i32 = arith.constant 0 : i32
    %c0_i32_0 = arith.constant 0 : i32
    return %arg0, %c0_i32, %1 : i32, i32, i32
  }
  func.func @transform_2(%arg0: i32, %arg1: i32, %arg2: i32) -> (i32, i32, i32, i32) {
    %c0_i32 = arith.constant 0 : i32
    %c0_i32_0 = arith.constant 0 : i32
    %c0_i32_1 = arith.constant 0 : i32
    return %arg0, %arg1, %c0_i32, %c0_i32_0 : i32, i32, i32, i32
  }
  func.func @transform_3(%arg0: i32, %arg1: i32, %arg2: i32) -> (i32, i32, i32, i32) {
    %c0_i32 = arith.constant 0 : i32
    %c0_i32_0 = arith.constant 0 : i32
    %c0_i32_1 = arith.constant 0 : i32
    return %arg0, %arg1, %c0_i32, %c0_i32_0 : i32, i32, i32, i32
  }
  func.func @transform_4(%arg0: i32, %arg1: i32, %arg2: i32) -> (i32, i32, i32, i32) {
    %c0_i32 = arith.constant 0 : i32
    %c0_i32_0 = arith.constant 0 : i32
    %c0_i32_1 = arith.constant 0 : i32
    return %arg0, %arg1, %c0_i32, %c0_i32_0 : i32, i32, i32, i32
  }
  func.func @transform_5(%arg0: i32, %arg1: i32, %arg2: i32) -> (i32, i32, i32, i32) {
    %c0_i32 = arith.constant 0 : i32
    %c0_i32_0 = arith.constant 0 : i32
    %c0_i32_1 = arith.constant 0 : i32
    return %arg0, %arg1, %c0_i32, %c0_i32_0 : i32, i32, i32, i32
  }
  func.func @transform_6(%arg0: i32, %arg1: i32, %arg2: i32) -> (i32, i32, i32, i32) {
    %c0_i32 = arith.constant 0 : i32
    %c0_i32_0 = arith.constant 0 : i32
    %c0_i32_1 = arith.constant 0 : i32
    return %arg0, %arg1, %c0_i32, %c0_i32_0 : i32, i32, i32, i32
  }
}

</mosaic_0001>

<bundles_post_ra>
// kernel: qnr_loss.3
= control target key start
LH: loop header
LB: loop body
LE: loop exit
PB: predicated region body
PF: predicated region fallthrough
CT: control target
= control target key end

     0   :  { %s1138_s21 = smov 0   ;;  %s1140_s22 = smov 0   ;;  %s1253_s0 = inlined_call_operand.vmem [shape: f32[2,4,256], index: 0, kind: input, shape index: {}]   ;;  %s1254_s1 = inlined_call_operand.vmem [shape: f32[2,1,256], index: 1, kind: input, shape index: {}]   ;;  %s1255_s2 = inlined_call_operand.vmem [shape: f32[2,1,4,4], index: 2, kind: output, shape index: {0}]   ;;  %s1256_s3 = inlined_call_operand.vmem [shape: f32[2,1,4,1], index: 3, kind: output, shape index: {1}]   ;;  %s1257_s4 = inlined_call_operand.vmem [shape: f32[2,1,4,1], index: 4, kind: output, shape index: {2}]   ;;  %s1258_s5 = inlined_call_operand.vmem [shape: f32[2,1,1,1], index: 5, kind: output, shape index: {3}]   ;;  %s1259_s6 = inlined_call_operand.vmem [shape: f32[2,1,1,1], index: 6, kind: output, shape index: {4}]  }
   0x1   :  { %s1142_s23 = smov 0  }
   0x2 LB: > { %s36_s24 = sadd.s32 1, %s1096_s22  ;;  %p1043_p0 = scmp.ge.s32.totalorder %s1100_s23, 1  ;;  %s1100_s23 = sphi %s1142_s23, %s17_s23   ;;  %s1096_s22 = sphi %s1140_s22, %s1261_s22   ;;  %s1092_s21 = sphi %s1138_s21, %s1260_s21  }
   0x3   : > { %p38_p1 = scmp.ge.s32.totalorder %s36_s24, 2  ;;  %p281_p2 = scmp.lt.s32.totalorder %s1100_s23, 3 }
   0x5   : > { %s1263_s24 = smov (%p38_p1, %s36_s24), 0  ;;  %p282_p3 = pnand %p1043_p0, %p281_p2 }
   0x6   : > { %p355_p4 = scmp.lt.s32.totalorder (!%p282_p3), %s1092_s21, 1 }
   0x7   : > { %285 = sbr.rel (%p282_p3) target bundleno = 196 (0xc4), region = 28 }
   0xc   : > { %s1265_s21 = smov (!%p355_p4, %s1092_s21), 1  ;;  %vm735_vm0 = vcmask 1043456   ;;  %vm760_vm1 = vcmask 1040384   ;;  %vm415_vm2 = vcmask 3072   ;;  %v1102_v50 = vmov 0.0  }
   0xd   : > { %s1052_s25 = sshll.u32 %s1265_s21, 3  ;;  %s1046_s26 = sshll.u32 %s1265_s21, 1  ;;  %vm413_vm3 = vcmask 27648   ;;  %vm418_vm4 = vcmask 0  }
   0xe   : > { %s362_s29 = scalar_lea.vmem %s1253_s0, %s1052_s25  ;;  %s373_s8 = scalar_lea.vmem %s1254_s1, %s1046_s26 }
   0xf   : > { %v421_v0 = vld [vmem:[%s362_s29] sm:$0xff]  ;;  %s1047_s9 = sshll.u32 %s1265_s21, 2  ;;  %s1224_s25 = scalar_lea.vmem %s1259_s6, %s1265_s21 }
  0x10   : > { %v1166_v1 = vld [vmem:[%s373_s8] sm:$0x3]  ;;  %425 = vst [vmem:[#allocation1] ss:$2 sm:$0xff] %v421_v0  ;;  %s396_s12 = scalar_lea.vmem %s1257_s4, %s1047_s9  ;;  %s389_s15 = scalar_lea.vmem %s1256_s3, %s1047_s9 }
  0x11   : > { %v733_v2 = vperm.slane %v1166_v1, 1  ;;  %v732_v3 = vperm.slane %v1166_v1, 0  ;;  %v754_v25 = vmul.f32 %v1166_v1, %v1166_v1  ;;  %417 = vst.msk [vmem:[%s396_s12] sm:$0xf] %vm415_vm2, %v1102_v50  ;;  %s1218_s18 = scalar_lea.vmem %s1255_s2, %s1047_s9  ;;  %s402_s28 = scalar_lea.vmem %s1258_s5, %s1265_s21 }
  0x12   : > { %416 = vst.msk [vmem:[%s389_s15] sm:$0xf] %vm415_vm2, %v1102_v50 }
  0x13   : > { %v734_v4 = vrot.slane %v733_v2, 4  ;;  %v756_v36 = vperm.slane %v754_v25, 0  ;;  %v757_v37 = vperm.slane %v754_v25, 1  ;;  %v785_v47 = vsel %vm760_vm1, %v732_v3, 0.0  ;;  %414 = vst.msk [vmem:[%s1218_s18] sm:$0xf] %vm413_vm3, %v1102_v50 }
  0x14   : > { %v786_v48 = vsel %vm760_vm1, %v733_v2, 0.0  ;;  %420 = vst.msk [vmem:[%s1224_s25] sm:$0x1] %vm418_vm4, %v1102_v50 }
  0x15   : > { %v736_v8 = vsel %vm735_vm0, %v732_v3, %v734_v4  ;;  %v761_v39 = vsel %vm760_vm1, %v756_v36, 0.0  ;;  %v762_v40 = vsel %vm760_vm1, %v757_v37, 0.0  ;;  %v787_v49 = vadd.f32 %v786_v48, %v785_v47  ;;  %419 = vst.msk [vmem:[%s402_s28] sm:$0x1] %vm418_vm4, %v1102_v50 }
  0x16   : > { %v738_v12 = vmul.f32 %v736_v8, %v421_v0  ;;  %v763_v45 = vadd.f32 %v762_v40, %v761_v39 }
  0x17   : > { %v426_v5 = vld.sshfl [vmem:[#allocation1] sm:$0xff pattern:$0x75316420]  ;;  %v427_v6 = vld.sshfl [vmem:[#allocation1 + $0x8] sm:$0xff pattern:$0x75316420] }
  0x18   : > { %430 = vst [vmem:[#allocation1] ss:$2 sm:$0xff] %v421_v0  ;;  %v1172_v7 = vand.u32 4294901760, %v426_v5  ;;  %v1178_v10 = vand.u32 4294901760, %v427_v6  ;;  %v769_v55 = vld [vmem:[%s396_s12] sm:$0xf] }
  0x19   : > { %v730_v51 = vld [vmem:[%s389_s15] sm:$0xf] }
  0x1a   : > { %v453_v9 = vsub.f32 %v426_v5, %v1172_v7  ;;  %v1181_v16 = vsub.f32 %v427_v6, %v1178_v10 }
  0x1b   : > { %v782_v2 = vld [vmem:[%s1224_s25] sm:$0x1] }
  0x1c   : > { %v454_v11 = vand.u32 4294901760, %v453_v9  ;;  %v600_v22 = vand.u32 4294901760, %v1181_v16  ;;  %v753_v56 = vld [vmem:[%s402_s28] sm:$0x1] }
  0x1e   : > { %v455_v13 = vsub.f32 %v453_v9, %v454_v11  ;;  %v601_v28 = vsub.f32 %v1181_v16, %v600_v22 }
  0x1f   : > { %v431_v14 = vld.sshfl [vmem:[#allocation1] sm:$0xff pattern:$0x75316420]  ;;  %v432_v15 = vld.sshfl [vmem:[#allocation1 + $0x8] sm:$0xff pattern:$0x75316420] }
  0x20   : > { %v450_v17 = vand.u32 4294901760, %v431_v14  ;;  %v596_v18 = vand.u32 4294901760, %v432_v15  ;;  %740 = vst [vmem:[#allocation1] ss:$2 sm:$0xff] %v738_v12  ;;  %v456_v19 = vand.u32 4294901760, %v455_v13  ;;  %v602_v38 = vand.u32 4294901760, %v601_v28 }
  0x22   : > { %v477_v20 = vsub.f32 %v431_v14, %v450_v17  ;;  %451 = vmatpush.xpose.msra.mxu0 %v450_v17  ;;  %527 = vmatpush.xpose.msra.mxu3 %v450_v17  ;;  %v623_v21 = vsub.f32 %v432_v15, %v596_v18 }
  0x24   : > { %504 = vmatpush.xpose.msra.mxu2 %v477_v20  ;;  %v478_v23 = vand.u32 4294901760, %v477_v20  ;;  %v624_v24 = vand.u32 4294901760, %v623_v21 }
  0x25   : > { %457 = vmatmul.f32.vlgmr.msra.gmra.mxu0 %v456_v19  ;;  %531 = vmatmul.f32.vlgmr.msra.gmra.mxu3 %v454_v11 }
  0x26   : > { %v479_v26 = vsub.f32 %v477_v20, %v478_v23  ;;  %553 = vmatpush.xpose.msrb.mxu0 %v478_v23  ;;  %v625_v27 = vsub.f32 %v623_v21, %v624_v24 }
  0x27   : > { %507 = vmatmul.f32.vlgmr.msra.gmra.mxu2 %v453_v9  ;;  %v741_v29 = vld.sshfl [vmem:[#allocation1] sm:$0xff pattern:$0x75316420]  ;;  %v742_v30 = vld.sshfl [vmem:[#allocation1 + $0x8] sm:$0xff pattern:$0x75316420] }
  0x28   : > { %597 = vmatpush.xpose.msrb.mxu2 %v596_v18  ;;  %v480_v31 = vand.u32 4294901760, %v479_v26  ;;  %v626_v32 = vand.u32 4294901760, %v625_v27  ;;  %770 = vst [vmem:[#allocation1] ss:$2 sm:$0xff] %v421_v0  ;;  %v745_v33 = vsel %vm735_vm0, %v741_v29, 0.0  ;;  %v746_v34 = vsel %vm735_vm0, %v742_v30, 0.0 }
  0x29   : > { %v747_v35 = vadd.f32 %v746_v34, %v745_v33 }
  0x2a   : > { %650 = vmatpush.xpose.msra.mxu0 %v623_v21  ;;  %481 = vmatpush.xpose.msra.mxu1 %v480_v31  ;;  %v423_v21 = vld [vmem:[%s1218_s18] sm:$0xf] }
  0x2b   : > { %627 = vmatpush.xpose.msrb.mxu3 %v626_v32  ;;  %748 = vadd.xlane.f32.xlu0 %v747_v35 }
  0x2c   : > { %699 = vmatpush.xpose.msra.mxu2 %v624_v24 }
  0x2d   : > { %483 = vmatmul.f32.vlgmr.msra.gmra.mxu1 %v1172_v7  ;;  %555 = vmatmul.f32.vlgmr.msrb.gmra.mxu0 %v1172_v7 }
  0x2e   : > { %575 = vmatpush.xpose.msrb.mxu1 %v450_v17  ;;  %629 = vmatmul.f32.vlgmr.msrb.gmra.mxu3 %v1178_v10 }
  0x2f   : > { %721 = vmatpush.xpose.msra.mxu3 %v596_v18  ;;  %603 = vmatmul.f32.vlgmr.msrb.gmra.mxu2 %v602_v38  ;;  %v771_v41 = vld.sshfl [vmem:[#allocation1] sm:$0xff pattern:$0x75316420]  ;;  %v772_v42 = vld.sshfl [vmem:[#allocation1 + $0x8] sm:$0xff pattern:$0x75316420] }
  0x30   : > { %v775_v43 = vsel %vm735_vm0, %v771_v41, 0.0  ;;  %v776_v44 = vsel %vm735_vm0, %v772_v42, 0.0 }
  0x31   : > { %v777_v46 = vadd.f32 %v776_v44, %v775_v43 }
  0x32   : > { %673 = vmatpush.xpose.msra.mxu1 %v596_v18 }
  0x33   : > { %778 = vadd.xlane.f32.xlu1 %v777_v46  ;;  %764 = vadd.xlane.f32.xlu0 %v763_v45 }
  0x35   : > { %577 = vmatmul.f32.vlgmr.msrb.gmra.mxu1 %v1172_v7  ;;  %653 = vmatmul.f32.vlgmr.msra.gmra.mxu0 %v1181_v16 }
  0x36   : > { %723 = vmatmul.f32.vlgmr.msra.gmra.mxu3 %v1178_v10 }
  0x37   : > { %701 = vmatmul.f32.vlgmr.msra.gmra.mxu2 %v1178_v10 }
  0x3b   : > { %788 = vadd.xlane.f32.xlu1 %v787_v49 }
  0x3d   : > { %677 = vmatmul.f32.vlgmr.msra.gmra.mxu1 %v600_v22 }
  0x9e   : > { %v749_v52 = vpop.xlane.xlu0 %748 }
  0x9f   : > { %v750_v53 = vadd.f32 %v749_v52, %v730_v51 }
  0xa1   : > { %752 = vst.msk [vmem:[%s389_s15] sm:$0xf] %vm415_vm2, %v750_v53 }
  0xa2   : > { %v458_v54 = vpop.f32.mrf.mxu0 }
  0xa6   : > { %v779_v57 = vpop.xlane.xlu1 %778  ;;  %v765_v59 = vpop.xlane.xlu0 %764 }
  0xa7   : > { %v780_v58 = vadd.f32 %v779_v57, %v769_v55  ;;  %v766_v60 = vadd.f32 %v765_v59, %v753_v56 }
  0xa8   : > { %v532_v61 = vpop.f32.mrf.mxu3 }
  0xa9   : > { %781 = vst.msk [vmem:[%s396_s12] sm:$0xf] %vm415_vm2, %v780_v58 }
  0xaa   : > { %v484_v62 = vpop.f32.mrf.mxu1  ;;  %v508_v63 = vpop.f32.mrf.mxu2  ;;  %768 = vst.msk [vmem:[%s402_s28] sm:$0x1] %vm418_vm4, %v766_v60 }
  0xab   : > { %v485_v0 = vadd.f32 %v484_v62, %v458_v54  ;;  %v556_v1 = vpop.f32.mrf.mxu0 }
  0xad   : > { %v509_v3 = vadd.f32 %v508_v63, %v485_v0 }
  0xae   : > { %v789_v4 = vpop.xlane.xlu1 %788 }
  0xaf   : > { %v533_v5 = vadd.f32 %v532_v61, %v509_v3  ;;  %v790_v6 = vadd.f32 %v789_v4, %v782_v2 }
  0xb1   : > { %v557_v7 = vadd.f32 %v556_v1, %v533_v5  ;;  %v630_v8 = vpop.f32.mrf.mxu3  ;;  %791 = vst.msk [vmem:[%s1224_s25] sm:$0x1] %vm418_vm4, %v790_v6 }
  0xb2   : > { %v578_v9 = vpop.f32.mrf.mxu1  ;;  %v604_v10 = vpop.f32.mrf.mxu2 }
  0xb3   : > { %v579_v11 = vadd.f32 %v578_v9, %v557_v7  ;;  %v654_v13 = vpop.f32.mrf.mxu0 }
  0xb5   : > { %v605_v12 = vadd.f32 %v604_v10, %v579_v11 }
  0xb7   : > { %v631_v14 = vadd.f32 %v630_v8, %v605_v12 }
  0xb9   : > { %v655_v15 = vadd.f32 %v654_v13, %v631_v14  ;;  %v724_v19 = vpop.f32.mrf.mxu3 }
  0xba   : > { %v678_v16 = vpop.f32.mrf.mxu1  ;;  %v702_v17 = vpop.f32.mrf.mxu2 }
  0xbb   : > { %v679_v18 = vadd.f32 %v678_v16, %v655_v15 }
  0xbd   : > { %v703_v20 = vadd.f32 %v702_v17, %v679_v18 }
  0xbf   : > { %v725_v22 = vadd.f32 %v724_v19, %v703_v20 }
  0xc1   : > { %v727_v23 = vadd.f32 %v725_v22, %v423_v21 }
  0xc3   : > { %729 = vst.msk [vmem:[%s1218_s18] sm:$0xf] %vm413_vm3, %v727_v23 }
  0xc4 PF: > { %s17_s23 = sadd.s32 1, %s1100_s23   ;;  %s1260_s21 = smov %s1096_s22 }
  0xc5   : > { %p14_p5 = scmp.ge.s32.totalorder %s17_s23, 4   ;;  %s1261_s22 = smov %s1263_s24 }
  0xc7   :  { %16 = sbr.rel (!%p14_p5) target bundleno = 2 (0x2), region = 113 }

// kernel: qnr_loss.2
= control target key start
LH: loop header
LB: loop body
LE: loop exit
PB: predicated region body
PF: predicated region fallthrough
CT: control target
= control target key end

     0   :  { %s6311_s21 = smov 0   ;;  %s6313_s22 = smov 0   ;;  %s7727_s0 = inlined_call_operand.vmem [shape: f32[2,4,4096], index: 0, kind: input, shape index: {}]   ;;  %s7728_s1 = inlined_call_operand.vmem [shape: f32[2,1,4096], index: 1, kind: input, shape index: {}]   ;;  %s7729_s2 = inlined_call_operand.vmem [shape: f32[2,1,4,4], index: 2, kind: output, shape index: {0}]   ;;  %s7730_s3 = inlined_call_operand.vmem [shape: f32[2,1,4,1], index: 3, kind: output, shape index: {1}]   ;;  %s7731_s4 = inlined_call_operand.vmem [shape: f32[2,1,4,1], index: 4, kind: output, shape index: {2}]   ;;  %s7732_s5 = inlined_call_operand.vmem [shape: f32[2,1,1,1], index: 5, kind: output, shape index: {3}]   ;;  %s7733_s6 = inlined_call_operand.vmem [shape: f32[2,1,1,1], index: 6, kind: output, shape index: {4}]  }
   0x1   :  { %s6315_s23 = smov 0  }
   0x2 LB: > { %s36_s24 = sadd.s32 1, %s6269_s22  ;;  %p6212_p0 = scmp.ge.s32.totalorder %s6273_s23, 1  ;;  %s6273_s23 = sphi %s6315_s23, %s17_s23   ;;  %s6269_s22 = sphi %s6313_s22, %s7890_s22   ;;  %s6265_s21 = sphi %s6311_s21, %s7889_s21  }
   0x3   : > { %p38_p1 = scmp.ge.s32.totalorder %s36_s24, 2  ;;  %p281_p2 = scmp.lt.s32.totalorder %s6273_s23, 3 }
   0x5   : > { %s7892_s24 = smov (%p38_p1, %s36_s24), 0  ;;  %p282_p3 = pnand %p6212_p0, %p281_p2 }
   0x7   : > { %285 = sbr.rel (%p282_p3) target bundleno = 624 (0x270), region = 28 }
   0xc   : > { %p355_p4 = scmp.lt.s32.totalorder %s6265_s21, 1  ;;  %vm5352_vm0 = vcmask 1043456   ;;  %vm5641_vm1 = vcmask 1040384   ;;  %vm415_vm2 = vcmask 3072   ;;  %vm413_vm3 = vcmask 27648  }
   0xd   : > { %vm418_vm4 = vcmask 0  }
   0xe   : > { %s7894_s21 = smov (!%p355_p4, %s6265_s21), 1 }
   0xf   : > { %s6221_s25 = sshll.u32 %s7894_s21, 7  ;;  %s6215_s29 = sshll.u32 %s7894_s21, 5 }
  0x10   : > { %s6335_s28 = scalar_lea.vmem %s7727_s0, %s6221_s25  ;;  %s6794_s8 = scalar_lea.vmem %s7728_s1, %s6215_s29 }
  0x11   : > { %v6338_v0 = vld [vmem:[%s6335_s28] sm:$0xff]  ;;  %v6342_v1 = vld [vmem:[%s6335_s28 + $0x8] sm:$0xff]  ;;  %v6369_v12 = vld [vmem:[%s6335_s28 + $0x10] sm:$0xff]  ;;  %s6216_s9 = sshll.u32 %s7894_s21, 2  ;;  %s408_s25 = scalar_lea.vmem %s7733_s6, %s7894_s21 }
  0x12   : > { %458 = vst [vmem:[#allocation1] ss:$2 sm:$0xff] %v6338_v0  ;;  %v6346_v2 = vld [vmem:[%s6335_s28 + $0x20] sm:$0xff]  ;;  %v6350_v5 = vld [vmem:[%s6335_s28 + $0x28] sm:$0xff]  ;;  %v6391_v20 = vld [vmem:[%s6335_s28 + $0x30] sm:$0xff]  ;;  %s7674_s12 = scalar_lea.vmem %s7731_s4, %s6216_s9  ;;  %s7679_s15 = scalar_lea.vmem %s7730_s3, %s6216_s9 }
  0x13   : > { %460 = vst [vmem:[#allocation1 + $0x10] ss:$2 sm:$0xff] %v6342_v1  ;;  %v6358_v8 = vld [vmem:[%s6335_s28 + $0x40] sm:$0xff]  ;;  %v6366_v11 = vld [vmem:[%s6335_s28 + $0x48] sm:$0xff]  ;;  %v6417_v32 = vld [vmem:[%s6335_s28 + $0x50] sm:$0xff]  ;;  %s7688_s18 = scalar_lea.vmem %s7729_s2, %s6216_s9 }
  0x14   : > { %7773 = vst [vmem:[#allocation2_spill] sm:$0xff] %v6366_v11  ;;  %v6378_v15 = vld [vmem:[%s6335_s28 + $0x60] sm:$0xff]  ;;  %v6388_v19 = vld [vmem:[%s6335_s28 + $0x68] sm:$0xff]  ;;  %v6429_v42 = vld [vmem:[%s6335_s28 + $0x18] sm:$0xff] }
  0x15   : > { %462 = vst [vmem:[#allocation1 + $0x20] ss:$2 sm:$0xff] %v6369_v12  ;;  %v6438_v52 = vld [vmem:[%s6335_s28 + $0x70] sm:$0xff] }
  0x16   : > { %7774 = vst [vmem:[#allocation3_spill] sm:$0xff] %v6378_v15 }
  0x17   : > { %464 = vst [vmem:[#allocation1 + $0x30] ss:$2 sm:$0xff] %v6429_v42 }
  0x19   : > { %v465_v3 = vld.sshfl [vmem:[#allocation1] sm:$0xff pattern:$0x75316420]  ;;  %v466_v4 = vld.sshfl [vmem:[#allocation1 + $0x8] sm:$0xff pattern:$0x75316420] }
  0x1a   : > { %473 = vst [vmem:[#allocation1] ss:$2 sm:$0xff] %v6346_v2  ;;  %v6352_v6 = vld.sshfl [vmem:[#allocation1 + $0x10] sm:$0xff pattern:$0x75316420]  ;;  %v6385_v18 = vand.u32 4294901760, %v465_v3 }
  0x1b   : > { %v6354_v7 = vld.sshfl [vmem:[#allocation1 + $0x18] sm:$0xff pattern:$0x75316420]  ;;  %v6413_v31 = vand.u32 4294901760, %v466_v4  ;;  %v6454_v62 = vand.u32 4294901760, %v6352_v6 }
  0x1c   : > { %474 = vst [vmem:[#allocation1 + $0x10] ss:$2 sm:$0xff] %v6350_v5  ;;  %v6393_v21 = vld.sshfl [vmem:[#allocation1 + $0x20] sm:$0xff pattern:$0x75316420]  ;;  %v642_v25 = vsub.f32 %v465_v3, %v6385_v18  ;;  %v6457_v3 = vld [vmem:[%s6335_s28 + $0x38] sm:$0xff] }
  0x1d   : > { %v6395_v22 = vld.sshfl [vmem:[#allocation1 + $0x28] sm:$0xff pattern:$0x75316420]  ;;  %v6425_v38 = vsub.f32 %v466_v4, %v6413_v31  ;;  %7775 = vst [vmem:[#allocation4_spill] sm:$0xff] %v6457_v3 }
  0x1e   : > { %475 = vst [vmem:[#allocation1 + $0x20] ss:$2 sm:$0xff] %v6391_v20  ;;  %v643_v28 = vand.u32 4294901760, %v642_v25 }
  0x1f   : > { %v789_v47 = vand.u32 4294901760, %v6425_v38 }
  0x20   : > { %v644_v34 = vsub.f32 %v642_v25, %v643_v28 }
  0x21   : > { %v6360_v9 = vld.sshfl [vmem:[#allocation1] sm:$0xff pattern:$0x75316420]  ;;  %v6362_v10 = vld.sshfl [vmem:[#allocation1 + $0x8] sm:$0xff pattern:$0x75316420]  ;;  %v790_v58 = vsub.f32 %v6425_v38, %v789_v47 }
  0x22   : > { %485 = vst [vmem:[#allocation1] ss:$2 sm:$0xff] %v6358_v8  ;;  %v645_v41 = vand.u32 4294901760, %v644_v34  ;;  %v6462_v34 = vld.sshfl [vmem:[#allocation1 + $0x38] sm:$0xff pattern:$0x75316420] }
  0x23   : > { %v6372_v13 = vld.sshfl [vmem:[#allocation1 + $0x10] sm:$0xff pattern:$0x75316420]  ;;  %v6374_v14 = vld.sshfl [vmem:[#allocation1 + $0x18] sm:$0xff pattern:$0x75316420] }
  0x24   : > { %486 = vst [vmem:[#allocation1 + $0x10] ss:$2 sm:$0xff] %v6366_v11  ;;  %v791_v4 = vand.u32 4294901760, %v790_v58 }
  0x25   : > { %v6419_v33 = vld.sshfl [vmem:[#allocation1 + $0x20] sm:$0xff pattern:$0x75316420]  ;;  %v6421_v35 = vld.sshfl [vmem:[#allocation1 + $0x28] sm:$0xff pattern:$0x75316420] }
  0x26   : > { %487 = vst [vmem:[#allocation1 + $0x20] ss:$2 sm:$0xff] %v6417_v32 }
  0x29   : > { %v6380_v16 = vld.sshfl [vmem:[#allocation1] sm:$0xff pattern:$0x75316420]  ;;  %v6382_v17 = vld.sshfl [vmem:[#allocation1 + $0x8] sm:$0xff pattern:$0x75316420] }
  0x2a   : > { %497 = vst [vmem:[#allocation1] ss:$2 sm:$0xff] %v6378_v15 }
  0x2b   : > { %v6397_v23 = vld.sshfl [vmem:[#allocation1 + $0x10] sm:$0xff pattern:$0x75316420]  ;;  %v6399_v24 = vld.sshfl [vmem:[#allocation1 + $0x18] sm:$0xff pattern:$0x75316420] }
  0x2c   : > { %498 = vst [vmem:[#allocation1 + $0x10] ss:$2 sm:$0xff] %v6388_v19 }
  0x2d   : > { %v6441_v53 = vld.sshfl [vmem:[#allocation1 + $0x20] sm:$0xff pattern:$0x75316420]  ;;  %v6444_v57 = vld.sshfl [vmem:[#allocation1 + $0x28] sm:$0xff pattern:$0x75316420] }
  0x2e   : > { %499 = vst [vmem:[#allocation1 + $0x20] ss:$2 sm:$0xff] %v6438_v52 }
  0x31   : > { %v6404_v26 = vld.sshfl [vmem:[#allocation1] sm:$0xff pattern:$0x75316420]  ;;  %v6406_v27 = vld.sshfl [vmem:[#allocation1 + $0x8] sm:$0xff pattern:$0x75316420] }
  0x32   : > { %541 = vst [vmem:[#allocation1] ss:$2 sm:$0xff] %v6338_v0 }
  0x33   : > { %v6409_v29 = vld.sshfl [vmem:[#allocation1 + $0x10] sm:$0xff pattern:$0x75316420]  ;;  %v6411_v30 = vld.sshfl [vmem:[#allocation1 + $0x18] sm:$0xff pattern:$0x75316420] }
  0x34   : > { %543 = vst [vmem:[#allocation1 + $0x10] ss:$2 sm:$0xff] %v6342_v1 }
  0x39   : > { %v548_v36 = vld.sshfl [vmem:[#allocation1] sm:$0xff pattern:$0x75316420]  ;;  %v549_v37 = vld.sshfl [vmem:[#allocation1 + $0x8] sm:$0xff pattern:$0x75316420] }
  0x3a   : > { %v639_v39 = vand.u32 4294901760, %v548_v36  ;;  %v785_v40 = vand.u32 4294901760, %v549_v37  ;;  %556 = vst [vmem:[#allocation1] ss:$2 sm:$0xff] %v6346_v2 }
  0x3b   : > { %v550_v45 = vld.sshfl [vmem:[#allocation1 + $0x10] sm:$0xff pattern:$0x75316420]  ;;  %v551_v46 = vld.sshfl [vmem:[#allocation1 + $0x18] sm:$0xff pattern:$0x75316420] }
  0x3c   : > { %v666_v43 = vsub.f32 %v548_v36, %v639_v39  ;;  %640 = vmatpush.xpose.msra.mxu0 %v639_v39  ;;  %716 = vmatpush.xpose.msra.mxu3 %v639_v39  ;;  %v812_v44 = vsub.f32 %v549_v37, %v785_v40  ;;  %v6432_v48 = vand.u32 4294901760, %v550_v45  ;;  %v6434_v49 = vand.u32 4294901760, %v551_v46  ;;  %557 = vst [vmem:[#allocation1 + $0x10] ss:$2 sm:$0xff] %v6350_v5 }
  0x3d   : > { %v934_v36 = vsub.f32 %v6352_v6, %v6454_v62 }
  0x3e   : > { %693 = vmatpush.xpose.msra.mxu2 %v666_v43  ;;  %v667_v50 = vand.u32 4294901760, %v666_v43  ;;  %v813_v51 = vand.u32 4294901760, %v812_v44  ;;  %v958_v56 = vsub.f32 %v550_v45, %v6432_v48  ;;  %v6450_v59 = vsub.f32 %v551_v46, %v6434_v49  ;;  %v6479_v45 = vld [vmem:[%s6335_s28 + $0x58] sm:$0xff] }
  0x3f   : > { %646 = vmatmul.f32.vlgmr.msra.gmra.mxu0 %v645_v41  ;;  %720 = vmatmul.f32.vlgmr.msra.gmra.mxu3 %v643_v28  ;;  %v6460_v28 = vld.sshfl [vmem:[#allocation1 + $0x30] sm:$0xff pattern:$0x75316420]  ;;  %v6472_v41 = vld.sshfl [vmem:[#allocation1 + $0x28] sm:$0xff pattern:$0x75316420] }
  0x40   : > { %v668_v54 = vsub.f32 %v666_v43, %v667_v50  ;;  %742 = vmatpush.xpose.msrb.mxu0 %v667_v50  ;;  %v814_v55 = vsub.f32 %v812_v44, %v813_v51  ;;  %v959_v63 = vand.u32 4294901760, %v958_v56  ;;  %476 = vst [vmem:[#allocation1 + $0x30] ss:$2 sm:$0xff] %v6457_v3  ;;  %v935_v6 = vand.u32 4294901760, %v934_v36 }
  0x41   : > { %696 = vmatmul.f32.vlgmr.msra.gmra.mxu2 %v642_v25  ;;  %v1105_v25 = vand.u32 4294901760, %v6450_v59  ;;  %7776 = vst [vmem:[#allocation5_spill] sm:$0xff] %v6472_v41  ;;  %v6482_v46 = vand.u32 4294901760, %v6354_v7 }
  0x42   : > { %786 = vmatpush.xpose.msrb.mxu2 %v785_v40  ;;  %v669_v60 = vand.u32 4294901760, %v668_v54  ;;  %v815_v61 = vand.u32 4294901760, %v814_v55  ;;  %v960_v37 = vsub.f32 %v958_v56, %v959_v63  ;;  %v936_v54 = vsub.f32 %v934_v36, %v935_v6 }
  0x43   : > { %v1106_v43 = vsub.f32 %v6450_v59, %v1105_v25  ;;  %v1080_v58 = vsub.f32 %v6354_v7, %v6482_v46 }
  0x44   : > { %839 = vmatpush.xpose.msra.mxu0 %v812_v44  ;;  %670 = vmatpush.xpose.msra.mxu1 %v669_v60  ;;  %v961_v44 = vand.u32 4294901760, %v960_v37 }
  0x45   : > { %816 = vmatpush.xpose.msrb.mxu3 %v815_v61  ;;  %v6498_v61 = vld [vmem:[%s6335_s28 + $0x78] sm:$0xff]  ;;  %s7704_s28 = scalar_lea.vmem %s7732_s5, %s7894_s21 }
  0x46   : > { %888 = vmatpush.xpose.msra.mxu2 %v813_v51 }
  0x47   : > { %672 = vmatmul.f32.vlgmr.msra.gmra.mxu1 %v6385_v18  ;;  %744 = vmatmul.f32.vlgmr.msrb.gmra.mxu0 %v6385_v18  ;;  %v6484_v50 = vld.sshfl [vmem:[#allocation1 + $0x30] sm:$0xff pattern:$0x75316420]  ;;  %v6486_v51 = vld.sshfl [vmem:[#allocation1 + $0x38] sm:$0xff pattern:$0x75316420] }
  0x48   : > { %764 = vmatpush.xpose.msrb.mxu1 %v639_v39  ;;  %818 = vmatmul.f32.vlgmr.msrb.gmra.mxu3 %v6413_v31  ;;  %v6470_v39 = vld.sshfl [vmem:[#allocation1 + $0x20] sm:$0xff pattern:$0x75316420]  ;;  %488 = vst [vmem:[#allocation1 + $0x30] ss:$2 sm:$0xff] %v6479_v45 }
  0x49   : > { %910 = vmatpush.xpose.msra.mxu3 %v785_v40  ;;  %792 = vmatmul.f32.vlgmr.msrb.gmra.mxu2 %v791_v4  ;;  %545 = vst [vmem:[#allocation1 + $0x20] ss:$2 sm:$0xff] %v6369_v12  ;;  %v1081_v4 = vand.u32 4294901760, %v1080_v58 }
  0x4a   : > { %932 = vmatpush.xpose.msrb.mxu0 %v6432_v48  ;;  %985 = vmatpush.xpose.msrb.mxu2 %v958_v56 }
  0x4c   : > { %862 = vmatpush.xpose.msra.mxu1 %v785_v40  ;;  %v1107_v40 = vand.u32 4294901760, %v1106_v43 }
  0x4d   : > { %1008 = vmatpush.xpose.msrb.mxu3 %v6432_v48 }
  0x4f   : > { %766 = vmatmul.f32.vlgmr.msrb.gmra.mxu1 %v6385_v18  ;;  %842 = vmatmul.f32.vlgmr.msra.gmra.mxu0 %v6425_v38  ;;  %v937_v18 = vand.u32 4294901760, %v936_v54  ;;  %v6502_v43 = vld.sshfl [vmem:[#allocation1 + $0x30] sm:$0xff pattern:$0x75316420] }
  0x50   : > { %912 = vmatmul.f32.vlgmr.msra.gmra.mxu3 %v6413_v31  ;;  %962 = vmatpush.xpose.msrb.mxu1 %v961_v44  ;;  %v552_v55 = vld.sshfl [vmem:[#allocation1 + $0x20] sm:$0xff pattern:$0x75316420]  ;;  %v553_v56 = vld.sshfl [vmem:[#allocation1 + $0x28] sm:$0xff pattern:$0x75316420] }
  0x51   : > { %890 = vmatmul.f32.vlgmr.msra.gmra.mxu2 %v6413_v31  ;;  %1034 = vmatpush.xpose.msra.mxu0 %v959_v63  ;;  %558 = vst [vmem:[#allocation1 + $0x20] ss:$2 sm:$0xff] %v6391_v20  ;;  %v1223_v60 = vand.u32 4294901760, %v552_v55  ;;  %v6500_v37 = vand.u32 4294901760, %v553_v56  ;;  %v1082_v31 = vsub.f32 %v1080_v58, %v1081_v4 }
  0x52   : > { %1078 = vmatpush.xpose.msra.mxu2 %v6434_v49  ;;  %1108 = vmatpush.xpose.msra.mxu3 %v1107_v40  ;;  %v6504_v44 = vld.sshfl [vmem:[#allocation1 + $0x38] sm:$0xff pattern:$0x75316420]  ;;  %v6514_v40 = vand.u32 4294901760, %v6393_v21 }
  0x53   : > { %500 = vst [vmem:[#allocation1 + $0x30] ss:$2 sm:$0xff] %v6498_v61  ;;  %v1250_v7 = vsub.f32 %v552_v55, %v1223_v60  ;;  %v1396_v63 = vsub.f32 %v553_v56, %v6500_v37  ;;  %v1371_v56 = vand.u32 4294901760, %v6395_v22 }
  0x55   : > { %v1251_v38 = vand.u32 4294901760, %v1250_v7  ;;  %v1397_v54 = vand.u32 4294901760, %v1396_v63 }
  0x57   : > { %866 = vmatmul.f32.vlgmr.msra.gmra.mxu1 %v789_v47  ;;  %938 = vmatmul.f32.vlgmr.msrb.gmra.mxu0 %v937_v18  ;;  %v1083_v47 = vand.u32 4294901760, %v1082_v31 }
  0x58   : > { %1012 = vmatmul.f32.vlgmr.msrb.gmra.mxu3 %v935_v6  ;;  %1056 = vmatpush.xpose.msra.mxu1 %v6432_v48  ;;  %v1226_v48 = vsub.f32 %v6393_v21, %v6514_v40 }
  0x59   : > { %988 = vmatmul.f32.vlgmr.msrb.gmra.mxu2 %v934_v36  ;;  %1131 = vmatpush.xpose.msrb.mxu0 %v6450_v59  ;;  %v1252_v59 = vsub.f32 %v1250_v7, %v1251_v38 }
  0x5a   : > { %1180 = vmatpush.xpose.msrb.mxu2 %v1105_v25  ;;  %1202 = vmatpush.xpose.msrb.mxu3 %v6434_v49  ;;  %v6516_v18 = vld.sshfl [vmem:[#allocation1 + $0x30] sm:$0xff pattern:$0x75316420]  ;;  %v6518_v6 = vld.sshfl [vmem:[#allocation1 + $0x38] sm:$0xff pattern:$0x75316420]  ;;  %v1398_v25 = vsub.f32 %v1396_v63, %v1397_v54 }
  0x5b   : > { %7777 = vst [vmem:[#allocation6_spill] sm:$0xff] %v6516_v18  ;;  %v1227_v36 = vand.u32 4294901760, %v1226_v48  ;;  %v1253_v55 = vand.u32 4294901760, %v1252_v59 }
  0x5c   : > { %7778 = vst [vmem:[#allocation7_spill] sm:$0xff] %v6518_v6  ;;  %v1399_v31 = vand.u32 4294901760, %v1398_v25 }
  0x5d   : > { %547 = vst [vmem:[#allocation1 + $0x30] ss:$2 sm:$0xff] %v6429_v42  ;;  %v1228_v21 = vsub.f32 %v1226_v48, %v1227_v36 }
  0x5f   : > { %964 = vmatmul.f32.vlgmr.msrb.gmra.mxu1 %v6454_v62  ;;  %1036 = vmatmul.f32.vlgmr.msra.gmra.mxu0 %v6454_v62 }
  0x60   : > { %1110 = vmatmul.f32.vlgmr.msra.gmra.mxu3 %v6482_v46  ;;  %1154 = vmatpush.xpose.msrb.mxu1 %v6434_v49  ;;  %v1372_v49 = vsub.f32 %v6395_v22, %v1371_v56 }
  0x61   : > { %1084 = vmatmul.f32.vlgmr.msra.gmra.mxu2 %v1083_v47  ;;  %1224 = vmatpush.xpose.msra.mxu0 %v1223_v60 }
  0x62   : > { %1277 = vmatpush.xpose.msra.mxu2 %v1250_v7  ;;  %1300 = vmatpush.xpose.msra.mxu3 %v1223_v60  ;;  %v1229_v7 = vand.u32 4294901760, %v1228_v21  ;;  %v560_v21 = vld.sshfl [vmem:[#allocation1] sm:$0xff pattern:$0x75316420] }
  0x64   : > { %v554_v6 = vld.sshfl [vmem:[#allocation1 + $0x30] sm:$0xff pattern:$0x75316420]  ;;  %v555_v18 = vld.sshfl [vmem:[#allocation1 + $0x38] sm:$0xff pattern:$0x75316420] }
  0x65   : > { %559 = vst [vmem:[#allocation1 + $0x30] ss:$2 sm:$0xff] %v6457_v3  ;;  %v1515_v47 = vand.u32 4294901760, %v554_v6 }
  0x67   : > { %1058 = vmatmul.f32.vlgmr.msra.gmra.mxu1 %v6454_v62  ;;  %1134 = vmatmul.f32.vlgmr.msrb.gmra.mxu0 %v1080_v58  ;;  %v1373_v62 = vand.u32 4294901760, %v1372_v49  ;;  %v6534_v58 = vand.u32 4294901760, %v555_v18  ;;  %v1542_v59 = vsub.f32 %v554_v6, %v1515_v47  ;;  %v1663_v6 = vand.u32 4294901760, %v6462_v34 }
  0x68   : > { %1204 = vmatmul.f32.vlgmr.msrb.gmra.mxu3 %v6482_v46  ;;  %1254 = vmatpush.xpose.msra.mxu1 %v1253_v55 }
  0x69   : > { %1182 = vmatmul.f32.vlgmr.msrb.gmra.mxu2 %v6482_v46  ;;  %1326 = vmatpush.xpose.msrb.mxu0 %v1251_v38  ;;  %v1374_v25 = vsub.f32 %v1372_v49, %v1373_v62  ;;  %v1688_v22 = vsub.f32 %v555_v18, %v6534_v58  ;;  %v6539_v46 = vand.u32 4294901760, %v6460_v28  ;;  %v1543_v38 = vand.u32 4294901760, %v1542_v59 }
  0x6a   : > { %1370 = vmatpush.xpose.msrb.mxu2 %v6500_v37  ;;  %1400 = vmatpush.xpose.msrb.mxu3 %v1399_v31 }
  0x6b   : > { %v1375_v55 = vand.u32 4294901760, %v1374_v25  ;;  %v1689_v31 = vand.u32 4294901760, %v1688_v22 }
  0x6f   : > { %1158 = vmatmul.f32.vlgmr.msrb.gmra.mxu1 %v1081_v4  ;;  %1230 = vmatmul.f32.vlgmr.msra.gmra.mxu0 %v1229_v7  ;;  %v1544_v4 = vsub.f32 %v1542_v59, %v1543_v38 }
  0x70   : > { %1304 = vmatmul.f32.vlgmr.msra.gmra.mxu3 %v1227_v36  ;;  %1348 = vmatpush.xpose.msrb.mxu1 %v1223_v60  ;;  %v1518_v60 = vsub.f32 %v6460_v28, %v6539_v46  ;;  %v561_v28 = vld.sshfl [vmem:[#allocation1 + $0x8] sm:$0xff pattern:$0x75316420] }
  0x71   : > { %1280 = vmatmul.f32.vlgmr.msra.gmra.mxu2 %v1226_v48  ;;  %1423 = vmatpush.xpose.msra.mxu0 %v1396_v63  ;;  %v1690_v63 = vsub.f32 %v1688_v22, %v1689_v31  ;;  %v1545_v18 = vand.u32 4294901760, %v1544_v4  ;;  %568 = vst [vmem:[#allocation1] ss:$2 sm:$0xff] %v6358_v8 }
  0x72   : > { %1472 = vmatpush.xpose.msra.mxu2 %v1397_v54  ;;  %1494 = vmatpush.xpose.msra.mxu3 %v6500_v37  ;;  %v1519_v54 = vand.u32 4294901760, %v1518_v60 }
  0x73   : > { %v1691_v48 = vand.u32 4294901760, %v1690_v63 }
  0x74   : > { %v1520_v36 = vsub.f32 %v1518_v60, %v1519_v54 }
  0x76   : > { %v1521_v7 = vand.u32 4294901760, %v1520_v36  ;;  %v562_v36 = vld.sshfl [vmem:[#allocation1 + $0x10] sm:$0xff pattern:$0x75316420] }
  0x77   : > { %1256 = vmatmul.f32.vlgmr.msra.gmra.mxu1 %v6514_v40  ;;  %1328 = vmatmul.f32.vlgmr.msrb.gmra.mxu0 %v6514_v40 }
  0x78   : > { %1402 = vmatmul.f32.vlgmr.msrb.gmra.mxu3 %v1371_v56  ;;  %1446 = vmatpush.xpose.msra.mxu1 %v6500_v37  ;;  %v1664_v37 = vsub.f32 %v6462_v34, %v1663_v6 }
  0x79   : > { %1376 = vmatmul.f32.vlgmr.msrb.gmra.mxu2 %v1375_v55  ;;  %1516 = vmatpush.xpose.msrb.mxu0 %v1515_v47  ;;  %v6551_v55 = vand.u32 4294901760, %v561_v28 }
  0x7a   : > { %1569 = vmatpush.xpose.msrb.mxu2 %v1542_v59  ;;  %1592 = vmatpush.xpose.msrb.mxu3 %v1515_v47  ;;  %v1807_v59 = vand.u32 4294901760, %v560_v21  ;;  %v1665_v25 = vand.u32 4294901760, %v1664_v37 }
  0x7b   : > { %v1980_v34 = vsub.f32 %v561_v28, %v6551_v55  ;;  %v2099_v28 = vand.u32 4294901760, %v562_v36 }
  0x7d   : > { %v1981_v63 = vand.u32 4294901760, %v1980_v34 }
  0x7f   : > { %1350 = vmatmul.f32.vlgmr.msrb.gmra.mxu1 %v6514_v40  ;;  %1426 = vmatmul.f32.vlgmr.msra.gmra.mxu0 %v1372_v49  ;;  %v1834_v40 = vsub.f32 %v560_v21, %v1807_v59  ;;  %v1666_v49 = vsub.f32 %v1664_v37, %v1665_v25 }
  0x80   : > { %1496 = vmatmul.f32.vlgmr.msra.gmra.mxu3 %v1371_v56  ;;  %1546 = vmatpush.xpose.msrb.mxu1 %v1545_v18 }
  0x81   : > { %1474 = vmatmul.f32.vlgmr.msra.gmra.mxu2 %v1371_v56  ;;  %1618 = vmatpush.xpose.msra.mxu0 %v1543_v38  ;;  %v6556_v56 = vand.u32 4294901760, %v6360_v9  ;;  %v1835_v38 = vand.u32 4294901760, %v1834_v40  ;;  %v1667_v4 = vand.u32 4294901760, %v1666_v49 }
  0x82   : > { %1662 = vmatpush.xpose.msra.mxu2 %v6534_v58  ;;  %1692 = vmatpush.xpose.msra.mxu3 %v1691_v48 }
  0x87   : > { %1450 = vmatmul.f32.vlgmr.msra.gmra.mxu1 %v1373_v62  ;;  %1522 = vmatmul.f32.vlgmr.msrb.gmra.mxu0 %v1521_v7  ;;  %v1836_v62 = vsub.f32 %v1834_v40, %v1835_v38 }
  0x88   : > { %1596 = vmatmul.f32.vlgmr.msrb.gmra.mxu3 %v1519_v54  ;;  %1640 = vmatpush.xpose.msra.mxu1 %v1515_v47  ;;  %v1810_v47 = vsub.f32 %v6360_v9, %v6556_v56  ;;  %v1955_v54 = vand.u32 4294901760, %v6362_v10  ;;  %v563_v9 = vld.sshfl [vmem:[#allocation1 + $0x18] sm:$0xff pattern:$0x75316420] }
  0x89   : > { %1572 = vmatmul.f32.vlgmr.msrb.gmra.mxu2 %v1518_v60  ;;  %1715 = vmatpush.xpose.msrb.mxu0 %v1688_v22  ;;  %v1982_v22 = vsub.f32 %v1980_v34, %v1981_v63  ;;  %v1837_v60 = vand.u32 4294901760, %v1836_v62  ;;  %569 = vst [vmem:[#allocation1 + $0x10] ss:$2 sm:$0xff] %v6366_v11  ;;  %v6581_v62 = vand.u32 4294901760, %v6374_v14 }
  0x8a   : > { %1764 = vmatpush.xpose.msrb.mxu2 %v1689_v31  ;;  %1786 = vmatpush.xpose.msrb.mxu3 %v6534_v58  ;;  %v1811_v31 = vand.u32 4294901760, %v1810_v47 }
  0x8b   : > { %v1983_v18 = vand.u32 4294901760, %v1982_v22 }
  0x8c   : > { %v1812_v48 = vsub.f32 %v1810_v47, %v1811_v31 }
  0x8e   : > { %v1813_v21 = vand.u32 4294901760, %v1812_v48 }
  0x8f   : > { %1548 = vmatmul.f32.vlgmr.msrb.gmra.mxu1 %v6539_v46  ;;  %1620 = vmatmul.f32.vlgmr.msra.gmra.mxu0 %v6539_v46 }
  0x90   : > { %1694 = vmatmul.f32.vlgmr.msra.gmra.mxu3 %v1663_v6  ;;  %1738 = vmatpush.xpose.msrb.mxu1 %v6534_v58  ;;  %v1956_v58 = vsub.f32 %v6362_v10, %v1955_v54 }
  0x91   : > { %1668 = vmatmul.f32.vlgmr.msra.gmra.mxu2 %v1667_v4  ;;  %1808 = vmatpush.xpose.msra.mxu0 %v1807_v59 }
  0x92   : > { %1861 = vmatpush.xpose.msra.mxu2 %v1834_v40  ;;  %1884 = vmatpush.xpose.msra.mxu3 %v1807_v59  ;;  %v1957_v7 = vand.u32 4294901760, %v1956_v58  ;;  %v6568_v40 = vand.u32 4294901760, %v563_v9 }
  0x94   : > { %v2272_v10 = vsub.f32 %v563_v9, %v6568_v40 }
  0x96   : > { %v2273_v4 = vand.u32 4294901760, %v2272_v10 }
  0x97   : > { %1642 = vmatmul.f32.vlgmr.msra.gmra.mxu1 %v6539_v46  ;;  %1718 = vmatmul.f32.vlgmr.msrb.gmra.mxu0 %v1664_v37  ;;  %v2126_v46 = vsub.f32 %v562_v36, %v2099_v28  ;;  %v1958_v37 = vsub.f32 %v1956_v58, %v1957_v7 }
  0x98   : > { %1788 = vmatmul.f32.vlgmr.msrb.gmra.mxu3 %v1663_v6  ;;  %1838 = vmatpush.xpose.msra.mxu1 %v1837_v60  ;;  %v565_v60 = vld.sshfl [vmem:[#allocation1 + $0x28] sm:$0xff pattern:$0x75316420] }
  0x99   : > { %1766 = vmatmul.f32.vlgmr.msrb.gmra.mxu2 %v1663_v6  ;;  %1910 = vmatpush.xpose.msrb.mxu0 %v1835_v38  ;;  %v6573_v6 = vand.u32 4294901760, %v6372_v13  ;;  %v2127_v49 = vand.u32 4294901760, %v2126_v46  ;;  %v1959_v38 = vand.u32 4294901760, %v1958_v37  ;;  %v6593_v36 = vand.u32 4294901760, %v565_v60 }
  0x9a   : > { %1954 = vmatpush.xpose.msrb.mxu2 %v6551_v55  ;;  %1984 = vmatpush.xpose.msrb.mxu3 %v1983_v18 }
  0x9b   : > { %v2564_v9 = vsub.f32 %v565_v60, %v6593_v36  ;;  %v567_v60 = vld.sshfl [vmem:[#allocation1 + $0x38] sm:$0xff pattern:$0x75316420] }
  0x9f   : > { %1742 = vmatmul.f32.vlgmr.msrb.gmra.mxu1 %v1665_v25  ;;  %1814 = vmatmul.f32.vlgmr.msra.gmra.mxu0 %v1813_v21  ;;  %v2128_v25 = vsub.f32 %v2126_v46, %v2127_v49 }
  0xa0   : > { %1888 = vmatmul.f32.vlgmr.msra.gmra.mxu3 %v1811_v31  ;;  %1932 = vmatpush.xpose.msrb.mxu1 %v1807_v59  ;;  %v2102_v59 = vsub.f32 %v6372_v13, %v6573_v6  ;;  %v564_v13 = vld.sshfl [vmem:[#allocation1 + $0x20] sm:$0xff pattern:$0x75316420] }
  0xa1   : > { %1864 = vmatmul.f32.vlgmr.msra.gmra.mxu2 %v1810_v47  ;;  %2007 = vmatpush.xpose.msra.mxu0 %v1980_v34  ;;  %v2274_v34 = vsub.f32 %v2272_v10, %v2273_v4  ;;  %v2129_v47 = vand.u32 4294901760, %v2128_v25  ;;  %570 = vst [vmem:[#allocation1 + $0x20] ss:$2 sm:$0xff] %v6417_v32  ;;  %v6590_v48 = vand.u32 4294901760, %v564_v13 }
  0xa2   : > { %2056 = vmatpush.xpose.msra.mxu2 %v1981_v63  ;;  %2078 = vmatpush.xpose.msra.mxu3 %v6551_v55  ;;  %v2103_v63 = vand.u32 4294901760, %v2102_v59 }
  0xa3   : > { %v2275_v22 = vand.u32 4294901760, %v2274_v34 }
  0xa4   : > { %v2104_v31 = vsub.f32 %v2102_v59, %v2103_v63 }
  0xa6   : > { %v2105_v18 = vand.u32 4294901760, %v2104_v31 }
  0xa7   : > { %1840 = vmatmul.f32.vlgmr.msra.gmra.mxu1 %v6556_v56  ;;  %1912 = vmatmul.f32.vlgmr.msrb.gmra.mxu0 %v6556_v56 }
  0xa8   : > { %1986 = vmatmul.f32.vlgmr.msrb.gmra.mxu3 %v1955_v54  ;;  %2030 = vmatpush.xpose.msra.mxu1 %v6551_v55  ;;  %v6587_v55 = vsub.f32 %v6374_v14, %v6581_v62 }
  0xa9   : > { %1960 = vmatmul.f32.vlgmr.msrb.gmra.mxu2 %v1959_v38  ;;  %2100 = vmatpush.xpose.msrb.mxu0 %v2099_v28 }
  0xaa   : > { %2153 = vmatpush.xpose.msrb.mxu2 %v2126_v46  ;;  %2176 = vmatpush.xpose.msrb.mxu3 %v2099_v28 }
  0xaf   : > { %1934 = vmatmul.f32.vlgmr.msrb.gmra.mxu1 %v6556_v56  ;;  %2010 = vmatmul.f32.vlgmr.msra.gmra.mxu0 %v1956_v58  ;;  %v2249_v56 = vand.u32 4294901760, %v6587_v55  ;;  %v6602_v58 = vand.u32 4294901760, %v6419_v33 }
  0xb0   : > { %2080 = vmatmul.f32.vlgmr.msra.gmra.mxu3 %v1955_v54  ;;  %2130 = vmatpush.xpose.msrb.mxu1 %v2129_v47 }
  0xb1   : > { %2058 = vmatmul.f32.vlgmr.msra.gmra.mxu2 %v1955_v54  ;;  %2202 = vmatpush.xpose.msra.mxu0 %v2127_v49  ;;  %v2418_v54 = vsub.f32 %v564_v13, %v6590_v48  ;;  %v2250_v14 = vsub.f32 %v6587_v55, %v2249_v56  ;;  %v2394_v37 = vsub.f32 %v6419_v33, %v6602_v58  ;;  %v6613_v33 = vand.u32 4294901760, %v6421_v35  ;;  %v566_v13 = vld.sshfl [vmem:[#allocation1 + $0x30] sm:$0xff pattern:$0x75316420] }
  0xb2   : > { %2246 = vmatpush.xpose.msra.mxu2 %v6568_v40  ;;  %2276 = vmatpush.xpose.msra.mxu3 %v2275_v22  ;;  %571 = vst [vmem:[#allocation1 + $0x30] ss:$2 sm:$0xff] %v6479_v45 }
  0xb3   : > { %v2251_v46 = vand.u32 4294901760, %v2250_v14 }
  0xb7   : > { %2034 = vmatmul.f32.vlgmr.msra.gmra.mxu1 %v1957_v7  ;;  %2106 = vmatmul.f32.vlgmr.msrb.gmra.mxu0 %v2105_v18  ;;  %v2419_v7 = vand.u32 4294901760, %v2418_v54 }
  0xb8   : > { %2180 = vmatmul.f32.vlgmr.msrb.gmra.mxu3 %v2103_v63  ;;  %2224 = vmatpush.xpose.msra.mxu1 %v2099_v28  ;;  %v2565_v28 = vand.u32 4294901760, %v2564_v9 }
  0xb9   : > { %2156 = vmatmul.f32.vlgmr.msrb.gmra.mxu2 %v2102_v59  ;;  %2299 = vmatpush.xpose.msrb.mxu0 %v2272_v10  ;;  %v2420_v10 = vsub.f32 %v2418_v54, %v2419_v7 }
  0xba   : > { %2348 = vmatpush.xpose.msrb.mxu2 %v2273_v4  ;;  %2370 = vmatpush.xpose.msrb.mxu3 %v6568_v40  ;;  %v2566_v49 = vsub.f32 %v2564_v9, %v2565_v28  ;;  %v2395_v4 = vand.u32 4294901760, %v2394_v37 }
  0xbb   : > { %v2421_v34 = vand.u32 4294901760, %v2420_v10 }
  0xbc   : > { %v647_v21 = vpop.f32.mrf.mxu0  ;;  %v2567_v22 = vand.u32 4294901760, %v2566_v49  ;;  %v2396_v31 = vsub.f32 %v2394_v37, %v2395_v4  ;;  %v6625_v49 = vand.u32 4294901760, %v566_v13 }
  0xbf   : > { %2132 = vmatmul.f32.vlgmr.msrb.gmra.mxu1 %v6573_v6  ;;  %2204 = vmatmul.f32.vlgmr.msra.gmra.mxu0 %v6573_v6 }
  0xc0   : > { %2278 = vmatmul.f32.vlgmr.msra.gmra.mxu3 %v6581_v62  ;;  %2322 = vmatpush.xpose.msrb.mxu1 %v6568_v40 }
  0xc1   : > { %2252 = vmatmul.f32.vlgmr.msra.gmra.mxu2 %v2251_v46  ;;  %2392 = vmatpush.xpose.msra.mxu0 %v6590_v48 }
  0xc2   : > { %2445 = vmatpush.xpose.msra.mxu2 %v2418_v54  ;;  %2468 = vmatpush.xpose.msra.mxu3 %v6590_v48  ;;  %v721_v38 = vpop.f32.mrf.mxu3  ;;  %v6622_v54 = vsub.f32 %v6421_v35, %v6613_v33  ;;  %v2710_v35 = vsub.f32 %v566_v13, %v6625_v49 }
  0xc4   : > { %v673_v59 = vpop.f32.mrf.mxu1  ;;  %v697_v25 = vpop.f32.mrf.mxu2 }
  0xc5   : > { %v674_v63 = vadd.f32 %v673_v59, %v647_v21  ;;  %v745_v47 = vpop.f32.mrf.mxu0  ;;  %v2397_v21 = vand.u32 4294901760, %v2396_v31 }
  0xc7   : > { %v698_v40 = vadd.f32 %v697_v25, %v674_v63  ;;  %2226 = vmatmul.f32.vlgmr.msra.gmra.mxu1 %v6573_v6  ;;  %2302 = vmatmul.f32.vlgmr.msrb.gmra.mxu0 %v6587_v55 }
  0xc8   : > { %2372 = vmatmul.f32.vlgmr.msrb.gmra.mxu3 %v6581_v62  ;;  %2422 = vmatpush.xpose.msra.mxu1 %v2421_v34 }
  0xc9   : > { %v722_v18 = vadd.f32 %v721_v38, %v698_v40  ;;  %2350 = vmatmul.f32.vlgmr.msrb.gmra.mxu2 %v6581_v62  ;;  %2494 = vmatpush.xpose.msrb.mxu0 %v2419_v7  ;;  %v2541_v38 = vand.u32 4294901760, %v6622_v54  ;;  %v6628_v62 = vand.u32 4294901760, %v567_v60  ;;  %v2711_v40 = vand.u32 4294901760, %v2710_v35 }
  0xca   : > { %2538 = vmatpush.xpose.msrb.mxu2 %v6593_v36  ;;  %2568 = vmatpush.xpose.msrb.mxu3 %v2567_v22 }
  0xcb   : > { %v746_v6 = vadd.f32 %v745_v47, %v722_v18  ;;  %v819_v14 = vpop.f32.mrf.mxu3  ;;  %v2542_v63 = vsub.f32 %v6622_v54, %v2541_v38  ;;  %v6639_v47 = vsub.f32 %v567_v60, %v6628_v62  ;;  %v2712_v60 = vsub.f32 %v2710_v35, %v2711_v40 }
  0xcc   : > { %v767_v46 = vpop.f32.mrf.mxu1  ;;  %v793_v10 = vpop.f32.mrf.mxu2 }
  0xcd   : > { %v768_v59 = vadd.f32 %v767_v46, %v746_v6  ;;  %v843_v25 = vpop.f32.mrf.mxu0  ;;  %v2543_v13 = vand.u32 4294901760, %v2542_v63  ;;  %v2857_v18 = vand.u32 4294901760, %v6639_v47 }
  0xcf   : > { %v794_v7 = vadd.f32 %v793_v10, %v768_v59  ;;  %2326 = vmatmul.f32.vlgmr.msrb.gmra.mxu1 %v2249_v56  ;;  %2398 = vmatmul.f32.vlgmr.msra.gmra.mxu0 %v2397_v21 }
  0xd0   : > { %2472 = vmatmul.f32.vlgmr.msra.gmra.mxu3 %v2395_v4  ;;  %2516 = vmatpush.xpose.msrb.mxu1 %v6590_v48  ;;  %v6642_v4 = vand.u32 4294901760, %v6484_v50 }
  0xd1   : > { %v820_v34 = vadd.f32 %v819_v14, %v794_v7  ;;  %2448 = vmatmul.f32.vlgmr.msra.gmra.mxu2 %v2394_v37  ;;  %2591 = vmatpush.xpose.msra.mxu0 %v2564_v9  ;;  %v2858_v14 = vsub.f32 %v6639_v47, %v2857_v18 }
  0xd2   : > { %2640 = vmatpush.xpose.msra.mxu2 %v2565_v28  ;;  %2662 = vmatpush.xpose.msra.mxu3 %v6593_v36  ;;  %v2686_v28 = vsub.f32 %v6484_v50, %v6642_v4  ;;  %v2713_v50 = vand.u32 4294901760, %v2712_v60 }
  0xd3   : > { %v844_v55 = vadd.f32 %v843_v25, %v820_v34  ;;  %v913_v56 = vpop.f32.mrf.mxu3  ;;  %v2859_v63 = vand.u32 4294901760, %v2858_v14 }
  0xd4   : > { %v867_v48 = vpop.f32.mrf.mxu1  ;;  %v891_v22 = vpop.f32.mrf.mxu2  ;;  %v2687_v10 = vand.u32 4294901760, %v2686_v28 }
  0xd5   : > { %v868_v37 = vadd.f32 %v867_v48, %v844_v55  ;;  %v939_v31 = vpop.f32.mrf.mxu0  ;;  %v573_v48 = vld.sshfl [vmem:[#allocation1 + $0x8] sm:$0xff pattern:$0x75316420] }
  0xd7   : > { %v892_v9 = vadd.f32 %v891_v22, %v868_v37  ;;  %2424 = vmatmul.f32.vlgmr.msra.gmra.mxu1 %v6602_v58  ;;  %2496 = vmatmul.f32.vlgmr.msrb.gmra.mxu0 %v6602_v58 }
  0xd8   : > { %2570 = vmatmul.f32.vlgmr.msrb.gmra.mxu3 %v6613_v33  ;;  %2614 = vmatpush.xpose.msra.mxu1 %v6593_v36  ;;  %v6655_v36 = vand.u32 4294901760, %v6486_v51 }
  0xd9   : > { %v914_v6 = vadd.f32 %v913_v56, %v892_v9  ;;  %2544 = vmatmul.f32.vlgmr.msrb.gmra.mxu2 %v2543_v13  ;;  %2684 = vmatpush.xpose.msrb.mxu0 %v6625_v49  ;;  %v572_v56 = vld.sshfl [vmem:[#allocation1] sm:$0xff pattern:$0x75316420] }
  0xda   : > { %2737 = vmatpush.xpose.msrb.mxu2 %v2710_v35  ;;  %2760 = vmatpush.xpose.msrb.mxu3 %v6625_v49  ;;  %v2688_v35 = vsub.f32 %v2686_v28, %v2687_v10  ;;  %580 = vst [vmem:[#allocation1] ss:$2 sm:$0xff] %v6378_v15  ;;  %v6664_v37 = vsub.f32 %v6486_v51, %v6655_v36 }
  0xdb   : > { %v940_v21 = vadd.f32 %v939_v31, %v914_v6  ;;  %v1013_v46 = vpop.f32.mrf.mxu3  ;;  %v6667_v6 = vand.u32 4294901760, %v572_v56 }
  0xdc   : > { %v965_v59 = vpop.f32.mrf.mxu1  ;;  %v989_v25 = vpop.f32.mrf.mxu2  ;;  %v2689_v13 = vand.u32 4294901760, %v2688_v35 }
  0xdd   : > { %v966_v7 = vadd.f32 %v965_v59, %v940_v21  ;;  %v1037_v34 = vpop.f32.mrf.mxu0  ;;  %v3002_v51 = vsub.f32 %v572_v56, %v6667_v6 }
  0xdf   : > { %v990_v55 = vadd.f32 %v989_v25, %v966_v7  ;;  %2518 = vmatmul.f32.vlgmr.msrb.gmra.mxu1 %v6602_v58  ;;  %2594 = vmatmul.f32.vlgmr.msra.gmra.mxu0 %v6622_v54 }
  0xe0   : > { %2664 = vmatmul.f32.vlgmr.msra.gmra.mxu3 %v6613_v33  ;;  %2714 = vmatpush.xpose.msrb.mxu1 %v2713_v50 }
  0xe1   : > { %v1014_v22 = vadd.f32 %v1013_v46, %v990_v55  ;;  %2642 = vmatmul.f32.vlgmr.msra.gmra.mxu2 %v6613_v33  ;;  %2786 = vmatpush.xpose.msra.mxu0 %v2711_v40  ;;  %v2833_v46 = vand.u32 4294901760, %v6664_v37  ;;  %v6670_v33 = vand.u32 4294901760, %v573_v48 }
  0xe2   : > { %2830 = vmatpush.xpose.msra.mxu2 %v6628_v62  ;;  %2860 = vmatpush.xpose.msra.mxu3 %v2859_v63 }
  0xe3   : > { %v1038_v58 = vadd.f32 %v1037_v34, %v1014_v22  ;;  %v1111_v31 = vpop.f32.mrf.mxu3  ;;  %v2834_v25 = vsub.f32 %v6664_v37, %v2833_v46  ;;  %v6682_v54 = vsub.f32 %v573_v48, %v6670_v33 }
  0xe4   : > { %v1059_v9 = vpop.f32.mrf.mxu1  ;;  %v1085_v60 = vpop.f32.mrf.mxu2 }
  0xe5   : > { %v1060_v14 = vadd.f32 %v1059_v9, %v1038_v58  ;;  %v1135_v21 = vpop.f32.mrf.mxu0  ;;  %v2835_v55 = vand.u32 4294901760, %v2834_v25  ;;  %v3149_v35 = vand.u32 4294901760, %v6682_v54  ;;  %v574_v25 = vld.sshfl [vmem:[#allocation1 + $0x10] sm:$0xff pattern:$0x75316420] }
  0xe7   : > { %v1086_v40 = vadd.f32 %v1085_v60, %v1060_v14  ;;  %2618 = vmatmul.f32.vlgmr.msra.gmra.mxu1 %v2541_v38  ;;  %2690 = vmatmul.f32.vlgmr.msrb.gmra.mxu0 %v2689_v13  ;;  %v3150_v22 = vsub.f32 %v6682_v54, %v3149_v35 }
  0xe8   : > { %2764 = vmatmul.f32.vlgmr.msrb.gmra.mxu3 %v2687_v10  ;;  %2808 = vmatpush.xpose.msra.mxu1 %v6625_v49  ;;  %v6685_v49 = vand.u32 4294901760, %v6380_v16 }
  0xe9   : > { %v1112_v59 = vadd.f32 %v1111_v31, %v1086_v40  ;;  %2740 = vmatmul.f32.vlgmr.msrb.gmra.mxu2 %v2686_v28  ;;  %2883 = vmatpush.xpose.msrb.mxu0 %v6639_v47  ;;  %v3003_v28 = vand.u32 4294901760, %v3002_v51  ;;  %v3151_v40 = vand.u32 4294901760, %v3150_v22 }
  0xea   : > { %2932 = vmatpush.xpose.msrb.mxu2 %v2857_v18  ;;  %2954 = vmatpush.xpose.msrb.mxu3 %v6628_v62  ;;  %v2978_v18 = vsub.f32 %v6380_v16, %v6685_v49 }
  0xeb   : > { %v1136_v38 = vadd.f32 %v1135_v21, %v1112_v59  ;;  %v1205_v10 = vpop.f32.mrf.mxu3  ;;  %v3004_v56 = vsub.f32 %v3002_v51, %v3003_v28 }
  0xec   : > { %v1159_v50 = vpop.f32.mrf.mxu1  ;;  %v1183_v7 = vpop.f32.mrf.mxu2  ;;  %v2979_v13 = vand.u32 4294901760, %v2978_v18 }
  0xed   : > { %v1160_v34 = vadd.f32 %v1159_v50, %v1136_v38  ;;  %v1231_v63 = vpop.f32.mrf.mxu0  ;;  %v3005_v16 = vand.u32 4294901760, %v3004_v56  ;;  %v575_v38 = vld.sshfl [vmem:[#allocation1 + $0x18] sm:$0xff pattern:$0x75316420] }
  0xee   : > { %581 = vst [vmem:[#allocation1 + $0x10] ss:$2 sm:$0xff] %v6388_v19 }
  0xef   : > { %v1184_v47 = vadd.f32 %v1183_v7, %v1160_v34  ;;  %2716 = vmatmul.f32.vlgmr.msrb.gmra.mxu1 %v6642_v4  ;;  %2788 = vmatmul.f32.vlgmr.msra.gmra.mxu0 %v6642_v4 }
  0xf0   : > { %2862 = vmatmul.f32.vlgmr.msra.gmra.mxu3 %v6655_v36  ;;  %2906 = vmatpush.xpose.msrb.mxu1 %v6628_v62  ;;  %v6698_v62 = vand.u32 4294901760, %v6382_v17 }
  0xf1   : > { %v1206_v48 = vadd.f32 %v1205_v10, %v1184_v47  ;;  %2836 = vmatmul.f32.vlgmr.msra.gmra.mxu2 %v2835_v55  ;;  %2976 = vmatpush.xpose.msra.mxu0 %v6667_v6  ;;  %v6710_v47 = vand.u32 4294901760, %v574_v25 }
  0xf2   : > { %3029 = vmatpush.xpose.msra.mxu2 %v3002_v51  ;;  %3052 = vmatpush.xpose.msra.mxu3 %v6667_v6  ;;  %v2980_v51 = vsub.f32 %v2978_v18, %v2979_v13  ;;  %v6707_v50 = vsub.f32 %v6382_v17, %v6698_v62 }
  0xf3   : > { %v1232_v58 = vadd.f32 %v1231_v63, %v1206_v48  ;;  %v1305_v31 = vpop.f32.mrf.mxu3  ;;  %v3294_v17 = vsub.f32 %v574_v25, %v6710_v47 }
  0xf4   : > { %v1257_v9 = vpop.f32.mrf.mxu1  ;;  %v1281_v60 = vpop.f32.mrf.mxu2  ;;  %v2981_v34 = vand.u32 4294901760, %v2980_v51  ;;  %v3125_v22 = vand.u32 4294901760, %v6707_v50 }
  0xf5   : > { %v1258_v14 = vadd.f32 %v1257_v9, %v1232_v58  ;;  %v1329_v21 = vpop.f32.mrf.mxu0 }
  0xf7   : > { %v1282_v59 = vadd.f32 %v1281_v60, %v1258_v14  ;;  %2810 = vmatmul.f32.vlgmr.msra.gmra.mxu1 %v6642_v4  ;;  %2886 = vmatmul.f32.vlgmr.msrb.gmra.mxu0 %v6664_v37 }
  0xf8   : > { %2956 = vmatmul.f32.vlgmr.msrb.gmra.mxu3 %v6655_v36  ;;  %3006 = vmatpush.xpose.msra.mxu1 %v3005_v16 }
  0xf9   : > { %v1306_v10 = vadd.f32 %v1305_v31, %v1282_v59  ;;  %2934 = vmatmul.f32.vlgmr.msrb.gmra.mxu2 %v6655_v36  ;;  %3078 = vmatpush.xpose.msrb.mxu0 %v3003_v28  ;;  %v6713_v36 = vand.u32 4294901760, %v575_v38  ;;  %v3126_v31 = vsub.f32 %v6707_v50, %v3125_v22 }
  0xfa   : > { %3122 = vmatpush.xpose.msrb.mxu2 %v6670_v33  ;;  %3152 = vmatpush.xpose.msrb.mxu3 %v3151_v40 }
  0xfb   : > { %v1330_v4 = vadd.f32 %v1329_v21, %v1306_v10  ;;  %v1403_v7 = vpop.f32.mrf.mxu3  ;;  %v6725_v37 = vsub.f32 %v575_v38, %v6713_v36  ;;  %v3127_v21 = vand.u32 4294901760, %v3126_v31 }
  0xfc   : > { %v1351_v63 = vpop.f32.mrf.mxu1  ;;  %v1377_v55 = vpop.f32.mrf.mxu2 }
  0xfd   : > { %v1352_v56 = vadd.f32 %v1351_v63, %v1330_v4  ;;  %v1427_v48 = vpop.f32.mrf.mxu0  ;;  %v3441_v40 = vand.u32 4294901760, %v6725_v37 }
  0xff   : > { %v1378_v28 = vadd.f32 %v1377_v55, %v1352_v56  ;;  %2910 = vmatmul.f32.vlgmr.msrb.gmra.mxu1 %v2833_v46  ;;  %2982 = vmatmul.f32.vlgmr.msra.gmra.mxu0 %v2981_v34  ;;  %v3442_v25 = vsub.f32 %v6725_v37, %v3441_v40 }
 0x100   : > { %3056 = vmatmul.f32.vlgmr.msra.gmra.mxu3 %v2979_v13  ;;  %3100 = vmatpush.xpose.msrb.mxu1 %v6667_v6  ;;  %v6728_v6 = vand.u32 4294901760, %v6397_v23 }
 0x101   : > { %v1404_v58 = vadd.f32 %v1403_v7, %v1378_v28  ;;  %3032 = vmatmul.f32.vlgmr.msra.gmra.mxu2 %v2978_v18  ;;  %3175 = vmatpush.xpose.msra.mxu0 %v6682_v54  ;;  %v3295_v18 = vand.u32 4294901760, %v3294_v17  ;;  %v3443_v56 = vand.u32 4294901760, %v3442_v25 }
 0x102   : > { %3224 = vmatpush.xpose.msra.mxu2 %v3149_v35  ;;  %3246 = vmatpush.xpose.msra.mxu3 %v6670_v33  ;;  %v3270_v35 = vsub.f32 %v6397_v23, %v6728_v6 }
 0x103   : > { %v1428_v46 = vadd.f32 %v1427_v48, %v1404_v58  ;;  %v1497_v13 = vpop.f32.mrf.mxu3  ;;  %v3296_v59 = vsub.f32 %v3294_v17, %v3295_v18  ;;  %v577_v58 = vld.sshfl [vmem:[#allocation1 + $0x28] sm:$0xff pattern:$0x75316420] }
 0x104   : > { %v1451_v9 = vpop.f32.mrf.mxu1  ;;  %v1475_v60 = vpop.f32.mrf.mxu2  ;;  %v3271_v4 = vand.u32 4294901760, %v3270_v35 }
 0x105   : > { %v1452_v16 = vadd.f32 %v1451_v9, %v1428_v46  ;;  %v1523_v14 = vpop.f32.mrf.mxu0  ;;  %v3297_v23 = vand.u32 4294901760, %v3296_v59 }
 0x106   : > { %v3272_v28 = vsub.f32 %v3270_v35, %v3271_v4 }
 0x107   : > { %v1476_v54 = vadd.f32 %v1475_v60, %v1452_v16  ;;  %3008 = vmatmul.f32.vlgmr.msra.gmra.mxu1 %v6685_v49  ;;  %3080 = vmatmul.f32.vlgmr.msrb.gmra.mxu0 %v6685_v49 }
 0x108   : > { %3154 = vmatmul.f32.vlgmr.msrb.gmra.mxu3 %v6698_v62  ;;  %3198 = vmatpush.xpose.msra.mxu1 %v6670_v33  ;;  %v6741_v33 = vand.u32 4294901760, %v6399_v24  ;;  %v3273_v9 = vand.u32 4294901760, %v3272_v28 }
 0x109   : > { %v1498_v51 = vadd.f32 %v1497_v13, %v1476_v54  ;;  %3128 = vmatmul.f32.vlgmr.msrb.gmra.mxu2 %v3127_v21  ;;  %3268 = vmatpush.xpose.msrb.mxu0 %v6710_v47 }
 0x10a   : > { %3321 = vmatpush.xpose.msrb.mxu2 %v3294_v17  ;;  %3344 = vmatpush.xpose.msrb.mxu3 %v6710_v47  ;;  %v576_v17 = vld.sshfl [vmem:[#allocation1 + $0x20] sm:$0xff pattern:$0x75316420]  ;;  %v6750_v46 = vsub.f32 %v6399_v24, %v6741_v33 }
 0x10b   : > { %v1524_v38 = vadd.f32 %v1523_v14, %v1498_v51  ;;  %v1597_v10 = vpop.f32.mrf.mxu3  ;;  %582 = vst [vmem:[#allocation1 + $0x20] ss:$2 sm:$0xff] %v6438_v52  ;;  %v6753_v14 = vand.u32 4294901760, %v576_v17 }
 0x10c   : > { %v1549_v7 = vpop.f32.mrf.mxu1  ;;  %v1573_v34 = vpop.f32.mrf.mxu2  ;;  %v3417_v59 = vand.u32 4294901760, %v6750_v46 }
 0x10d   : > { %v1550_v63 = vadd.f32 %v1549_v7, %v1524_v38  ;;  %v1621_v55 = vpop.f32.mrf.mxu0  ;;  %v3586_v24 = vsub.f32 %v576_v17, %v6753_v14 }
 0x10e   : > { %v3418_v25 = vsub.f32 %v6750_v46, %v3417_v59 }
 0x10f   : > { %v1574_v48 = vadd.f32 %v1573_v34, %v1550_v63  ;;  %3102 = vmatmul.f32.vlgmr.msrb.gmra.mxu1 %v6685_v49  ;;  %3178 = vmatmul.f32.vlgmr.msra.gmra.mxu0 %v6707_v50 }
 0x110   : > { %3248 = vmatmul.f32.vlgmr.msra.gmra.mxu3 %v6698_v62  ;;  %3298 = vmatpush.xpose.msrb.mxu1 %v3297_v23  ;;  %v3419_v23 = vand.u32 4294901760, %v3418_v25 }
 0x111   : > { %v1598_v31 = vadd.f32 %v1597_v10, %v1574_v48  ;;  %3226 = vmatmul.f32.vlgmr.msra.gmra.mxu2 %v6698_v62  ;;  %3370 = vmatpush.xpose.msra.mxu0 %v3295_v18  ;;  %v6756_v62 = vand.u32 4294901760, %v577_v58 }
 0x112   : > { %3414 = vmatpush.xpose.msra.mxu2 %v6713_v36  ;;  %3444 = vmatpush.xpose.msra.mxu3 %v3443_v56 }
 0x113   : > { %v1622_v49 = vadd.f32 %v1621_v55, %v1598_v31  ;;  %v1695_v13 = vpop.f32.mrf.mxu3  ;;  %v6768_v50 = vsub.f32 %v577_v58, %v6756_v62 }
 0x114   : > { %v1643_v60 = vpop.f32.mrf.mxu1  ;;  %v1669_v16 = vpop.f32.mrf.mxu2 }
 0x115   : > { %v1644_v21 = vadd.f32 %v1643_v60, %v1622_v49  ;;  %v1719_v54 = vpop.f32.mrf.mxu0  ;;  %v3733_v63 = vand.u32 4294901760, %v6768_v50 }
 0x117   : > { %v1670_v18 = vadd.f32 %v1669_v16, %v1644_v21  ;;  %3202 = vmatmul.f32.vlgmr.msra.gmra.mxu1 %v3125_v22  ;;  %3274 = vmatmul.f32.vlgmr.msrb.gmra.mxu0 %v3273_v9  ;;  %v3734_v48 = vsub.f32 %v6768_v50, %v3733_v63 }
 0x118   : > { %3348 = vmatmul.f32.vlgmr.msrb.gmra.mxu3 %v3271_v4  ;;  %3392 = vmatpush.xpose.msra.mxu1 %v6710_v47  ;;  %v6771_v47 = vand.u32 4294901760, %v6441_v53 }
 0x119   : > { %v1696_v51 = vadd.f32 %v1695_v13, %v1670_v18  ;;  %3324 = vmatmul.f32.vlgmr.msrb.gmra.mxu2 %v3270_v35  ;;  %3467 = vmatpush.xpose.msrb.mxu0 %v6725_v37  ;;  %v3587_v35 = vand.u32 4294901760, %v3586_v24  ;;  %v3735_v60 = vand.u32 4294901760, %v3734_v48  ;;  %v579_v18 = vld.sshfl [vmem:[#allocation1 + $0x38] sm:$0xff pattern:$0x75316420] }
 0x11a   : > { %3516 = vmatpush.xpose.msrb.mxu2 %v3441_v40  ;;  %3538 = vmatpush.xpose.msrb.mxu3 %v6713_v36  ;;  %v3562_v40 = vsub.f32 %v6441_v53, %v6771_v47 }
 0x11b   : > { %v1720_v22 = vadd.f32 %v1719_v54, %v1696_v51  ;;  %v1789_v38 = vpop.f32.mrf.mxu3  ;;  %v3588_v55 = vsub.f32 %v3586_v24, %v3587_v35  ;;  %v578_v54 = vld.sshfl [vmem:[#allocation1 + $0x30] sm:$0xff pattern:$0x75316420] }
 0x11c   : > { %v1743_v10 = vpop.f32.mrf.mxu1  ;;  %v1767_v4 = vpop.f32.mrf.mxu2  ;;  %v3563_v58 = vand.u32 4294901760, %v3562_v40  ;;  %583 = vst [vmem:[#allocation1 + $0x30] ss:$2 sm:$0xff] %v6498_v61 }
 0x11d   : > { %v1744_v7 = vadd.f32 %v1743_v10, %v1720_v22  ;;  %v1815_v34 = vpop.f32.mrf.mxu0  ;;  %v3589_v49 = vand.u32 4294901760, %v3588_v55 }
 0x11e   : > { %v3564_v21 = vsub.f32 %v3562_v40, %v3563_v58 }
 0x11f   : > { %v1768_v37 = vadd.f32 %v1767_v4, %v1744_v7  ;;  %3300 = vmatmul.f32.vlgmr.msrb.gmra.mxu1 %v6728_v6  ;;  %3372 = vmatmul.f32.vlgmr.msra.gmra.mxu0 %v6728_v6  ;;  %v6805_v7 = vand.u32 4294901760, %v578_v54 }
 0x120   : > { %3446 = vmatmul.f32.vlgmr.msra.gmra.mxu3 %v6741_v33  ;;  %3490 = vmatpush.xpose.msrb.mxu1 %v6713_v36  ;;  %v6784_v36 = vand.u32 4294901760, %v6444_v57  ;;  %v3565_v22 = vand.u32 4294901760, %v3564_v21  ;;  %v6839_v21 = vld [vmem:[%s6794_s8 + $0x10] sm:$0xff] }
 0x121   : > { %v1790_v56 = vadd.f32 %v1789_v38, %v1768_v37  ;;  %3420 = vmatmul.f32.vlgmr.msra.gmra.mxu2 %v3419_v23  ;;  %3560 = vmatpush.xpose.msra.mxu0 %v6753_v14  ;;  %v6803_v38 = vld [vmem:[%s6794_s8] sm:$0xff]  ;;  %v6815_v55 = vsub.f32 %v578_v54, %v6805_v7  ;;  %7780 = vst [vmem:[#allocation9_spill] sm:$0xff] %v6839_v21 }
 0x122   : > { %3613 = vmatpush.xpose.msra.mxu2 %v3586_v24  ;;  %3636 = vmatpush.xpose.msra.mxu3 %v6753_v14 }
 0x123   : > { %v1816_v28 = vadd.f32 %v1815_v34, %v1790_v56  ;;  %v1889_v17 = vpop.f32.mrf.mxu3 }
 0x124   : > { %v1841_v31 = vpop.f32.mrf.mxu1  ;;  %v1865_v53 = vpop.f32.mrf.mxu2 }
 0x125   : > { %v1842_v13 = vadd.f32 %v1841_v31, %v1816_v28  ;;  %v1913_v9 = vpop.f32.mrf.mxu0 }
 0x127   : > { %v1866_v16 = vadd.f32 %v1865_v53, %v1842_v13  ;;  %3394 = vmatmul.f32.vlgmr.msra.gmra.mxu1 %v6728_v6  ;;  %3470 = vmatmul.f32.vlgmr.msrb.gmra.mxu0 %v6750_v46  ;;  %v6799_v6 = vsub.f32 %v6444_v57, %v6784_v36  ;;  %v7738_v57 = vperm.slane %v6803_v38, 1  ;;  %v3879_v53 = vand.u32 4294901760, %v6815_v55 }
 0x128   : > { %3540 = vmatmul.f32.vlgmr.msrb.gmra.mxu3 %v6741_v33  ;;  %3590 = vmatpush.xpose.msra.mxu1 %v3589_v49 }
 0x129   : > { %v1890_v24 = vadd.f32 %v1889_v17, %v1866_v16  ;;  %3518 = vmatmul.f32.vlgmr.msrb.gmra.mxu2 %v6741_v33  ;;  %3662 = vmatpush.xpose.msrb.mxu0 %v3587_v35  ;;  %v7743_v33 = vand.u32 4294901760, %v6799_v6  ;;  %v6808_v35 = vand.u32 4294901760, %v579_v18 }
 0x12a   : > { %3706 = vmatpush.xpose.msrb.mxu2 %v6756_v62  ;;  %3736 = vmatpush.xpose.msrb.mxu3 %v3735_v60 }
 0x12b   : > { %v1914_v51 = vadd.f32 %v1913_v9, %v1890_v24  ;;  %v1987_v25 = vpop.f32.mrf.mxu3  ;;  %v3710_v48 = vsub.f32 %v6799_v6, %v7743_v33  ;;  %v6823_v46 = vsub.f32 %v579_v18, %v6808_v35 }
 0x12c   : > { %v1935_v10 = vpop.f32.mrf.mxu1  ;;  %v1961_v4 = vpop.f32.mrf.mxu2 }
 0x12d   : > { %v1936_v34 = vadd.f32 %v1935_v10, %v1914_v51  ;;  %v2011_v23 = vpop.f32.mrf.mxu0  ;;  %v3711_v9 = vand.u32 4294901760, %v3710_v48  ;;  %v7740_v16 = vand.u32 4294901760, %v6823_v46  ;;  %v6851_v51 = vld [vmem:[%s6794_s8 + $0x18] sm:$0xff]  ;;  %v7742_v10 = vperm.slane %v6803_v38, 5 }
 0x12e   : > { %7781 = vst [vmem:[#allocation10_spill] sm:$0xff] %v6851_v51 }
 0x12f   : > { %v1962_v37 = vadd.f32 %v1961_v4, %v1936_v34  ;;  %3494 = vmatmul.f32.vlgmr.msrb.gmra.mxu1 %v3417_v59  ;;  %3566 = vmatmul.f32.vlgmr.msra.gmra.mxu0 %v3565_v22  ;;  %v6826_v59 = vld [vmem:[%s6794_s8 + $0x8] sm:$0xff]  ;;  %v3880_v4 = vsub.f32 %v6815_v55, %v3879_v53 }
 0x130   : > { %3640 = vmatmul.f32.vlgmr.msra.gmra.mxu3 %v3563_v58  ;;  %3684 = vmatpush.xpose.msrb.mxu1 %v6753_v14  ;;  %7779 = vst [vmem:[#allocation8_spill] sm:$0xff] %v6826_v59  ;;  %v7739_v14 = vperm.slane %v6803_v38, 0  ;;  %v6832_v58 = vand.u32 4294901760, %v6502_v43  ;;  %v7736_v60 = vperm.slane %v6826_v59, 1  ;;  %v7746_v48 = vperm.slane %v6826_v59, 3 }
 0x131   : > { %v1988_v56 = vadd.f32 %v1987_v25, %v1962_v37  ;;  %3616 = vmatmul.f32.vlgmr.msra.gmra.mxu2 %v3562_v40  ;;  %3759 = vmatpush.xpose.msra.mxu0 %v6768_v50  ;;  %v5336_v40 = vrot.slane %v7738_v57, 4  ;;  %v7737_v50 = vperm.slane %v6803_v38, 3  ;;  %v7741_v25 = vperm.slane %v6803_v38, 2  ;;  %v6900_v34 = vld.sshfl [vmem:[#allocation1 + $0x8] sm:$0xff pattern:$0x75316420] }
 0x132   : > { %3808 = vmatpush.xpose.msra.mxu2 %v3733_v63  ;;  %3830 = vmatpush.xpose.msra.mxu3 %v6756_v62  ;;  %v6848_v24 = vsub.f32 %v6502_v43, %v6832_v58  ;;  %v7747_v43 = vperm.slane %v6826_v59, 0  ;;  %v7744_v37 = vperm.slane %v6839_v21, 1  ;;  %v3881_v57 = vand.u32 4294901760, %v3880_v4 }
 0x133   : > { %v2012_v28 = vadd.f32 %v2011_v23, %v1988_v56  ;;  %v2081_v17 = vpop.f32.mrf.mxu3  ;;  %v5353_v54 = vsel %vm5352_vm0, %v7739_v14, %v5336_v40  ;;  %v5337_v22 = vrot.slane %v7737_v50, 4  ;;  %v5340_v56 = vrot.slane %v7736_v60, 4 }
 0x134   : > { %v2035_v63 = vpop.f32.mrf.mxu1  ;;  %v2059_v31 = vpop.f32.mrf.mxu2  ;;  %v7745_v40 = vperm.slane %v6851_v51, 1 }
 0x135   : > { %v2036_v49 = vadd.f32 %v2035_v63, %v2012_v28  ;;  %v2107_v13 = vpop.f32.mrf.mxu0  ;;  %v5385_v28 = vmul.f32 %v5353_v54, %v6338_v0  ;;  %v7748_v54 = vperm.slane %v6803_v38, 7 }
 0x137   : > { %v2060_v18 = vadd.f32 %v2059_v31, %v2036_v49  ;;  %3592 = vmatmul.f32.vlgmr.msra.gmra.mxu1 %v6771_v47  ;;  %3664 = vmatmul.f32.vlgmr.msrb.gmra.mxu0 %v6771_v47  ;;  %v7752_v31 = vand.u32 4294901760, %v6848_v24  ;;  %v5354_v49 = vsel %vm5352_vm0, %v7741_v25, %v5337_v22  ;;  %v5357_v22 = vsel %vm5352_vm0, %v7747_v43, %v5340_v56 }
 0x138   : > { %3738 = vmatmul.f32.vlgmr.msrb.gmra.mxu3 %v6784_v36  ;;  %3782 = vmatpush.xpose.msra.mxu1 %v6756_v62  ;;  %v4026_v62 = vsub.f32 %v6823_v46, %v7740_v16  ;;  %v6886_v16 = vand.u32 4294901760, %v6504_v44  ;;  %v7750_v25 = vperm.slane %v6826_v59, 2  ;;  %v5386_v4 = vmul.f32 %v5354_v49, %v6342_v1 }
 0x139   : > { %v2082_v23 = vadd.f32 %v2081_v17, %v2060_v18  ;;  %3712 = vmatmul.f32.vlgmr.msrb.gmra.mxu2 %v3711_v9  ;;  %3852 = vmatpush.xpose.msrb.mxu0 %v6805_v7  ;;  %v7749_v9 = vperm.slane %v6803_v38, 4  ;;  %v5338_v18 = vrot.slane %v7742_v10, 4  ;;  %v5341_v10 = vrot.slane %v7746_v48, 4 }
 0x13a   : > { %3905 = vmatpush.xpose.msrb.mxu2 %v6815_v55  ;;  %3928 = vmatpush.xpose.msrb.mxu3 %v6805_v7  ;;  %v4027_v33 = vand.u32 4294901760, %v4026_v62  ;;  %v5344_v56 = vrot.slane %v7744_v37, 4  ;;  %v6906_v62 = vrot.slane %v7745_v40, 4  ;;  %v7753_v49 = vperm.slane %v6803_v38, 6 }
 0x13b   : > { %v2108_v17 = vadd.f32 %v2107_v13, %v2082_v23  ;;  %v2181_v63 = vpop.f32.mrf.mxu3  ;;  %v6921_v40 = vsub.f32 %v6504_v44, %v6886_v16  ;;  %v7755_v48 = vperm.slane %v6839_v21, 3  ;;  %v5358_v44 = vsel %vm5352_vm0, %v7750_v25, %v5341_v10 }
 0x13c   : > { %v2133_v60 = vpop.f32.mrf.mxu1  ;;  %v2157_v50 = vpop.f32.mrf.mxu2  ;;  %v5390_v55 = vmul.f32 %v5358_v44, %v6350_v5  ;;  %v6979_v44 = vand.u32 4294901760, %v6404_v26 }
 0x13d   : > { %v2134_v13 = vadd.f32 %v2133_v60, %v2108_v17  ;;  %v2205_v23 = vpop.f32.mrf.mxu0  ;;  %v3856_v60 = vsub.f32 %v6848_v24, %v7752_v31  ;;  %v584_v17 = vld.sshfl [vmem:[#allocation1] sm:$0xff pattern:$0x75316420] }
 0x13e   : > { %5417 = vst [vmem:[#allocation1] ss:$2 sm:$0xff] %v5385_v28  ;;  %v6940_v28 = vand.u32 4294901760, %v584_v17 }
 0x13f   : > { %v2158_v14 = vadd.f32 %v2157_v50, %v2134_v13  ;;  %3686 = vmatmul.f32.vlgmr.msrb.gmra.mxu1 %v6771_v47  ;;  %3762 = vmatmul.f32.vlgmr.msra.gmra.mxu0 %v6799_v6  ;;  %v7751_v50 = vperm.slane %v6826_v59, 5  ;;  %v5355_v47 = vsel %vm5352_vm0, %v7749_v9, %v5338_v18  ;;  %v5339_v13 = vrot.slane %v7748_v54, 4  ;;  %v6923_v18 = vld.sshfl [vmem:[#allocation1 + $0x10] sm:$0xff pattern:$0x75316420] }
 0x140   : > { %3832 = vmatmul.f32.vlgmr.msra.gmra.mxu3 %v6784_v36  ;;  %3882 = vmatpush.xpose.msrb.mxu1 %v3881_v57  ;;  %v5389_v57 = vmul.f32 %v5357_v22, %v6346_v2  ;;  %v5387_v54 = vmul.f32 %v5355_v47, %v6369_v12  ;;  %v6951_v47 = vld.sshfl [vmem:[#allocation1 + $0x28] sm:$0xff pattern:$0x75316420] }
 0x141   : > { %v2182_v37 = vadd.f32 %v2181_v63, %v2158_v14  ;;  %3810 = vmatmul.f32.vlgmr.msra.gmra.mxu2 %v6784_v36  ;;  %3954 = vmatpush.xpose.msra.mxu0 %v3879_v53  ;;  %v6930_v36 = vld.sshfl [vmem:[#allocation1 + $0x18] sm:$0xff pattern:$0x75316420]  ;;  %v3857_v63 = vand.u32 4294901760, %v3856_v60  ;;  %v5342_v22 = vrot.slane %v7751_v50, 4  ;;  %v5356_v10 = vsel %vm5352_vm0, %v7753_v49, %v5339_v13 }
 0x142   : > { %3998 = vmatpush.xpose.msra.mxu2 %v6808_v35  ;;  %4028 = vmatpush.xpose.msra.mxu3 %v4027_v33  ;;  %5419 = vst [vmem:[#allocation1 + $0x10] ss:$2 sm:$0xff] %v5386_v4  ;;  %v6947_v4 = vand.u32 4294901760, %v6900_v34  ;;  %v6949_v60 = vld.sshfl [vmem:[#allocation1 + $0x20] sm:$0xff pattern:$0x75316420]  ;;  %v5388_v41 = vmul.f32 %v5356_v10, %v6429_v42 }
 0x143   : > { %v2206_v14 = vadd.f32 %v2205_v23, %v2182_v37  ;;  %v2279_v53 = vpop.f32.mrf.mxu3  ;;  %v7782_v50 = vperm.slane %v6839_v21, 0  ;;  %v7783_v13 = vand.u32 4294901760, %v6799_v6  ;;  %v5345_v49 = vrot.slane %v7755_v48, 4  ;;  %5421 = vst [vmem:[#allocation1 + $0x20] ss:$2 sm:$0xff] %v5387_v54 }
 0x144   : > { %v2227_v33 = vpop.f32.mrf.mxu1  ;;  %v2253_v43 = vpop.f32.mrf.mxu2  ;;  %v6971_v6 = vsub.f32 %v584_v17, %v6940_v28  ;;  %v7789_v54 = vperm.slane %v6826_v59, 7 }
 0x145   : > { %v2228_v25 = vadd.f32 %v2227_v33, %v2206_v14  ;;  %v2303_v37 = vpop.f32.mrf.mxu0  ;;  %v5361_v9 = vsel %vm5352_vm0, %v7782_v50, %v5344_v56  ;;  %v6959_v14 = vld.sshfl [vmem:[#allocation1] sm:$0xff pattern:$0x75316420]  ;;  %v6961_v33 = vld.sshfl [vmem:[#allocation1 + $0x8] sm:$0xff pattern:$0x75316420] }
 0x146   : > { %v7784_v56 = vand.u32 4294901760, %v6848_v24  ;;  %5432 = vst [vmem:[#allocation1] ss:$2 sm:$0xff] %v5389_v57  ;;  %v7788_v57 = vperm.slane %v6826_v59, 4  ;;  %v5343_v10 = vrot.slane %v7789_v54, 4  ;;  %v7010_v54 = vsub.f32 %v6404_v26, %v6979_v44 }
 0x147   : > { %v2254_v31 = vadd.f32 %v2253_v43, %v2228_v25  ;;  %3786 = vmatmul.f32.vlgmr.msra.gmra.mxu1 %v7783_v13  ;;  %3858 = vmatmul.f32.vlgmr.msrb.gmra.mxu0 %v3857_v63  ;;  %v7785_v43 = vand.u32 4294901760, %v6921_v40  ;;  %v6981_v63 = vld.sshfl [vmem:[#allocation1 + $0x30] sm:$0xff pattern:$0x75316420] }
 0x148   : > { %3932 = vmatmul.f32.vlgmr.msrb.gmra.mxu3 %v7784_v56  ;;  %3976 = vmatpush.xpose.msra.mxu1 %v6805_v7  ;;  %7786 = vst [vmem:[#allocation11_spill] sm:$0xff] %v6981_v63  ;;  %v7787_v7 = vand.u32 4294901760, %v6823_v46  ;;  %v6999_v56 = vld.sshfl [vmem:[#allocation1 + $0x38] sm:$0xff pattern:$0x75316420]  ;;  %v7793_v63 = vperm.slane %v6826_v59, 6 }
 0x149   : > { %v2280_v25 = vadd.f32 %v2279_v53, %v2254_v31  ;;  %3908 = vmatmul.f32.vlgmr.msrb.gmra.mxu2 %v6848_v24  ;;  %v4002_v50 = vsub.f32 %v6921_v40, %v7785_v43  ;;  %4051 = vmatpush.xpose.msrb.mxu0 %v6823_v46  ;;  %v6988_v24 = vsub.f32 %v6900_v34, %v6947_v4  ;;  %v6990_v31 = vld.sshfl [vmem:[#allocation1 + $0x10] sm:$0xff pattern:$0x75316420]  ;;  %v6992_v17 = vld.sshfl [vmem:[#allocation1 + $0x18] sm:$0xff pattern:$0x75316420] }
 0x14a   : > { %4100 = vmatpush.xpose.msrb.mxu2 %v7787_v7  ;;  %4122 = vmatpush.xpose.msrb.mxu3 %v6808_v35  ;;  %v5359_v53 = vsel %vm5352_vm0, %v7788_v57, %v5342_v22  ;;  %5433 = vst [vmem:[#allocation1 + $0x10] ss:$2 sm:$0xff] %v5390_v55  ;;  %v5393_v43 = vmul.f32 %v5361_v9, %v6358_v8  ;;  %v7791_v22 = vperm.slane %v6839_v21, 2  ;;  %v7792_v9 = vperm.slane %v6851_v51, 3 }
 0x14b   : > { %v2304_v13 = vadd.f32 %v2303_v37, %v2280_v25  ;;  %v2373_v46 = vpop.f32.mrf.mxu3  ;;  %7790 = vst [vmem:[#allocation12_spill] sm:$0xff] %v6999_v56  ;;  %v4003_v55 = vand.u32 4294901760, %v4002_v50  ;;  %v5391_v56 = vmul.f32 %v5359_v53, %v6391_v20 }
 0x14c   : > { %v2327_v48 = vpop.f32.mrf.mxu1  ;;  %v2351_v23 = vpop.f32.mrf.mxu2  ;;  %5423 = vst [vmem:[#allocation1 + $0x30] ss:$2 sm:$0xff] %v5388_v41  ;;  %v5362_v57 = vsel %vm5352_vm0, %v7791_v22, %v5345_v49  ;;  %v5349_v34 = vrot.slane %v7792_v9, 4  ;;  %v7760_v41 = vand.u32 4294901760, %v6988_v24  ;;  %v5360_v49 = vsel %vm5352_vm0, %v7793_v63, %v5343_v10 }
 0x14d   : > { %v2328_v37 = vadd.f32 %v2327_v48, %v2304_v13  ;;  %v2399_v25 = vpop.f32.mrf.mxu0  ;;  %v7022_v26 = vld.sshfl [vmem:[#allocation1] sm:$0xff pattern:$0x75316420]  ;;  %v7024_v50 = vld.sshfl [vmem:[#allocation1 + $0x8] sm:$0xff pattern:$0x75316420]  ;;  %v5394_v13 = vmul.f32 %v5362_v57, %v6366_v11 }
 0x14e   : > { %7794 = vst [vmem:[#allocation13_spill] sm:$0xff] %v7022_v26  ;;  %v7796_v22 = vperm.slane %v6839_v21, 5  ;;  %v7797_v63 = vand.u32 4294901760, %v6971_v6  ;;  %v7034_v10 = vld.sshfl [vmem:[#allocation1 + $0x20] sm:$0xff pattern:$0x75316420] }
 0x14f   : > { %v2352_v48 = vadd.f32 %v2351_v23, %v2328_v37  ;;  %3884 = vmatmul.f32.vlgmr.msrb.gmra.mxu1 %v6832_v58  ;;  %3956 = vmatmul.f32.vlgmr.msra.gmra.mxu0 %v6832_v58  ;;  %7795 = vst [vmem:[#allocation14_spill] sm:$0xff] %v7024_v50  ;;  %v7798_v37 = vperm.slane %v6851_v51, 0  ;;  %v7801_v57 = vperm.slane %v6851_v51, 2 }
 0x150   : > { %v5346_v53 = vrot.slane %v7796_v22, 4  ;;  %4030 = vmatmul.f32.vlgmr.msra.gmra.mxu3 %v6886_v16  ;;  %4074 = vmatpush.xpose.msrb.mxu1 %v6808_v35  ;;  %v4172_v23 = vsub.f32 %v6971_v6, %v7797_v63  ;;  %5444 = vst [vmem:[#allocation1] ss:$2 sm:$0xff] %v5393_v43  ;;  %v7043_v22 = vld.sshfl [vmem:[#allocation1 + $0x28] sm:$0xff pattern:$0x75316420]  ;;  %v5392_v43 = vmul.f32 %v5360_v49, %v6457_v3 }
 0x151   : > { %v5365_v9 = vsel %vm5352_vm0, %v7798_v37, %v6906_v62  ;;  %v2374_v7 = vadd.f32 %v2373_v46, %v2352_v48  ;;  %4004 = vmatmul.f32.vlgmr.msra.gmra.mxu2 %v4003_v55  ;;  %4144 = vmatpush.xpose.msra.mxu0 %v6940_v28  ;;  %v4318_v62 = vsub.f32 %v6988_v24, %v7760_v41  ;;  %v7052_v46 = vld.sshfl [vmem:[#allocation1 + $0x10] sm:$0xff pattern:$0x75316420]  ;;  %v7056_v35 = vand.u32 4294901760, %v6406_v27 }
 0x152   : > { %4197 = vmatpush.xpose.msra.mxu2 %v6971_v6  ;;  %4220 = vmatpush.xpose.msra.mxu3 %v6940_v28  ;;  %7799 = vst [vmem:[#allocation15_spill] sm:$0xff] %v7052_v46  ;;  %v7058_v63 = vld.sshfl [vmem:[#allocation1 + $0x18] sm:$0xff pattern:$0x75316420]  ;;  %v5397_v49 = vmul.f32 %v5365_v9, %v6378_v15  ;;  %v5366_v59 = vsel %vm5352_vm0, %v7801_v57, %v5349_v34  ;;  %v7802_v41 = vperm.slane %v6839_v21, 4  ;;  %v4173_v55 = vand.u32 4294901760, %v4172_v23 }
 0x153   : > { %5434 = vst [vmem:[#allocation1 + $0x20] ss:$2 sm:$0xff] %v5391_v56  ;;  %v2400_v48 = vadd.f32 %v2399_v25, %v2374_v7  ;;  %v2473_v37 = vpop.f32.mrf.mxu3  ;;  %v7067_v7 = vld.sshfl [vmem:[#allocation1 + $0x30] sm:$0xff pattern:$0x75316420]  ;;  %v7803_v25 = vperm.slane %v6839_v21, 7 }
 0x154   : > { %7800 = vst [vmem:[#allocation16_spill] sm:$0xff] %v7058_v63  ;;  %v5363_v46 = vsel %vm5352_vm0, %v7802_v41, %v5346_v53  ;;  %v2425_v56 = vpop.f32.mrf.mxu1  ;;  %v2449_v50 = vpop.f32.mrf.mxu2  ;;  %v7804_v9 = vand.u32 4294901760, %v7010_v54  ;;  %v7075_v34 = vand.u32 4294901760, %v6923_v18  ;;  %v7077_v57 = vld.sshfl [vmem:[#allocation1 + $0x38] sm:$0xff pattern:$0x75316420] }
 0x155   : > { %5445 = vst [vmem:[#allocation1 + $0x10] ss:$2 sm:$0xff] %v5394_v13  ;;  %v5347_v26 = vrot.slane %v7803_v25, 4  ;;  %v2426_v63 = vadd.f32 %v2425_v56, %v2400_v48  ;;  %v2497_v11 = vpop.f32.mrf.mxu0  ;;  %v7805_v13 = vperm.slane %v6851_v51, 5  ;;  %v4319_v23 = vand.u32 4294901760, %v4318_v62 }
 0x156   : > { %v4148_v15 = vsub.f32 %v7010_v54, %v7804_v9  ;;  %5435 = vst [vmem:[#allocation1 + $0x30] ss:$2 sm:$0xff] %v5392_v43  ;;  %v5398_v25 = vmul.f32 %v5366_v59, %v6388_v19  ;;  %v5395_v3 = vmul.f32 %v5363_v46, %v6417_v32  ;;  %v7766_v41 = vperm.slane %v6851_v51, 7 }
 0x157   : > { %v5350_v53 = vrot.slane %v7805_v13, 4  ;;  %v2450_v48 = vadd.f32 %v2449_v50, %v2426_v63  ;;  %3978 = vmatmul.f32.vlgmr.msra.gmra.mxu1 %v6832_v58  ;;  %4054 = vmatmul.f32.vlgmr.msrb.gmra.mxu0 %v6921_v40  ;;  %v7085_v56 = vld.sshfl [vmem:[#allocation1] sm:$0xff pattern:$0x75316420]  ;;  %v7094_v59 = vsub.f32 %v6406_v27, %v7056_v35  ;;  %v7806_v58 = vperm.slane %v6839_v21, 6 }
 0x158   : > { %v7087_v9 = vld.sshfl [vmem:[#allocation1 + $0x8] sm:$0xff pattern:$0x75316420]  ;;  %4124 = vmatmul.f32.vlgmr.msrb.gmra.mxu3 %v6886_v16  ;;  %4174 = vmatpush.xpose.msra.mxu1 %v4173_v55  ;;  %v4149_v43 = vand.u32 4294901760, %v4148_v15  ;;  %v7807_v62 = vand.u32 4294901760, %v6971_v6  ;;  %v7104_v46 = vsub.f32 %v6923_v18, %v7075_v34  ;;  %v5351_v13 = vrot.slane %v7766_v41, 4 }
 0x159   : > { %5456 = vst [vmem:[#allocation1] ss:$2 sm:$0xff] %v5397_v49  ;;  %v5364_v50 = vsel %vm5352_vm0, %v7806_v58, %v5347_v26  ;;  %v2474_v63 = vadd.f32 %v2473_v37, %v2450_v48  ;;  %4102 = vmatmul.f32.vlgmr.msrb.gmra.mxu2 %v6886_v16  ;;  %4320 = vmatpush.xpose.msrb.mxu3 %v4319_v23  ;;  %v7808_v26 = vperm.slane %v6851_v51, 4 }
 0x15a   : > { %4246 = vmatpush.xpose.msrb.mxu0 %v7807_v62  ;;  %4290 = vmatpush.xpose.msrb.mxu2 %v6947_v4  ;;  %v7107_v27 = vld.sshfl [vmem:[#allocation1 + $0x20] sm:$0xff pattern:$0x75316420]  ;;  %v7109_v55 = vld.sshfl [vmem:[#allocation1 + $0x28] sm:$0xff pattern:$0x75316420]  ;;  %v5396_v23 = vmul.f32 %v5364_v50, %v6479_v45 }
 0x15b   : > { %v5367_v37 = vsel %vm5352_vm0, %v7808_v26, %v5350_v53  ;;  %v2498_v16 = vadd.f32 %v2497_v11, %v2474_v63  ;;  %v2571_v15 = vpop.f32.mrf.mxu3  ;;  %v7767_v62 = vand.u32 4294901760, %v7094_v59  ;;  %v7125_v63 = vand.u32 4294901760, %v6409_v29  ;;  %5446 = vst [vmem:[#allocation1 + $0x20] ss:$2 sm:$0xff] %v5395_v3 }
 0x15c   : > { %v7114_v49 = vld.sshfl [vmem:[#allocation1 + $0x10] sm:$0xff pattern:$0x75316420]  ;;  %v7116_v6 = vld.sshfl [vmem:[#allocation1 + $0x18] sm:$0xff pattern:$0x75316420]  ;;  %v2519_v48 = vpop.f32.mrf.mxu1  ;;  %v2545_v58 = vpop.f32.mrf.mxu2 }
 0x15d   : > { %7809 = vst [vmem:[#allocation17_spill] sm:$0xff] %v7116_v6  ;;  %v2520_v21 = vadd.f32 %v2519_v48, %v2498_v16  ;;  %v2595_v53 = vpop.f32.mrf.mxu0  ;;  %v7128_v26 = vand.u32 4294901760, %v6930_v36  ;;  %v7130_v18 = vld.sshfl [vmem:[#allocation1 + $0x30] sm:$0xff pattern:$0x75316420]  ;;  %v7810_v6 = vand.u32 4294901760, %v6921_v40  ;;  %v5399_v48 = vmul.f32 %v5367_v37, %v6438_v52 }
 0x15e   : > { %5457 = vst [vmem:[#allocation1 + $0x10] ss:$2 sm:$0xff] %v5398_v25  ;;  %v7132_v41 = vld.sshfl [vmem:[#allocation1 + $0x38] sm:$0xff pattern:$0x75316420]  ;;  %v7813_v11 = vand.u32 4294901760, %v7010_v54 }
 0x15f   : > { %v2546_v50 = vadd.f32 %v2545_v58, %v2520_v21  ;;  %4078 = vmatmul.f32.vlgmr.msrb.gmra.mxu1 %v7810_v6  ;;  %4150 = vmatmul.f32.vlgmr.msra.gmra.mxu0 %v4149_v43  ;;  %v7814_v3 = vperm.slane %v6851_v51, 6  ;;  %v4294_v43 = vsub.f32 %v7094_v59, %v7767_v62  ;;  %5447 = vst [vmem:[#allocation1 + $0x30] ss:$2 sm:$0xff] %v5396_v23  ;;  %v7170_v6 = vand.u32 4294901760, %v6411_v30 }
 0x160   : > { %v7136_v25 = vld.sshfl [vmem:[#allocation1] sm:$0xff pattern:$0x75316420]  ;;  %v7138_v16 = vld.sshfl [vmem:[#allocation1 + $0x8] sm:$0xff pattern:$0x75316420]  ;;  %4224 = vmatmul.f32.vlgmr.msra.gmra.mxu3 %v7813_v11  ;;  %4268 = vmatpush.xpose.msrb.mxu1 %v6940_v28 }
 0x161   : > { %7811 = vst [vmem:[#allocation18_spill] sm:$0xff] %v7136_v25  ;;  %v5368_v21 = vsel %vm5352_vm0, %v7814_v3, %v5351_v13  ;;  %v2572_v40 = vadd.f32 %v2571_v15, %v2546_v50  ;;  %4200 = vmatmul.f32.vlgmr.msra.gmra.mxu2 %v7010_v54  ;;  %4343 = vmatpush.xpose.msra.mxu0 %v6988_v24  ;;  %v7816_v28 = vand.u32 4294901760, %v7104_v46 }
 0x162   : > { %7812 = vst [vmem:[#allocation19_spill] sm:$0xff] %v7138_v16  ;;  %4414 = vmatpush.xpose.msra.mxu3 %v6947_v4  ;;  %v7163_v54 = vsub.f32 %v6409_v29, %v7125_v63  ;;  %v7167_v15 = vsub.f32 %v6930_v36, %v7128_v26  ;;  %v7177_v3 = vld.sshfl [vmem:[#allocation1 + $0x20] sm:$0xff pattern:$0x75316420]  ;;  %v5400_v29 = vmul.f32 %v5368_v21, %v6498_v61 }
 0x163   : > { %5711 = vst [vmem:[#allocation1] ss:$2 sm:$0xff] %v6338_v0  ;;  %v7815_v0 = vand.u32 4294901760, %v6988_v24  ;;  %v7159_v37 = vsub.f32 %v7104_v46, %v7816_v28  ;;  %v2596_v24 = vadd.f32 %v2595_v53, %v2572_v40  ;;  %v2665_v13 = vpop.f32.mrf.mxu3  ;;  %v4295_v28 = vand.u32 4294901760, %v4294_v43 }
 0x164   : > { %v2619_v11 = vpop.f32.mrf.mxu1  ;;  %v2643_v50 = vpop.f32.mrf.mxu2  ;;  %v7180_v62 = vld.sshfl [vmem:[#allocation1 + $0x28] sm:$0xff pattern:$0x75316420]  ;;  %v7770_v51 = vand.u32 4294901760, %v7167_v15 }
 0x165   : > { %4392 = vmatpush.xpose.msra.mxu2 %v7815_v0  ;;  %v7172_v23 = vld.sshfl [vmem:[#allocation1 + $0x10] sm:$0xff pattern:$0x75316420]  ;;  %v7174_v58 = vld.sshfl [vmem:[#allocation1 + $0x18] sm:$0xff pattern:$0x75316420]  ;;  %v2620_v0 = vadd.f32 %v2619_v11, %v2596_v24  ;;  %v2691_v36 = vpop.f32.mrf.mxu0 }
 0x166   : > { %7817 = vst [vmem:[#allocation20_spill] sm:$0xff] %v7172_v23  ;;  %v4465_v53 = vand.u32 4294901760, %v7159_v37  ;;  %v7193_v37 = vld.sshfl [vmem:[#allocation1 + $0x30] sm:$0xff pattern:$0x75316420] }
 0x167   : > { %7818 = vst [vmem:[#allocation21_spill] sm:$0xff] %v7174_v58  ;;  %v2644_v58 = vadd.f32 %v2643_v50, %v2620_v0  ;;  %4176 = vmatmul.f32.vlgmr.msra.gmra.mxu1 %v6979_v44  ;;  %4248 = vmatmul.f32.vlgmr.msrb.gmra.mxu0 %v6979_v44  ;;  %v7195_v24 = vld.sshfl [vmem:[#allocation1 + $0x38] sm:$0xff pattern:$0x75316420]  ;;  %v5500_v50 = vsel %vm5352_vm0, %v6959_v14, 0.0 }
 0x168   : > { %5713 = vst [vmem:[#allocation1 + $0x10] ss:$2 sm:$0xff] %v6342_v1  ;;  %v7189_v1 = vsub.f32 %v6411_v30, %v7170_v6  ;;  %4322 = vmatmul.f32.vlgmr.msrb.gmra.mxu3 %v7056_v35  ;;  %4366 = vmatpush.xpose.msra.mxu1 %v6947_v4  ;;  %v4610_v4 = vsub.f32 %v7167_v15, %v7770_v51 }
 0x169   : > { %5458 = vst [vmem:[#allocation1 + $0x20] ss:$2 sm:$0xff] %v5399_v48  ;;  %v2666_v48 = vadd.f32 %v2665_v13, %v2644_v58  ;;  %4296 = vmatmul.f32.vlgmr.msrb.gmra.mxu2 %v4295_v28  ;;  %4436 = vmatpush.xpose.msrb.mxu0 %v7075_v34  ;;  %v7208_v13 = vand.u32 4294901760, %v6949_v60  ;;  %v5501_v58 = vsel %vm5352_vm0, %v6961_v33, 0.0 }
 0x16a   : > { %v5718_v21 = vld.sshfl [vmem:[#allocation1] sm:$0xff pattern:$0x75316420]  ;;  %v5719_v43 = vld.sshfl [vmem:[#allocation1 + $0x8] sm:$0xff pattern:$0x75316420]  ;;  %4489 = vmatpush.xpose.msrb.mxu2 %v7104_v46  ;;  %4512 = vmatpush.xpose.msrb.mxu3 %v7075_v34  ;;  %v5502_v51 = vadd.f32 %v5501_v58, %v5500_v50 }
 0x16b   : > { %7819 = vst [vmem:[#allocation22_spill] sm:$0xff] %v7193_v37  ;;  %v5794_v11 = vsel %vm5352_vm0, %v5718_v21, 0.0  ;;  %v5795_v30 = vsel %vm5352_vm0, %v5719_v43, 0.0  ;;  %v2692_v14 = vadd.f32 %v2691_v36, %v2666_v48  ;;  %v2765_v0 = vpop.f32.mrf.mxu3  ;;  %v7217_v21 = vand.u32 4294901760, %v6470_v39 }
 0x16c   : > { %7820 = vst [vmem:[#allocation23_spill] sm:$0xff] %v7195_v24  ;;  %v2717_v40 = vpop.f32.mrf.mxu1  ;;  %v2741_v23 = vpop.f32.mrf.mxu2  ;;  %v5796_v16 = vadd.f32 %v5795_v30, %v5794_v11  ;;  %v7821_v50 = vand.u32 4294901760, %v7163_v54  ;;  %v4611_v37 = vand.u32 4294901760, %v4610_v4  ;;  %v5509_v4 = vsel %vm5352_vm0, %v7043_v22, 0.0 }
 0x16d   : > { %5459 = vst [vmem:[#allocation1 + $0x30] ss:$2 sm:$0xff] %v5400_v29  ;;  %v5503_v29 = vsel %vm5352_vm0, %v6990_v31, 0.0  ;;  %v5505_v31 = vsel %vm5352_vm0, %v6992_v17, 0.0  ;;  %v2718_v36 = vadd.f32 %v2717_v40, %v2692_v14  ;;  %v2789_v48 = vpop.f32.mrf.mxu0  ;;  %v7825_v22 = vperm.slane %v6803_v38, 0 }
 0x16e   : > { %5726 = vst [vmem:[#allocation1] ss:$2 sm:$0xff] %v6346_v2  ;;  %v7221_v2 = vsub.f32 %v6949_v60, %v7208_v13  ;;  %v5504_v24 = vadd.f32 %v5503_v29, %v5502_v51  ;;  %v4440_v58 = vsub.f32 %v7163_v54, %v7821_v50  ;;  %v7235_v60 = vsub.f32 %v6470_v39, %v7217_v21 }
 0x16f   : > { %v5720_v43 = vld.sshfl [vmem:[#allocation1 + $0x10] sm:$0xff pattern:$0x75316420]  ;;  %v5721_v11 = vld.sshfl [vmem:[#allocation1 + $0x18] sm:$0xff pattern:$0x75316420]  ;;  %v2742_v17 = vadd.f32 %v2741_v23, %v2718_v36  ;;  %4270 = vmatmul.f32.vlgmr.msrb.gmra.mxu1 %v6979_v44  ;;  %4346 = vmatmul.f32.vlgmr.msra.gmra.mxu0 %v7094_v59 }
 0x170   : > { %v5797_v33 = vsel %vm5352_vm0, %v5720_v43, 0.0  ;;  %v7226_v28 = vld.sshfl [vmem:[#allocation1 + $0x20] sm:$0xff pattern:$0x75316420]  ;;  %5727 = vst [vmem:[#allocation1 + $0x10] ss:$2 sm:$0xff] %v6350_v5  ;;  %4416 = vmatmul.f32.vlgmr.msra.gmra.mxu3 %v7056_v35  ;;  %4466 = vmatpush.xpose.msrb.mxu1 %v4465_v53 }
 0x171   : > { %v7228_v25 = vld.sshfl [vmem:[#allocation1 + $0x28] sm:$0xff pattern:$0x75316420]  ;;  %v5507_v51 = vsel %vm5352_vm0, %v7034_v10, 0.0  ;;  %v7771_v40 = vand.u32 4294901760, %v7221_v2  ;;  %v5798_v30 = vadd.f32 %v5797_v33, %v5796_v16  ;;  %v2766_v23 = vadd.f32 %v2765_v0, %v2742_v17  ;;  %4394 = vmatmul.f32.vlgmr.msra.gmra.mxu2 %v7056_v35  ;;  %4612 = vmatpush.xpose.msra.mxu3 %v4611_v37 }
 0x172   : > { %5715 = vst [vmem:[#allocation1 + $0x20] ss:$2 sm:$0xff] %v6369_v12  ;;  %v5506_v12 = vadd.f32 %v5505_v31, %v5504_v24  ;;  %v7822_v44 = vand.u32 4294901760, %v7104_v46  ;;  %v7251_v5 = vand.u32 4294901760, %v6951_v47  ;;  %v5799_v53 = vsel %vm5352_vm0, %v5721_v11, 0.0  ;;  %4582 = vmatpush.xpose.msra.mxu2 %v7128_v26 }
 0x173   : > { %v4441_v16 = vand.u32 4294901760, %v4440_v58  ;;  %v7824_v24 = vand.u32 4294901760, %v7189_v1  ;;  %v2790_v14 = vadd.f32 %v2789_v48, %v2766_v23  ;;  %v2863_v0 = vpop.f32.mrf.mxu3  ;;  %v5511_v43 = vsel %vm5352_vm0, %v7067_v7, 0.0  ;;  %v7827_v48 = vld [vmem:[#allocation5_spill] sm:$0xff] }
 0x174   : > { %v7245_v39 = vld.sshfl [vmem:[#allocation1 + $0x30] sm:$0xff pattern:$0x75316420]  ;;  %4538 = vmatpush.xpose.msra.mxu0 %v7822_v44  ;;  %v7253_v10 = vld.sshfl [vmem:[#allocation1 + $0x38] sm:$0xff pattern:$0x75316420]  ;;  %v5508_v29 = vadd.f32 %v5507_v51, %v5506_v12  ;;  %v2811_v36 = vpop.f32.mrf.mxu1  ;;  %v2837_v50 = vpop.f32.mrf.mxu2  ;;  %v5800_v11 = vadd.f32 %v5799_v53, %v5798_v30  ;;  %v7284_v12 = vsub.f32 %v6951_v47, %v7251_v5 }
 0x175   : > { %7823 = vst [vmem:[#allocation24_spill] sm:$0xff] %v7253_v10  ;;  %v7262_v35 = vsub.f32 %v7189_v1, %v7824_v24  ;;  %v5894_v33 = vsel %vm5641_vm1, %v7825_v22, 0.0  ;;  %v7826_v37 = vperm.slane %v6803_v38, 1  ;;  %v7280_v58 = vand.u32 4294901760, %v7827_v48  ;;  %v2887_v51 = vpop.f32.mrf.mxu0 }
 0x176   : > { %5717 = vst [vmem:[#allocation1 + $0x30] ss:$2 sm:$0xff] %v6429_v42  ;;  %v7277_v42 = vsub.f32 %v7221_v2, %v7771_v40  ;;  %v5510_v7 = vadd.f32 %v5509_v4, %v5508_v29  ;;  %v2812_v17 = vadd.f32 %v2811_v36, %v2790_v14  ;;  %v5513_v44 = vsel %vm5352_vm0, %v7077_v57, 0.0  ;;  %v5730_v40 = vld.sshfl [vmem:[#allocation1] sm:$0xff pattern:$0x75316420] }
 0x177   : > { %v5895_v31 = vsel %vm5641_vm1, %v7826_v37, 0.0  ;;  %v7828_v24 = vperm.slane %v6803_v38, 2  ;;  %v7829_v53 = vand.u32 4294901760, %v7094_v59  ;;  %4442 = vmatmul.f32.vlgmr.msrb.gmra.mxu0 %v4441_v16  ;;  %v7830_v47 = vand.u32 4294901760, %v7235_v60 }
 0x178   : > { %v5512_v46 = vadd.f32 %v5511_v43, %v5510_v7  ;;  %v5896_v10 = vadd.f32 %v5895_v31, %v5894_v33  ;;  %v2838_v30 = vadd.f32 %v2837_v50, %v2812_v17  ;;  %v5731_v57 = vld.sshfl [vmem:[#allocation1 + $0x8] sm:$0xff pattern:$0x75316420]  ;;  %v7831_v14 = vand.u32 4294901760, %v7163_v54  ;;  %4635 = vmatpush.xpose.msrb.mxu0 %v7167_v15 }
 0x179   : > { %v5722_v23 = vld.sshfl [vmem:[#allocation1 + $0x20] sm:$0xff pattern:$0x75316420]  ;;  %v5897_v22 = vsel %vm5641_vm1, %v7828_v24, 0.0  ;;  %4370 = vmatmul.f32.vlgmr.msra.gmra.mxu1 %v7829_v53  ;;  %v7296_v4 = vsub.f32 %v7235_v60, %v7830_v47  ;;  %v4587_v43 = vand.u32 4294901760, %v7262_v35  ;;  %v7306_v59 = vsub.f32 %v7827_v48, %v7280_v58  ;;  %4492 = vmatmul.f32.vlgmr.msrb.gmra.mxu2 %v7163_v54  ;;  %v7834_v24 = vld [vmem:[#allocation4_spill] sm:$0xff] }
 0x17a   : > { %v5723_v37 = vld.sshfl [vmem:[#allocation1 + $0x28] sm:$0xff pattern:$0x75316420]  ;;  %v5801_v29 = vsel %vm5352_vm0, %v5722_v23, 0.0  ;;  %4516 = vmatmul.f32.vlgmr.msrb.gmra.mxu3 %v7831_v14  ;;  %4560 = vmatpush.xpose.msra.mxu1 %v7075_v34  ;;  %5738 = vst [vmem:[#allocation1] ss:$2 sm:$0xff] %v6358_v8  ;;  %v5514_v54 = vadd.f32 %v5513_v44, %v5512_v46  ;;  %v5898_v7 = vadd.f32 %v5897_v22, %v5896_v10 }
 0x17b   : > { %5728 = vst [vmem:[#allocation1 + $0x20] ss:$2 sm:$0xff] %v6391_v20  ;;  %v5802_v16 = vadd.f32 %v5801_v29, %v5800_v11  ;;  %v5803_v33 = vsel %vm5352_vm0, %v5723_v37, 0.0  ;;  %v2864_v20 = vadd.f32 %v2863_v0, %v2838_v30  ;;  %v4757_v31 = vand.u32 4294901760, %v7277_v42  ;;  %4706 = vmatpush.xpose.msrb.mxu3 %v7128_v26  ;;  %v2957_v23 = vpop.f32.mrf.mxu3  ;;  %v7835_v14 = vld [vmem:[#allocation2_spill] sm:$0xff]  ;;  %v7836_v44 = vld [vmem:[#allocation13_spill] sm:$0xff] }
 0x17c   : > { %v7772_v34 = vand.u32 4294901760, %v7284_v12  ;;  %v7832_v35 = vperm.slane %v6803_v38, 3  ;;  %v7833_v48 = vand.u32 4294901760, %v7167_v15  ;;  %v5732_v0 = vld.sshfl [vmem:[#allocation1 + $0x10] sm:$0xff pattern:$0x75316420]  ;;  %v2911_v53 = vpop.f32.mrf.mxu1  ;;  %v2935_v47 = vpop.f32.mrf.mxu2 }
 0x17d   : > { %v5724_v36 = vld.sshfl [vmem:[#allocation1 + $0x30] sm:$0xff pattern:$0x75316420]  ;;  %v5725_v8 = vld.sshfl [vmem:[#allocation1 + $0x38] sm:$0xff pattern:$0x75316420]  ;;  %v5804_v11 = vadd.f32 %v5803_v33, %v5802_v16  ;;  %v2888_v17 = vadd.f32 %v2887_v51, %v2864_v20  ;;  %v2983_v10 = vpop.f32.mrf.mxu0 }
 0x17e   : > { %v5899_v50 = vsel %vm5641_vm1, %v7832_v35, 0.0  ;;  %4684 = vmatpush.xpose.msrb.mxu2 %v7833_v48  ;;  %5729 = vst [vmem:[#allocation1 + $0x30] ss:$2 sm:$0xff] %v7834_v24  ;;  %v5733_v37 = vld.sshfl [vmem:[#allocation1 + $0x18] sm:$0xff pattern:$0x75316420] }
 0x17f   : > { %v5805_v30 = vsel %vm5352_vm0, %v5724_v36, 0.0  ;;  %v4877_v15 = vand.u32 4294901760, %v7306_v59  ;;  %5739 = vst [vmem:[#allocation1 + $0x10] ss:$2 sm:$0xff] %v7835_v14  ;;  %v5807_v16 = vsel %vm5352_vm0, %v5725_v8, 0.0  ;;  %v2912_v46 = vadd.f32 %v2911_v53, %v2888_v17  ;;  %v7837_v33 = vld [vmem:[#allocation14_spill] sm:$0xff]  ;;  %4540 = vmatmul.f32.vlgmr.msra.gmra.mxu0 %v7125_v63 }
 0x180   : > { %v5806_v35 = vadd.f32 %v5805_v30, %v5804_v11  ;;  %v5809_v51 = vsel %vm5352_vm0, %v5730_v40, 0.0  ;;  %v5515_v22 = vsel %vm5352_vm0, %v7836_v44, 0.0  ;;  %v5517_v20 = vsel %vm5352_vm0, %v7837_v33, 0.0  ;;  %v7838_v53 = vld [vmem:[#allocation15_spill] sm:$0xff]  ;;  %4728 = vmatpush.xpose.msra.mxu0 %v7208_v13 }
 0x181   : > { %v7334_v36 = vsub.f32 %v7284_v12, %v7772_v34  ;;  %v5516_v11 = vadd.f32 %v5515_v22, %v5514_v54  ;;  %v5900_v30 = vadd.f32 %v5899_v50, %v5898_v7  ;;  %v2936_v8 = vadd.f32 %v2935_v47, %v2912_v46  ;;  %4468 = vmatmul.f32.vlgmr.msrb.gmra.mxu1 %v7125_v63 }
 0x182   : > { %v5734_v48 = vld.sshfl [vmem:[#allocation1 + $0x20] sm:$0xff pattern:$0x75316420]  ;;  %v5808_v24 = vadd.f32 %v5807_v16, %v5806_v35  ;;  %v5735_v40 = vld.sshfl [vmem:[#allocation1 + $0x28] sm:$0xff pattern:$0x75316420]  ;;  %4614 = vmatmul.f32.vlgmr.msra.gmra.mxu3 %v7170_v6  ;;  %4658 = vmatpush.xpose.msrb.mxu1 %v7128_v26 }
 0x183   : > { %v5811_v17 = vsel %vm5352_vm0, %v5731_v57, 0.0  ;;  %v5519_v14 = vsel %vm5352_vm0, %v7838_v53, 0.0  ;;  %v7839_v44 = vperm.slane %v6803_v38, 4  ;;  %5740 = vst [vmem:[#allocation1 + $0x20] ss:$2 sm:$0xff] %v6417_v32  ;;  %v5813_v54 = vsel %vm5352_vm0, %v5732_v0, 0.0  ;;  %4588 = vmatmul.f32.vlgmr.msra.gmra.mxu2 %v4587_v43  ;;  %4804 = vmatpush.xpose.msra.mxu3 %v7208_v13 }
 0x184   : > { %v5810_v50 = vadd.f32 %v5809_v51, %v5808_v24  ;;  %v5815_v7 = vsel %vm5352_vm0, %v5733_v37, 0.0  ;;  %v5518_v47 = vadd.f32 %v5517_v20, %v5516_v11  ;;  %v2958_v57 = vadd.f32 %v2957_v23, %v2936_v8  ;;  %v7840_v35 = vld [vmem:[#allocation16_spill] sm:$0xff]  ;;  %4781 = vmatpush.xpose.msra.mxu2 %v7221_v2  ;;  %v7842_v0 = vld [vmem:[#allocation11_spill] sm:$0xff]  ;;  %v3057_v20 = vpop.f32.mrf.mxu3  ;;  %v3009_v8 = vpop.f32.mrf.mxu1 }
 0x185   : > { %v5901_v33 = vsel %vm5641_vm1, %v7839_v44, 0.0  ;;  %v5521_v16 = vsel %vm5352_vm0, %v7840_v35, 0.0  ;;  %v5523_v46 = vsel %vm5352_vm0, %v7107_v27, 0.0  ;;  %v7841_v26 = vperm.slane %v6803_v38, 5  ;;  %v3033_v27 = vpop.f32.mrf.mxu2  ;;  %v3081_v29 = vpop.f32.mrf.mxu0 }
 0x186   : > { %v7360_v37 = vand.u32 4294901760, %v7842_v0  ;;  %v5812_v43 = vadd.f32 %v5811_v17, %v5810_v50  ;;  %v5520_v23 = vadd.f32 %v5519_v14, %v5518_v47  ;;  %v5902_v51 = vadd.f32 %v5901_v33, %v5900_v30  ;;  %v5736_v24 = vld.sshfl [vmem:[#allocation1 + $0x30] sm:$0xff pattern:$0x75316420] }
 0x187   : > { %v5903_v32 = vsel %vm5641_vm1, %v7841_v26, 0.0  ;;  %v2984_v22 = vadd.f32 %v2983_v10, %v2958_v57  ;;  %v5737_v11 = vld.sshfl [vmem:[#allocation1 + $0x38] sm:$0xff pattern:$0x75316420]  ;;  %v4903_v53 = vand.u32 4294901760, %v7334_v36  ;;  %v5817_v35 = vsel %vm5352_vm0, %v5734_v48, 0.0  ;;  %4638 = vmatmul.f32.vlgmr.msrb.gmra.mxu0 %v7189_v1 }
 0x188   : > { %5741 = vst [vmem:[#allocation1 + $0x30] ss:$2 sm:$0xff] %v6479_v45  ;;  %v5814_v44 = vadd.f32 %v5813_v54, %v5812_v43  ;;  %v5522_v26 = vadd.f32 %v5521_v16, %v5520_v23  ;;  %v5819_v17 = vsel %vm5352_vm0, %v5735_v40, 0.0  ;;  %v5525_v10 = vsel %vm5352_vm0, %v7109_v55, 0.0 }
 0x189   : > { %v3010_v34 = vadd.f32 %v3009_v8, %v2984_v22  ;;  %v7843_v30 = vperm.slane %v6803_v38, 6  ;;  %v7373_v36 = vsub.f32 %v7842_v0, %v7360_v37  ;;  %v5904_v50 = vadd.f32 %v5903_v32, %v5902_v51  ;;  %4562 = vmatmul.f32.vlgmr.msra.gmra.mxu1 %v7125_v63  ;;  %v5742_v40 = vld.sshfl [vmem:[#allocation1] sm:$0xff pattern:$0x75316420] }
 0x18a   : > { %v5816_v45 = vadd.f32 %v5815_v7, %v5814_v44  ;;  %v5524_v33 = vadd.f32 %v5523_v46, %v5522_v26  ;;  %v7380_v55 = vsub.f32 %v7306_v59, %v4877_v15  ;;  %v5743_v54 = vld.sshfl [vmem:[#allocation1 + $0x8] sm:$0xff pattern:$0x75316420]  ;;  %4708 = vmatmul.f32.vlgmr.msrb.gmra.mxu3 %v7170_v6  ;;  %4758 = vmatpush.xpose.msra.mxu1 %v4757_v31  ;;  %v5527_v57 = vsel %vm5352_vm0, %v7130_v18, 0.0  ;;  %v7848_v44 = vld [vmem:[#allocation12_spill] sm:$0xff] }
 0x18b   : > { %v5905_v14 = vsel %vm5641_vm1, %v7843_v30, 0.0  ;;  %v3034_v48 = vadd.f32 %v3033_v27, %v3010_v34  ;;  %v7844_v7 = vld [vmem:[#allocation6_spill] sm:$0xff]  ;;  %v7845_v34 = vld [vmem:[#allocation3_spill] sm:$0xff]  ;;  %v7846_v16 = vperm.slane %v6803_v38, 7  ;;  %4686 = vmatmul.f32.vlgmr.msrb.gmra.mxu2 %v7170_v6  ;;  %v7847_v0 = vand.u32 4294901760, %v7221_v2  ;;  %4904 = vmatpush.xpose.msrb.mxu3 %v4903_v53 }
 0x18c   : > { %v7386_v47 = vand.u32 4294901760, %v7844_v7  ;;  %5750 = vst [vmem:[#allocation1] ss:$2 sm:$0xff] %v7845_v34  ;;  %v5818_v63 = vadd.f32 %v5817_v35, %v5816_v45  ;;  %v5821_v42 = vsel %vm5352_vm0, %v5736_v24, 0.0  ;;  %v5823_v31 = vsel %vm5352_vm0, %v5737_v11, 0.0  ;;  %4874 = vmatpush.xpose.msrb.mxu2 %v7251_v5  ;;  %v3155_v6 = vpop.f32.mrf.mxu3  ;;  %v3103_v27 = vpop.f32.mrf.mxu1 }
 0x18d   : > { %v5907_v46 = vsel %vm5641_vm1, %v7846_v16, 0.0  ;;  %v3058_v32 = vadd.f32 %v3057_v20, %v3034_v48  ;;  %4830 = vmatpush.xpose.msrb.mxu0 %v7847_v0  ;;  %v5526_v43 = vadd.f32 %v5525_v10, %v5524_v33  ;;  %v5047_v18 = vand.u32 4294901760, %v7373_v36  ;;  %v5744_v20 = vld.sshfl [vmem:[#allocation1 + $0x10] sm:$0xff pattern:$0x75316420]  ;;  %v3129_v24 = vpop.f32.mrf.mxu2  ;;  %v3179_v26 = vpop.f32.mrf.mxu0 }
 0x18e   : > { %v5820_v23 = vadd.f32 %v5819_v17, %v5818_v63  ;;  %v5529_v38 = vsel %vm5352_vm0, %v7132_v41, 0.0  ;;  %v5906_v51 = vadd.f32 %v5905_v14, %v5904_v50  ;;  %v5745_v2 = vld.sshfl [vmem:[#allocation1 + $0x18] sm:$0xff pattern:$0x75316420]  ;;  %v7405_v11 = vsub.f32 %v7844_v7, %v7386_v47 }
 0x18f   : > { %v3082_v22 = vadd.f32 %v3081_v29, %v3058_v32  ;;  %v5528_v8 = vadd.f32 %v5527_v57, %v5526_v43  ;;  %v7408_v53 = vand.u32 4294901760, %v7848_v44  ;;  %5751 = vst [vmem:[#allocation1 + $0x10] ss:$2 sm:$0xff] %v6388_v19  ;;  %v5531_v41 = vsel %vm5352_vm0, %v7085_v56, 0.0  ;;  %v7852_v32 = vld [vmem:[#allocation8_spill] sm:$0xff] }
 0x190   : > { %v5822_v35 = vadd.f32 %v5821_v42, %v5820_v23  ;;  %v4879_v17 = vand.u32 4294901760, %v7380_v55  ;;  %v5825_v10 = vsel %vm5352_vm0, %v5742_v40, 0.0  ;;  %v5827_v45 = vsel %vm5352_vm0, %v5743_v54, 0.0  ;;  %v5746_v40 = vld.sshfl [vmem:[#allocation1 + $0x20] sm:$0xff pattern:$0x75316420] }
 0x191   : > { %v3104_v29 = vadd.f32 %v3103_v27, %v3082_v22  ;;  %v5530_v30 = vadd.f32 %v5529_v38, %v5528_v8  ;;  %v5533_v33 = vsel %vm5352_vm0, %v7087_v9, 0.0  ;;  %v5908_v50 = vadd.f32 %v5907_v46, %v5906_v51  ;;  %v5747_v34 = vld.sshfl [vmem:[#allocation1 + $0x28] sm:$0xff pattern:$0x75316420]  ;;  %v7855_v23 = vld [vmem:[#allocation17_spill] sm:$0xff] }
 0x192   : > { %v5824_v14 = vadd.f32 %v5823_v31, %v5822_v35  ;;  %v7849_v19 = vand.u32 4294901760, %v7189_v1  ;;  %v7850_v56 = vand.u32 4294901760, %v7296_v4  ;;  %v7425_v7 = vsub.f32 %v7373_v36, %v5047_v18  ;;  %5752 = vst [vmem:[#allocation1 + $0x20] ss:$2 sm:$0xff] %v6438_v52 }
 0x193   : > { %v3130_v48 = vadd.f32 %v3129_v24, %v3104_v29  ;;  %v5532_v63 = vadd.f32 %v5531_v41, %v5530_v30  ;;  %v7851_v54 = vand.u32 4294901760, %v7235_v60  ;;  %v5023_v9 = vand.u32 4294901760, %v7405_v11  ;;  %4784 = vmatmul.f32.vlgmr.msra.gmra.mxu2 %v7235_v60  ;;  %v5748_v52 = vld.sshfl [vmem:[#allocation1 + $0x30] sm:$0xff pattern:$0x75316420] }
 0x194   : > { %4662 = vmatmul.f32.vlgmr.msrb.gmra.mxu1 %v7849_v19  ;;  %4734 = vmatmul.f32.vlgmr.msra.gmra.mxu0 %v7850_v56  ;;  %v7433_v1 = vsub.f32 %v7848_v44, %v7408_v53  ;;  %v5826_v4 = vadd.f32 %v5825_v10, %v5824_v14  ;;  %v5535_v57 = vsel %vm5352_vm0, %v7114_v49, 0.0  ;;  %v5829_v46 = vsel %vm5352_vm0, %v5744_v20, 0.0  ;;  %v3249_v22 = vpop.f32.mrf.mxu3  ;;  %v3203_v44 = vpop.f32.mrf.mxu1 }
 0x195   : > { %4808 = vmatmul.f32.vlgmr.msra.gmra.mxu3 %v7851_v54  ;;  %4852 = vmatpush.xpose.msrb.mxu1 %v7208_v13  ;;  %v3156_v16 = vadd.f32 %v3155_v6, %v3130_v48  ;;  %v5534_v13 = vadd.f32 %v5533_v33, %v5532_v63  ;;  %v7853_v0 = vperm.slane %v7852_v32, 0  ;;  %v7854_v31 = vand.u32 4294901760, %v7284_v12  ;;  %v5749_v6 = vld.sshfl [vmem:[#allocation1 + $0x38] sm:$0xff pattern:$0x75316420]  ;;  %v3227_v35 = vpop.f32.mrf.mxu2  ;;  %v3275_v30 = vpop.f32.mrf.mxu0 }
 0x196   : > { %4927 = vmatpush.xpose.msra.mxu0 %v7284_v12  ;;  %4998 = vmatpush.xpose.msra.mxu3 %v7251_v5  ;;  %v5828_v43 = vadd.f32 %v5827_v45, %v5826_v4  ;;  %v5831_v49 = vsel %vm5352_vm0, %v5745_v2, 0.0  ;;  %v5537_v60 = vsel %vm5352_vm0, %v7855_v23, 0.0  ;;  %v7856_v8 = vperm.slane %v7852_v32, 1  ;;  %5753 = vst [vmem:[#allocation1 + $0x30] ss:$2 sm:$0xff] %v6498_v61 }
 0x197   : > { %v5909_v42 = vsel %vm5641_vm1, %v7853_v0, 0.0  ;;  %4976 = vmatpush.xpose.msra.mxu2 %v7854_v31  ;;  %v3180_v51 = vadd.f32 %v3179_v26, %v3156_v16  ;;  %v5536_v20 = vadd.f32 %v5535_v57, %v5534_v13  ;;  %v7857_v12 = vperm.slane %v7852_v32, 2  ;;  %v7860_v57 = vld [vmem:[#allocation7_spill] sm:$0xff]  ;;  %v5754_v23 = vld.sshfl [vmem:[#allocation1] sm:$0xff pattern:$0x75316420] }
 0x198   : > { %v5910_v38 = vadd.f32 %v5909_v42, %v5908_v50  ;;  %v5911_v27 = vsel %vm5641_vm1, %v7856_v8, 0.0  ;;  %v7459_v2 = vsub.f32 %v7405_v11, %v5023_v9  ;;  %v5830_v41 = vadd.f32 %v5829_v46, %v5828_v43  ;;  %v7861_v46 = vld [vmem:[#allocation22_spill] sm:$0xff] }
 0x199   : > { %v5913_v24 = vsel %vm5641_vm1, %v7857_v12, 0.0  ;;  %v5539_v29 = vsel %vm5352_vm0, %v7177_v3, 0.0  ;;  %v3204_v10 = vadd.f32 %v3203_v44, %v3180_v51  ;;  %v5833_v14 = vsel %vm5352_vm0, %v5746_v40, 0.0 }
 0x19a   : > { %v5912_v26 = vadd.f32 %v5911_v27, %v5910_v38  ;;  %v5538_v45 = vadd.f32 %v5537_v60, %v5536_v20  ;;  %v7858_v33 = vperm.slane %v7852_v32, 3  ;;  %v5193_v48 = vand.u32 4294901760, %v7433_v1 }
 0x19b   : > { %v5832_v19 = vadd.f32 %v5831_v49, %v5830_v41  ;;  %v5541_v61 = vsel %vm5352_vm0, %v7180_v62, 0.0  ;;  %v3228_v63 = vadd.f32 %v3227_v35, %v3204_v10  ;;  %v5835_v3 = vsel %vm5352_vm0, %v5747_v34, 0.0  ;;  %4880 = vmatmul.f32.vlgmr.msrb.gmra.mxu2 %v4879_v17  ;;  %v7863_v17 = vld [vmem:[#allocation23_spill] sm:$0xff]  ;;  %v5755_v35 = vld.sshfl [vmem:[#allocation1 + $0x8] sm:$0xff pattern:$0x75316420] }
 0x19c   : > { %v5915_v50 = vsel %vm5641_vm1, %v7858_v33, 0.0  ;;  %v5914_v56 = vadd.f32 %v5913_v24, %v5912_v26  ;;  %4760 = vmatmul.f32.vlgmr.msra.gmra.mxu1 %v7217_v21  ;;  %4832 = vmatmul.f32.vlgmr.msrb.gmra.mxu0 %v7217_v21  ;;  %v5540_v40 = vadd.f32 %v5539_v29, %v5538_v45  ;;  %v7859_v54 = vperm.slane %v7852_v32, 4  ;;  %v3349_v51 = vpop.f32.mrf.mxu3  ;;  %v3301_v12 = vpop.f32.mrf.mxu1  ;;  %v7865_v29 = vld [vmem:[#allocation18_spill] sm:$0xff] }
 0x19d   : > { %4906 = vmatmul.f32.vlgmr.msrb.gmra.mxu3 %v7280_v58  ;;  %4950 = vmatpush.xpose.msra.mxu1 %v7251_v5  ;;  %v7480_v16 = vand.u32 4294901760, %v7860_v57  ;;  %v5834_v62 = vadd.f32 %v5833_v14, %v5832_v19  ;;  %v5543_v13 = vsel %vm5352_vm0, %v7861_v46, 0.0  ;;  %v3250_v42 = vadd.f32 %v3249_v22, %v3228_v63  ;;  %v3325_v24 = vpop.f32.mrf.mxu2  ;;  %v7867_v63 = vld [vmem:[#allocation19_spill] sm:$0xff] }
 0x19e   : > { %v5917_v4 = vsel %vm5641_vm1, %v7859_v54, 0.0  ;;  %v5916_v0 = vadd.f32 %v5915_v50, %v5914_v56  ;;  %5020 = vmatpush.xpose.msrb.mxu0 %v7360_v37  ;;  %v5837_v34 = vsel %vm5352_vm0, %v5748_v52, 0.0  ;;  %v5542_v31 = vadd.f32 %v5541_v61, %v5540_v40  ;;  %5073 = vmatpush.xpose.msrb.mxu2 %v7373_v36  ;;  %v5756_v61 = vld.sshfl [vmem:[#allocation1 + $0x10] sm:$0xff pattern:$0x75316420] }
 0x19f   : > { %v7862_v43 = vperm.slane %v7852_v32, 5  ;;  %5096 = vmatpush.xpose.msrb.mxu3 %v7360_v37  ;;  %v5194_v49 = vsub.f32 %v7433_v1, %v5193_v48  ;;  %v5836_v55 = vadd.f32 %v5835_v3, %v5834_v62  ;;  %v5545_v60 = vsel %vm5352_vm0, %v7863_v17, 0.0  ;;  %v7868_v62 = vld [vmem:[#allocation9_spill] sm:$0xff] }
 0x1a0   : > { %v5918_v38 = vadd.f32 %v5917_v4, %v5916_v0  ;;  %v3276_v52 = vadd.f32 %v3275_v30, %v3250_v42  ;;  %v5839_v22 = vsel %vm5352_vm0, %v5749_v6, 0.0  ;;  %v5544_v20 = vadd.f32 %v5543_v13, %v5542_v31  ;;  %v3373_v30 = vpop.f32.mrf.mxu0  ;;  %v5757_v0 = vld.sshfl [vmem:[#allocation1 + $0x18] sm:$0xff pattern:$0x75316420] }
 0x1a1   : > { %v5919_v5 = vsel %vm5641_vm1, %v7862_v43, 0.0  ;;  %v7864_v8 = vperm.slane %v7852_v32, 6  ;;  %v5049_v44 = vand.u32 4294901760, %v7425_v7  ;;  %v5838_v41 = vadd.f32 %v5837_v34, %v5836_v55  ;;  %v7870_v34 = vld [vmem:[#allocation20_spill] sm:$0xff] }
 0x1a2   : > { %v5547_v26 = vsel %vm5352_vm0, %v7865_v29, 0.0  ;;  %v5920_v10 = vadd.f32 %v5919_v5, %v5918_v38  ;;  %v3302_v14 = vadd.f32 %v3301_v12, %v3276_v52  ;;  %v5841_v45 = vsel %vm5352_vm0, %v5754_v23, 0.0  ;;  %v5758_v17 = vld.sshfl [vmem:[#allocation1 + $0x20] sm:$0xff pattern:$0x75316420] }
 0x1a3   : > { %v5921_v27 = vsel %vm5641_vm1, %v7864_v8, 0.0  ;;  %v5546_v6 = vadd.f32 %v5545_v60, %v5544_v20  ;;  %v7866_v33 = vperm.slane %v7852_v32, 7  ;;  %v5195_v19 = vand.u32 4294901760, %v5194_v49  ;;  %4978 = vmatmul.f32.vlgmr.msra.gmra.mxu2 %v7280_v58  ;;  %v7872_v38 = vld [vmem:[#allocation21_spill] sm:$0xff] }
 0x1a4   : > { %v5840_v56 = vadd.f32 %v5839_v22, %v5838_v41  ;;  %v5549_v7 = vsel %vm5352_vm0, %v7867_v63, 0.0  ;;  %v5922_v3 = vadd.f32 %v5921_v27, %v5920_v10  ;;  %v3326_v40 = vadd.f32 %v3325_v24, %v3302_v14  ;;  %4854 = vmatmul.f32.vlgmr.msrb.gmra.mxu1 %v7217_v21  ;;  %4930 = vmatmul.f32.vlgmr.msra.gmra.mxu0 %v7306_v59  ;;  %v3395_v27 = vpop.f32.mrf.mxu1  ;;  %v5759_v24 = vld.sshfl [vmem:[#allocation1 + $0x28] sm:$0xff pattern:$0x75316420] }
 0x1a5   : > { %v5923_v50 = vsel %vm5641_vm1, %v7866_v33, 0.0  ;;  %v5843_v54 = vsel %vm5352_vm0, %v5755_v35, 0.0  ;;  %v5548_v4 = vadd.f32 %v5547_v26, %v5546_v6  ;;  %v7869_v46 = vperm.slane %v7868_v62, 0  ;;  %5000 = vmatmul.f32.vlgmr.msra.gmra.mxu3 %v7280_v58  ;;  %5050 = vmatpush.xpose.msrb.mxu1 %v5049_v44  ;;  %v3421_v12 = vpop.f32.mrf.mxu2  ;;  %v5760_v6 = vld.sshfl [vmem:[#allocation1 + $0x30] sm:$0xff pattern:$0x75316420] }
 0x1a6   : > { %v7520_v13 = vsub.f32 %v7860_v57, %v7480_v16  ;;  %v5842_v42 = vadd.f32 %v5841_v45, %v5840_v56  ;;  %v5551_v21 = vsel %vm5352_vm0, %v7870_v34, 0.0  ;;  %v5924_v31 = vadd.f32 %v5923_v50, %v5922_v3  ;;  %5122 = vmatpush.xpose.msra.mxu0 %v5047_v18  ;;  %5166 = vmatpush.xpose.msra.mxu2 %v7408_v53  ;;  %v3447_v18 = vpop.f32.mrf.mxu3  ;;  %v5761_v3 = vld.sshfl [vmem:[#allocation1 + $0x38] sm:$0xff pattern:$0x75316420] }
 0x1a7   : > { %v5925_v32 = vsel %vm5641_vm1, %v7869_v46, 0.0  ;;  %v3350_v43 = vadd.f32 %v3349_v51, %v3326_v40  ;;  %v5845_v5 = vsel %vm5352_vm0, %v5756_v61, 0.0  ;;  %v5550_v49 = vadd.f32 %v5549_v7, %v5548_v4  ;;  %5196 = vmatpush.xpose.msra.mxu3 %v5195_v19 }
 0x1a8   : > { %v7871_v23 = vperm.slane %v7868_v62, 1  ;;  %v5025_v55 = vand.u32 4294901760, %v7459_v2  ;;  %v5844_v60 = vadd.f32 %v5843_v54, %v5842_v42  ;;  %v5553_v58 = vsel %vm5352_vm0, %v7872_v38, 0.0  ;;  %v3471_v26 = vpop.f32.mrf.mxu0 }
 0x1a9   : > { %v5926_v52 = vadd.f32 %v5925_v32, %v5924_v31  ;;  %v3374_v36 = vadd.f32 %v3373_v30, %v3350_v43  ;;  %v5847_v51 = vsel %vm5352_vm0, %v5757_v0, 0.0  ;;  %v5552_v22 = vadd.f32 %v5551_v21, %v5550_v49  ;;  %v7878_v43 = vld [vmem:[#allocation24_spill] sm:$0xff] }
 0x1aa   : > { %v5927_v57 = vsel %vm5641_vm1, %v7871_v23, 0.0  ;;  %v7873_v20 = vperm.slane %v7868_v62, 2  ;;  %v5169_v2 = vand.u32 4294901760, %v7520_v13  ;;  %v5846_v44 = vadd.f32 %v5845_v5, %v5844_v60 }
 0x1ab   : > { %v5555_v35 = vsel %vm5352_vm0, %v7226_v28, 0.0  ;;  %v5928_v41 = vadd.f32 %v5927_v57, %v5926_v52  ;;  %v3396_v29 = vadd.f32 %v3395_v27, %v3374_v36  ;;  %v5849_v10 = vsel %vm5352_vm0, %v5758_v17, 0.0  ;;  %5076 = vmatmul.f32.vlgmr.msrb.gmra.mxu2 %v7405_v11  ;;  %v6247_v57 = vld [vmem:[%s6794_s8] sm:$0xff] }
 0x1ac   : > { %v5929_v8 = vsel %vm5641_vm1, %v7873_v20, 0.0  ;;  %v5554_v14 = vadd.f32 %v5553_v58, %v5552_v22  ;;  %v7874_v30 = vperm.slane %v7868_v62, 3  ;;  %v5848_v33 = vadd.f32 %v5847_v51, %v5846_v44  ;;  %4954 = vmatmul.f32.vlgmr.msra.gmra.mxu1 %v4877_v15  ;;  %5026 = vmatmul.f32.vlgmr.msrb.gmra.mxu0 %v5025_v55  ;;  %v3495_v49 = vpop.f32.mrf.mxu1  ;;  %v7880_v20 = vld [vmem:[#allocation10_spill] sm:$0xff] }
 0x1ad   : > { %v5557_v50 = vsel %vm5352_vm0, %v7228_v25, 0.0  ;;  %v5930_v19 = vadd.f32 %v5929_v8, %v5928_v41  ;;  %v3422_v61 = vadd.f32 %v3421_v12, %v3396_v29  ;;  %v5851_v28 = vsel %vm5352_vm0, %v5759_v24, 0.0  ;;  %5100 = vmatmul.f32.vlgmr.msrb.gmra.mxu3 %v5023_v9  ;;  %5144 = vmatpush.xpose.msra.mxu1 %v7360_v37  ;;  %v3519_v23 = vpop.f32.mrf.mxu2 }
 0x1ae   : > { %v5931_v45 = vsel %vm5641_vm1, %v7874_v30, 0.0  ;;  %v5556_v56 = vadd.f32 %v5555_v35, %v5554_v14  ;;  %v7875_v63 = vperm.slane %v7868_v62, 4  ;;  %v5170_v25 = vsub.f32 %v7520_v13, %v5169_v2  ;;  %5219 = vmatpush.xpose.msrb.mxu0 %v7433_v1  ;;  %5268 = vmatpush.xpose.msrb.mxu2 %v5193_v48  ;;  %v3541_v34 = vpop.f32.mrf.mxu3 }
 0x1af   : > { %v5850_v59 = vadd.f32 %v5849_v10, %v5848_v33  ;;  %v5559_v15 = vsel %vm5352_vm0, %v7245_v39, 0.0  ;;  %v5932_v40 = vadd.f32 %v5931_v45, %v5930_v19  ;;  %v3448_v54 = vadd.f32 %v3447_v18, %v3422_v61  ;;  %5290 = vmatpush.xpose.msrb.mxu3 %v7408_v53 }
 0x1b0   : > { %v5933_v7 = vsel %vm5641_vm1, %v7875_v63, 0.0  ;;  %v5853_v4 = vsel %vm5352_vm0, %v5760_v6, 0.0  ;;  %v5558_v9 = vadd.f32 %v5557_v50, %v5556_v56  ;;  %v7876_v37 = vperm.slane %v7868_v62, 5  ;;  %v3567_v60 = vpop.f32.mrf.mxu0 }
 0x1b1   : > { %v5852_v39 = vadd.f32 %v5851_v28, %v5850_v59  ;;  %v5934_v32 = vadd.f32 %v5933_v7, %v5932_v40  ;;  %v7877_v0 = vperm.slane %v7868_v62, 6  ;;  %v3472_v42 = vadd.f32 %v3471_v26, %v3448_v54 }
 0x1b2   : > { %v5935_v46 = vsel %vm5641_vm1, %v7876_v37, 0.0  ;;  %v5855_v21 = vsel %vm5352_vm0, %v5761_v3, 0.0  ;;  %v5560_v31 = vadd.f32 %v5559_v15, %v5558_v9  ;;  %v5561_v5 = vsel %vm5352_vm0, %v7878_v43, 0.0 }
 0x1b3   : > { %v5937_v11 = vsel %vm5641_vm1, %v7877_v0, 0.0  ;;  %v5854_v1 = vadd.f32 %v5853_v4, %v5852_v39  ;;  %v5936_v48 = vadd.f32 %v5935_v46, %v5934_v32  ;;  %v7578_v55 = vmul.f32 %v6247_v57, %v6247_v57  ;;  %v6248_v39 = vld [vmem:[%s6794_s8 + $0x8] sm:$0xff] }
 0x1b4   : > { %v3496_v17 = vadd.f32 %v3495_v49, %v3472_v42  ;;  %v5171_v38 = vand.u32 4294901760, %v5170_v25  ;;  %v7879_v58 = vperm.slane %v7868_v62, 7  ;;  %v5562_v18 = vadd.f32 %v5561_v5, %v5560_v31  ;;  %5052 = vmatmul.f32.vlgmr.msrb.gmra.mxu1 %v7386_v47  ;;  %5124 = vmatmul.f32.vlgmr.msra.gmra.mxu0 %v7386_v47  ;;  %v3593_v6 = vpop.f32.mrf.mxu1 }
 0x1b5   : > { %v5856_v36 = vadd.f32 %v5855_v21, %v5854_v1  ;;  %v5938_v51 = vadd.f32 %v5937_v11, %v5936_v48  ;;  %v7881_v8 = vperm.slane %v7880_v20, 0  ;;  %5198 = vmatmul.f32.vlgmr.msra.gmra.mxu3 %v7480_v16  ;;  %5242 = vmatpush.xpose.msrb.mxu1 %v7408_v53  ;;  %v5577_v62 = vperm.slane %v7578_v55, 0  ;;  %v3617_v33 = vpop.f32.mrf.mxu2 }
 0x1b6   : > { %v5939_v52 = vsel %vm5641_vm1, %v7879_v58, 0.0  ;;  %v3520_v22 = vadd.f32 %v3519_v23, %v3496_v17  ;;  %5172 = vmatmul.f32.vlgmr.msra.gmra.mxu2 %v5171_v38  ;;  %v7882_v44 = vperm.slane %v7880_v20, 1  ;;  %v5578_v41 = vperm.slane %v7578_v55, 1  ;;  %5563 = vadd.xlane.f32.xlu0 %v5562_v18  ;;  %v3641_v14 = vpop.f32.mrf.mxu3 }
 0x1b7   : > { %v5941_v27 = vsel %vm5641_vm1, %v7881_v8, 0.0  ;;  %v5940_v12 = vadd.f32 %v5939_v52, %v5938_v51  ;;  %5857 = vadd.xlane.f32.xlu1 %v5856_v36  ;;  %v5579_v29 = vperm.slane %v7578_v55, 2  ;;  %v7883_v53 = vperm.slane %v7880_v20, 2 }
 0x1b8   : > { %v3542_v24 = vadd.f32 %v3541_v34, %v3520_v22  ;;  %v5943_v35 = vsel %vm5641_vm1, %v7882_v44, 0.0  ;;  %v5580_v45 = vperm.slane %v7578_v55, 3  ;;  %v7884_v19 = vperm.slane %v7880_v20, 3  ;;  %v3665_v63 = vpop.f32.mrf.mxu0 }
 0x1b9   : > { %v5942_v26 = vadd.f32 %v5941_v27, %v5940_v12  ;;  %v5945_v30 = vsel %vm5641_vm1, %v7883_v53, 0.0  ;;  %v5581_v28 = vperm.slane %v7578_v55, 4  ;;  %v5642_v7 = vsel %vm5641_vm1, %v5577_v62, 0.0 }
 0x1ba   : > { %v3568_v10 = vadd.f32 %v3567_v60, %v3542_v24  ;;  %v5947_v61 = vsel %vm5641_vm1, %v7884_v19, 0.0  ;;  %v5643_v25 = vsel %vm5641_vm1, %v5578_v41, 0.0  ;;  %v5645_v3 = vsel %vm5641_vm1, %v5579_v29, 0.0 }
 0x1bb   : > { %v5944_v50 = vadd.f32 %v5943_v35, %v5942_v26  ;;  %v5644_v15 = vadd.f32 %v5643_v25, %v5642_v7  ;;  %v7885_v54 = vperm.slane %v7880_v20, 4  ;;  %v5582_v9 = vperm.slane %v7578_v55, 5  ;;  %v6249_v25 = vld [vmem:[%s6794_s8 + $0x10] sm:$0xff] }
 0x1bc   : > { %v3594_v56 = vadd.f32 %v3593_v6, %v3568_v10  ;;  %5146 = vmatmul.f32.vlgmr.msra.gmra.mxu1 %v7386_v47  ;;  %5222 = vmatmul.f32.vlgmr.msrb.gmra.mxu0 %v7520_v13  ;;  %v5647_v37 = vsel %vm5641_vm1, %v5580_v45, 0.0  ;;  %v7616_v32 = vmul.f32 %v6248_v39, %v6248_v39  ;;  %v7886_v47 = vperm.slane %v7880_v20, 5  ;;  %v3687_v57 = vpop.f32.mrf.mxu1 }
 0x1bd   : > { %v5946_v59 = vadd.f32 %v5945_v30, %v5944_v50  ;;  %v5949_v4 = vsel %vm5641_vm1, %v7885_v54, 0.0  ;;  %5292 = vmatmul.f32.vlgmr.msrb.gmra.mxu3 %v7480_v16  ;;  %v5646_v0 = vadd.f32 %v5645_v3, %v5644_v15  ;;  %v5583_v34 = vperm.slane %v7578_v55, 6  ;;  %v3713_v17 = vpop.f32.mrf.mxu2 }
 0x1be   : > { %v3618_v40 = vadd.f32 %v3617_v33, %v3594_v56  ;;  %5270 = vmatmul.f32.vlgmr.msrb.gmra.mxu2 %v7480_v16  ;;  %v5951_v42 = vsel %vm5641_vm1, %v7886_v47, 0.0  ;;  %v5649_v21 = vsel %vm5641_vm1, %v5581_v28, 0.0  ;;  %v3739_v49 = vpop.f32.mrf.mxu3  ;;  %v7887_v23 = vperm.slane %v7880_v20, 6 }
 0x1bf   : > { %v5948_v46 = vadd.f32 %v5947_v61, %v5946_v59  ;;  %v5648_v43 = vadd.f32 %v5647_v37, %v5646_v0  ;;  %v5584_v48 = vperm.slane %v7578_v55, 7  ;;  %v5651_v16 = vsel %vm5641_vm1, %v5582_v9, 0.0 }
 0x1c0   : > { %v3642_v11 = vadd.f32 %v3641_v14, %v3618_v40  ;;  %v5953_v1 = vsel %vm5641_vm1, %v7887_v23, 0.0  ;;  %v7888_v52 = vperm.slane %v7880_v20, 7  ;;  %v5585_v18 = vperm.slane %v7616_v32, 0  ;;  %v3763_v22 = vpop.f32.mrf.mxu0 }
 0x1c1   : > { %v5950_v31 = vadd.f32 %v5949_v4, %v5948_v46  ;;  %v5650_v38 = vadd.f32 %v5649_v21, %v5648_v43  ;;  %v5653_v51 = vsel %vm5641_vm1, %v5583_v34, 0.0  ;;  %v5586_v55 = vperm.slane %v7616_v32, 1 }
 0x1c2   : > { %v3666_v5 = vadd.f32 %v3665_v63, %v3642_v11  ;;  %v5955_v36 = vsel %vm5641_vm1, %v7888_v52, 0.0  ;;  %v5655_v62 = vsel %vm5641_vm1, %v5584_v48, 0.0  ;;  %v5587_v35 = vperm.slane %v7616_v32, 2 }
 0x1c3   : > { %v5952_v60 = vadd.f32 %v5951_v42, %v5950_v31  ;;  %v5652_v27 = vadd.f32 %v5651_v16, %v5650_v38  ;;  %v5657_v41 = vsel %vm5641_vm1, %v5585_v18, 0.0  ;;  %v5588_v10 = vperm.slane %v7616_v32, 3 }
 0x1c4   : > { %v3688_v58 = vadd.f32 %v3687_v57, %v3666_v5  ;;  %5246 = vmatmul.f32.vlgmr.msrb.gmra.mxu1 %v5169_v2  ;;  %v5659_v13 = vsel %vm5641_vm1, %v5586_v55, 0.0  ;;  %v3787_v2 = vpop.f32.mrf.mxu1  ;;  %v5589_v45 = vperm.slane %v7616_v32, 4  ;;  %v5661_v6 = vsel %vm5641_vm1, %v5587_v35, 0.0 }
 0x1c5   : > { %v5954_v8 = vadd.f32 %v5953_v1, %v5952_v60  ;;  %v5654_v44 = vadd.f32 %v5653_v51, %v5652_v27  ;;  %v3811_v14 = vpop.f32.mrf.mxu2  ;;  %v5590_v61 = vperm.slane %v7616_v32, 5  ;;  %v5663_v28 = vsel %vm5641_vm1, %v5588_v10, 0.0  ;;  %v6250_v27 = vld [vmem:[%s6794_s8 + $0x18] sm:$0xff] }
 0x1c6   : > { %v3714_v12 = vadd.f32 %v3713_v17, %v3688_v58  ;;  %v3833_v33 = vpop.f32.mrf.mxu3  ;;  %v5571_v3 = vmul.f32 %v6249_v25, %v6249_v25  ;;  %v5591_v59 = vperm.slane %v7616_v32, 6  ;;  %v5665_v15 = vsel %vm5641_vm1, %v5589_v45, 0.0 }
 0x1c7   : > { %v5956_v24 = vadd.f32 %v5955_v36, %v5954_v8  ;;  %v5656_v29 = vadd.f32 %v5655_v62, %v5654_v44  ;;  %v5592_v4 = vperm.slane %v7616_v32, 7  ;;  %v5667_v9 = vsel %vm5641_vm1, %v5590_v61, 0.0 }
 0x1c8   : > { %v3740_v20 = vadd.f32 %v3739_v49, %v3714_v12  ;;  %v3859_v56 = vpop.f32.mrf.mxu0  ;;  %v5593_v11 = vperm.slane %v5571_v3, 0  ;;  %v5669_v47 = vsel %vm5641_vm1, %v5591_v59, 0.0  ;;  %v5594_v34 = vperm.slane %v5571_v3, 1 }
 0x1c9   : > { %5957 = vadd.xlane.f32.xlu1 %v5956_v24  ;;  %v5658_v53 = vadd.f32 %v5657_v41, %v5656_v29  ;;  %v5671_v21 = vsel %vm5641_vm1, %v5592_v4, 0.0  ;;  %v5595_v5 = vperm.slane %v5571_v3, 2  ;;  %v5596_v32 = vperm.slane %v5571_v3, 3 }
 0x1ca   : > { %v3764_v26 = vadd.f32 %v3763_v22, %v3740_v20  ;;  %v5673_v49 = vsel %vm5641_vm1, %v5593_v11, 0.0  ;;  %v5675_v1 = vsel %vm5641_vm1, %v5594_v34, 0.0  ;;  %v5597_v17 = vperm.slane %v5571_v3, 4 }
 0x1cb   : > { %v5660_v50 = vadd.f32 %v5659_v13, %v5658_v53  ;;  %v5677_v60 = vsel %vm5641_vm1, %v5595_v5, 0.0  ;;  %v5598_v18 = vperm.slane %v5571_v3, 5  ;;  %v5679_v51 = vsel %vm5641_vm1, %v5596_v32, 0.0 }
 0x1cc   : > { %v3788_v30 = vadd.f32 %v3787_v2, %v3764_v26  ;;  %v3885_v37 = vpop.f32.mrf.mxu1  ;;  %v5572_v12 = vmul.f32 %v6250_v27, %v6250_v27  ;;  %v5599_v55 = vperm.slane %v5571_v3, 6  ;;  %v5681_v62 = vsel %vm5641_vm1, %v5597_v17, 0.0 }
 0x1cd   : > { %v5662_v63 = vadd.f32 %v5661_v6, %v5660_v50  ;;  %v3909_v46 = vpop.f32.mrf.mxu2  ;;  %v5600_v20 = vperm.slane %v5571_v3, 7  ;;  %v5683_v35 = vsel %vm5641_vm1, %v5598_v18, 0.0 }
 0x1ce   : > { %v3812_v19 = vadd.f32 %v3811_v14, %v3788_v30  ;;  %v3933_v16 = vpop.f32.mrf.mxu3  ;;  %v5601_v13 = vperm.slane %v5572_v12, 0  ;;  %v5685_v2 = vsel %vm5641_vm1, %v5599_v55, 0.0  ;;  %v5602_v6 = vperm.slane %v5572_v12, 1 }
 0x1cf   : > { %v5664_v40 = vadd.f32 %v5663_v28, %v5662_v63  ;;  %v5603_v61 = vperm.slane %v5572_v12, 2  ;;  %v5607_v34 = vperm.slane %v5572_v12, 6  ;;  %v5608_v5 = vperm.slane %v5572_v12, 7 }
 0x1d0   : > { %v3834_v7 = vadd.f32 %v3833_v33, %v3812_v19  ;;  %v3957_v57 = vpop.f32.mrf.mxu0  ;;  %v5687_v33 = vsel %vm5641_vm1, %v5600_v20, 0.0  ;;  %v5689_v28 = vsel %vm5641_vm1, %v5601_v13, 0.0  ;;  %v5691_v25 = vsel %vm5641_vm1, %v5602_v6, 0.0 }
 0x1d1   : > { %v5666_v39 = vadd.f32 %v5665_v15, %v5664_v40  ;;  %v5693_v4 = vsel %vm5641_vm1, %v5603_v61, 0.0 }
 0x1d2   : > { %v3860_v54 = vadd.f32 %v3859_v56, %v3834_v7  ;;  %v5604_v7 = vperm.slane %v5572_v12, 3 }
 0x1d3   : > { %v5668_v42 = vadd.f32 %v5667_v9, %v5666_v39 }
 0x1d4   : > { %v3886_v0 = vadd.f32 %v3885_v37, %v3860_v54  ;;  %v3979_v58 = vpop.f32.mrf.mxu1  ;;  %v5605_v54 = vperm.slane %v5572_v12, 4  ;;  %v5695_v11 = vsel %vm5641_vm1, %v5604_v7, 0.0 }
 0x1d5   : > { %v5670_v31 = vadd.f32 %v5669_v47, %v5668_v42  ;;  %v4005_v52 = vpop.f32.mrf.mxu2 }
 0x1d6   : > { %v3910_v43 = vadd.f32 %v3909_v46, %v3886_v0  ;;  %v4031_v26 = vpop.f32.mrf.mxu3  ;;  %v5606_v0 = vperm.slane %v5572_v12, 5 }
 0x1d7   : > { %v5672_v23 = vadd.f32 %v5671_v21, %v5670_v31  ;;  %v5697_v21 = vsel %vm5641_vm1, %v5605_v54, 0.0 }
 0x1d8   : > { %v3934_v38 = vadd.f32 %v3933_v16, %v3910_v43  ;;  %v4055_v10 = vpop.f32.mrf.mxu0  ;;  %v5701_v16 = vsel %vm5641_vm1, %v5607_v34, 0.0 }
 0x1d9   : > { %v5674_v48 = vadd.f32 %v5673_v49, %v5672_v23  ;;  %v5699_v49 = vsel %vm5641_vm1, %v5606_v0, 0.0 }
 0x1da   : > { %v3958_v22 = vadd.f32 %v3957_v57, %v3934_v38 }
 0x1db   : > { %v5676_v36 = vadd.f32 %v5675_v1, %v5674_v48 }
 0x1dc   : > { %v3980_v24 = vadd.f32 %v3979_v58, %v3958_v22  ;;  %v4079_v53 = vpop.f32.mrf.mxu1  ;;  %v5703_v58 = vsel %vm5641_vm1, %v5608_v5, 0.0 }
 0x1dd   : > { %v5678_v8 = vadd.f32 %v5677_v60, %v5676_v36  ;;  %v4103_v30 = vpop.f32.mrf.mxu2 }
 0x1de   : > { %v4006_v41 = vadd.f32 %v4005_v52, %v3980_v24  ;;  %v4125_v15 = vpop.f32.mrf.mxu3 }
 0x1df   : > { %v5680_v44 = vadd.f32 %v5679_v51, %v5678_v8 }
 0x1e0   : > { %v4032_v14 = vadd.f32 %v4031_v26, %v4006_v41  ;;  %v4151_v40 = vpop.f32.mrf.mxu0 }
 0x1e1   : > { %v5682_v29 = vadd.f32 %v5681_v62, %v5680_v44 }
 0x1e2   : > { %v4056_v50 = vadd.f32 %v4055_v10, %v4032_v14 }
 0x1e3   : > { %v5684_v45 = vadd.f32 %v5683_v35, %v5682_v29 }
 0x1e4   : > { %v4080_v56 = vadd.f32 %v4079_v53, %v4056_v50  ;;  %v4177_v37 = vpop.f32.mrf.mxu1 }
 0x1e5   : > { %v5686_v19 = vadd.f32 %v5685_v2, %v5684_v45  ;;  %v4201_v46 = vpop.f32.mrf.mxu2 }
 0x1e6   : > { %v4104_v3 = vadd.f32 %v4103_v30, %v4080_v56  ;;  %v4225_v1 = vpop.f32.mrf.mxu3 }
 0x1e7   : > { %v5688_v63 = vadd.f32 %v5687_v33, %v5686_v19 }
 0x1e8   : > { %v4126_v9 = vadd.f32 %v4125_v15, %v4104_v3  ;;  %v4249_v48 = vpop.f32.mrf.mxu0 }
 0x1e9   : > { %v5690_v59 = vadd.f32 %v5689_v28, %v5688_v63 }
 0x1ea   : > { %v4152_v47 = vadd.f32 %v4151_v40, %v4126_v9 }
 0x1eb   : > { %v5692_v39 = vadd.f32 %v5691_v25, %v5690_v59 }
 0x1ec   : > { %v4178_v31 = vadd.f32 %v4177_v37, %v4152_v47  ;;  %v4271_v17 = vpop.f32.mrf.mxu1 }
 0x1ed   : > { %v5694_v42 = vadd.f32 %v5693_v4, %v5692_v39  ;;  %v4297_v60 = vpop.f32.mrf.mxu2 }
 0x1ee   : > { %v4202_v23 = vadd.f32 %v4201_v46, %v4178_v31  ;;  %v4323_v8 = vpop.f32.mrf.mxu3  ;;  %v6275_v31 = vmov 0.0  }
 0x1ef   : > { %v5696_v43 = vadd.f32 %v5695_v11, %v5694_v42  ;;  %417 = vst.msk [vmem:[%s7674_s12] sm:$0xf] %vm415_vm2, %v6275_v31 }
 0x1f0   : > { %v4226_v57 = vadd.f32 %v4225_v1, %v4202_v23  ;;  %v4347_v27 = vpop.f32.mrf.mxu0  ;;  %416 = vst.msk [vmem:[%s7679_s15] sm:$0xf] %vm415_vm2, %v6275_v31 }
 0x1f1   : > { %v5698_v32 = vadd.f32 %v5697_v21, %v5696_v43  ;;  %414 = vst.msk [vmem:[%s7688_s18] sm:$0xf] %vm413_vm3, %v6275_v31 }
 0x1f2   : > { %v4250_v52 = vadd.f32 %v4249_v48, %v4226_v57  ;;  %420 = vst.msk [vmem:[%s408_s25] sm:$0x1] %vm418_vm4, %v6275_v31 }
 0x1f3   : > { %v5700_v38 = vadd.f32 %v5699_v49, %v5698_v32  ;;  %419 = vst.msk [vmem:[%s7704_s28] sm:$0x1] %vm418_vm4, %v6275_v31 }
 0x1f4   : > { %v4272_v18 = vadd.f32 %v4271_v17, %v4250_v52 }
 0x1f5   : > { %v5702_v36 = vadd.f32 %v5701_v16, %v5700_v38  ;;  %v4395_v62 = vpop.f32.mrf.mxu2 }
 0x1f6   : > { %v4298_v22 = vadd.f32 %v4297_v60, %v4272_v18  ;;  %v4371_v55 = vpop.f32.mrf.mxu1  ;;  %v4417_v35 = vpop.f32.mrf.mxu3  ;;  %v5710_v57 = vld [vmem:[%s7674_s12] sm:$0xf] }
 0x1f7   : > { %v5704_v51 = vadd.f32 %v5703_v58, %v5702_v36  ;;  %v5299_v60 = vld [vmem:[%s7679_s15] sm:$0xf] }
 0x1f8   : > { %v4324_v12 = vadd.f32 %v4323_v8, %v4298_v22  ;;  %v4443_v41 = vpop.f32.mrf.mxu0 }
 0x1f9   : > { %5705 = vadd.xlane.f32.xlu0 %v5704_v51 }
 0x1fa   : > { %v4348_v24 = vadd.f32 %v4347_v27, %v4324_v12 }
 0x1fc   : > { %v4372_v44 = vadd.f32 %v4371_v55, %v4348_v24 }
 0x1fd   : > { %v4493_v10 = vpop.f32.mrf.mxu2 }
 0x1fe   : > { %v4396_v20 = vadd.f32 %v4395_v62, %v4372_v44  ;;  %v4469_v26 = vpop.f32.mrf.mxu1  ;;  %v4517_v53 = vpop.f32.mrf.mxu3 }
 0x200   : > { %v4418_v29 = vadd.f32 %v4417_v35, %v4396_v20  ;;  %v4541_v30 = vpop.f32.mrf.mxu0 }
 0x202   : > { %v4444_v13 = vadd.f32 %v4443_v41, %v4418_v29  ;;  %v5861_v41 = vld [vmem:[%s408_s25] sm:$0x1] }
 0x204   : > { %v4470_v2 = vadd.f32 %v4469_v26, %v4444_v13 }
 0x206   : > { %v4494_v14 = vadd.f32 %v4493_v10, %v4470_v2  ;;  %v4563_v6 = vpop.f32.mrf.mxu1  ;;  %v4589_v33 = vpop.f32.mrf.mxu2 }
 0x207   : > { %v4615_v28 = vpop.f32.mrf.mxu3 }
 0x208   : > { %v4518_v45 = vadd.f32 %v4517_v53, %v4494_v14  ;;  %v4639_v56 = vpop.f32.mrf.mxu0 }
 0x20a   : > { %v4542_v50 = vadd.f32 %v4541_v30, %v4518_v45 }
 0x20c   : > { %v4564_v19 = vadd.f32 %v4563_v6, %v4542_v50 }
 0x20e   : > { %v4590_v61 = vadd.f32 %v4589_v33, %v4564_v19  ;;  %v4687_v25 = vpop.f32.mrf.mxu2 }
 0x20f   : > { %v4709_v40 = vpop.f32.mrf.mxu3 }
 0x210   : > { %v4616_v63 = vadd.f32 %v4615_v28, %v4590_v61 }
 0x211   : > { %v4663_v7 = vpop.f32.mrf.mxu1  ;;  %v4735_v54 = vpop.f32.mrf.mxu0 }
 0x212   : > { %v4640_v3 = vadd.f32 %v4639_v56, %v4616_v63  ;;  %v441_v63 = vld [vmem:[%s7688_s18] sm:$0xf] }
 0x214   : > { %v4664_v59 = vadd.f32 %v4663_v7, %v4640_v3 }
 0x216   : > { %v4688_v15 = vadd.f32 %v4687_v25, %v4664_v59  ;;  %v4785_v37 = vpop.f32.mrf.mxu2  ;;  %v5568_v59 = vld [vmem:[%s7704_s28] sm:$0x1] }
 0x218   : > { %v4710_v4 = vadd.f32 %v4709_v40, %v4688_v15  ;;  %v4809_v11 = vpop.f32.mrf.mxu3 }
 0x219   : > { %v4761_v9 = vpop.f32.mrf.mxu1  ;;  %v4833_v47 = vpop.f32.mrf.mxu0 }
 0x21a   : > { %v4736_v46 = vadd.f32 %v4735_v54, %v4710_v4 }
 0x21c   : > { %v4762_v39 = vadd.f32 %v4761_v9, %v4736_v46 }
 0x21e   : > { %v4786_v0 = vadd.f32 %v4785_v37, %v4762_v39  ;;  %v4881_v21 = vpop.f32.mrf.mxu2 }
 0x220   : > { %v4810_v42 = vadd.f32 %v4809_v11, %v4786_v0  ;;  %v4907_v23 = vpop.f32.mrf.mxu3 }
 0x221   : > { %v4855_v34 = vpop.f32.mrf.mxu1  ;;  %v4931_v32 = vpop.f32.mrf.mxu0 }
 0x222   : > { %v4834_v43 = vadd.f32 %v4833_v47, %v4810_v42 }
 0x224   : > { %v4856_v5 = vadd.f32 %v4855_v34, %v4834_v43 }
 0x226   : > { %v4882_v49 = vadd.f32 %v4881_v21, %v4856_v5  ;;  %v4979_v16 = vpop.f32.mrf.mxu2 }
 0x228   : > { %v4908_v1 = vadd.f32 %v4907_v23, %v4882_v49  ;;  %v5001_v22 = vpop.f32.mrf.mxu3 }
 0x229   : > { %v4955_v48 = vpop.f32.mrf.mxu1  ;;  %v5564_v38 = vpop.xlane.xlu0 %5563 }
 0x22a   : > { %v5858_v17 = vpop.xlane.xlu1 %5857  ;;  %v4932_v58 = vadd.f32 %v4931_v32, %v4908_v1  ;;  %v5565_v36 = vadd.f32 %v5564_v38, %v5299_v60  ;;  %v5027_v8 = vpop.f32.mrf.mxu0 }
 0x22b   : > { %v5859_v52 = vadd.f32 %v5858_v17, %v5710_v57 }
 0x22c   : > { %v4956_v18 = vadd.f32 %v4955_v48, %v4932_v58  ;;  %5567 = vst.msk [vmem:[%s7679_s15] sm:$0xf] %vm415_vm2, %v5565_v36 }
 0x22d   : > { %5860 = vst.msk [vmem:[%s7674_s12] sm:$0xf] %vm415_vm2, %v5859_v52 }
 0x22e   : > { %v4980_v51 = vadd.f32 %v4979_v16, %v4956_v18  ;;  %v5077_v55 = vpop.f32.mrf.mxu2 }
 0x230   : > { %v5002_v27 = vadd.f32 %v5001_v22, %v4980_v51  ;;  %v5101_v20 = vpop.f32.mrf.mxu3 }
 0x231   : > { %v5053_v12 = vpop.f32.mrf.mxu1 }
 0x232   : > { %v5028_v62 = vadd.f32 %v5027_v8, %v5002_v27  ;;  %v5125_v35 = vpop.f32.mrf.mxu0 }
 0x234   : > { %v5054_v24 = vadd.f32 %v5053_v12, %v5028_v62 }
 0x236   : > { %v5078_v44 = vadd.f32 %v5077_v55, %v5054_v24 }
 0x238   : > { %v5102_v29 = vadd.f32 %v5101_v20, %v5078_v44  ;;  %v5199_v45 = vpop.f32.mrf.mxu3 }
 0x239   : > { %v5147_v26 = vpop.f32.mrf.mxu1  ;;  %v5173_v10 = vpop.f32.mrf.mxu2 }
 0x23a   : > { %v5126_v2 = vadd.f32 %v5125_v35, %v5102_v29  ;;  %v5223_v6 = vpop.f32.mrf.mxu0 }
 0x23c   : > { %v5958_v13 = vpop.xlane.xlu1 %5957  ;;  %v5148_v53 = vadd.f32 %v5147_v26, %v5126_v2 }
 0x23d   : > { %v5959_v14 = vadd.f32 %v5958_v13, %v5861_v41 }
 0x23e   : > { %v5174_v30 = vadd.f32 %v5173_v10, %v5148_v53 }
 0x23f   : > { %5960 = vst.msk [vmem:[%s408_s25] sm:$0x1] %vm418_vm4, %v5959_v14 }
 0x240   : > { %v5200_v33 = vadd.f32 %v5199_v45, %v5174_v30  ;;  %v5293_v7 = vpop.f32.mrf.mxu3 }
 0x241   : > { %v5247_v50 = vpop.f32.mrf.mxu1  ;;  %v5271_v61 = vpop.f32.mrf.mxu2 }
 0x242   : > { %v5224_v19 = vadd.f32 %v5223_v6, %v5200_v33 }
 0x244   : > { %v5248_v28 = vadd.f32 %v5247_v50, %v5224_v19 }
 0x246   : > { %v5272_v56 = vadd.f32 %v5271_v61, %v5248_v28 }
 0x248   : > { %v5294_v25 = vadd.f32 %v5293_v7, %v5272_v56 }
 0x24a   : > { %v5296_v3 = vadd.f32 %v5294_v25, %v441_v63 }
 0x24c   : > { %5298 = vst.msk [vmem:[%s7688_s18] sm:$0xf] %vm413_vm3, %v5296_v3 }
 0x26c   : > { %v5706_v15 = vpop.xlane.xlu0 %5705 }
 0x26d   : > { %v5707_v40 = vadd.f32 %v5706_v15, %v5568_v59 }
 0x26f   : > { %5709 = vst.msk [vmem:[%s7704_s28] sm:$0x1] %vm418_vm4, %v5707_v40 }
 0x270 PF: > { %s17_s23 = sadd.s32 1, %s6273_s23   ;;  %s7889_s21 = smov %s6269_s22 }
 0x271   : > { %p14_p5 = scmp.ge.s32.totalorder %s17_s23, 4   ;;  %s7890_s22 = smov %s7892_s24 }
 0x273   :  { %16 = sbr.rel (!%p14_p5) target bundleno = 2 (0x2), region = 125 }

</bundles_post_ra>
